<compile_context>
chip_gen: v6e
topology: v6e:2x2x1
jax: 0.10.0
libtpu: 0.0.40
codegen_flags: <defaults>
</compile_context>

<pallas_src>
import functools

import jax
import jax.numpy as jnp
from jax.experimental import pallas as pl
from jax.experimental.pallas import tpu as pltpu

# ---------------- model hyper-parameters (small, consistent with T5Config) ----
B = 2          # batch
SQ = 8         # query (decoder) sequence length
SK = 16        # key/value (encoder) sequence length
D_MODEL = 32   # config.d_model
N_HEADS = 4    # config.num_heads
D_KV = 8       # config.d_kv
INNER = N_HEADS * D_KV   # = 32
LN_EPS = 1e-6  # config.layer_norm_epsilon

_HI = jax.lax.Precision.HIGHEST


def _cross_attn_kernel(h_ref, kv_ref, wq_ref, wkv_ref, wo_ref, out_ref, *,
                       n_heads, d_kv, eps):
    """One grid step == one batch element. All tensors are tiny and VMEM-resident.

    h_ref   : (SQ, D)          hidden states (residual + LN input)
    kv_ref  : (SK, D)          encoder states
    wq_ref  : (H, D, d_kv)     per-head Q weight, T5LayerNorm weight pre-folded
    wkv_ref : (2H, D, d_kv)    per-head K weights stacked over per-head V weights
    wo_ref  : (H, d_kv, D)     per-head output-projection slices of Wo
    out_ref : (SQ, D)          layer output (aliased with the hidden-states input)
    """
    sq, d_model = h_ref.shape
    sk = kv_ref.shape[0]

    h = h_ref[...].astype(jnp.float32)           # (SQ, D)
    kv = kv_ref[...].astype(jnp.float32)         # (SK, D)

    # ---- T5LayerNorm (RMS norm, fp32). LN weight is folded into wq_ref. ----
    variance = jnp.mean(h * h, axis=-1, keepdims=True)
    normed = h * jax.lax.rsqrt(variance + eps)   # (SQ, D)

    # ---- head-batched projections (single leading batch dim = head index). ----
    # Broadcasting the activations over heads keeps total MXU FLOPs identical to
    # one fused (rows, D) @ (D, INNER) matmul while avoiding lane-dim head slices.
    normed_h = jnp.broadcast_to(normed[None], (n_heads, sq, d_model))      # (H, SQ, D)
    kv_h = jnp.broadcast_to(kv[None], (2 * n_heads, sk, d_model))          # (2H, SK, D)

    q_h = jnp.einsum('hqd,hde->hqe', normed_h, wq_ref[...],
                     precision=_HI, preferred_element_type=jnp.float32)    # (H, SQ, d_kv)
    kvp = jnp.einsum('hkd,hde->hke', kv_h, wkv_ref[...],
                     precision=_HI, preferred_element_type=jnp.float32)    # (2H, SK, d_kv)
    k_h = kvp[:n_heads]                                                    # (H, SK, d_kv)
    v_h = kvp[n_heads:]                                                    # (H, SK, d_kv)

    # ---- attention scores + fp32 softmax (T5: no scaling, zero position bias) ----
    scores = jnp.einsum('hqe,hke->hqk', q_h, k_h,
                        precision=_HI, preferred_element_type=jnp.float32)  # (H, SQ, SK)
    scores = scores - jnp.max(scores, axis=-1, keepdims=True)
    p = jnp.exp(scores)
    p = p / jnp.sum(p, axis=-1, keepdims=True)    # exact reciprocal (EUP slack anyway)

    # ---- context + per-head output projection, summed over heads (== full Wo) ----
    ctx = jnp.einsum('hqk,hke->hqe', p, v_h,
                     precision=_HI, preferred_element_type=jnp.float32)     # (H, SQ, d_kv)
    proj = jnp.einsum('hqe,hem->hqm', ctx, wo_ref[...],
                      precision=_HI, preferred_element_type=jnp.float32)    # (H, SQ, D)

    out = h + jnp.sum(proj, axis=0)               # residual, (SQ, D)
    out_ref[...] = out.astype(out_ref.dtype)


def prepare_params(wq, wk, wv, wo, ln_weight):
    """One-time (init-time) weight preparation — NOT per forward call.

    * Fold the T5LayerNorm weight into Wq (the normed activations feed only Q here).
    * Split projection weights per head and stack K over V so the kernel does one
      head-batched K/V einsum and slices heads along the cheap leading axis.
    """
    d, inner = wq.shape
    wq_h = (ln_weight.reshape(d, 1) * wq).reshape(d, N_HEADS, D_KV).transpose(1, 0, 2)
    wk_h = wk.reshape(d, N_HEADS, D_KV).transpose(1, 0, 2)       # (H, D, d_kv)
    wv_h = wv.reshape(d, N_HEADS, D_KV).transpose(1, 0, 2)       # (H, D, d_kv)
    wkv_h = jnp.concatenate([wk_h, wv_h], axis=0)                # (2H, D, d_kv)
    wo_h = wo.reshape(N_HEADS, D_KV, d)                          # (H, d_kv, D)
    return wq_h, wkv_h, wo_h


def t5_cross_attention(hidden_states, key_value_states, wq_h, wkv_h, wo_h):
    """hidden_states: (B, SQ, D); key_value_states: (B, SK, D); prepared weights."""
    b, sq, d = hidden_states.shape
    sk = key_value_states.shape[1]
    n_heads, _, d_kv = wq_h.shape

    # Wrapper-side (metadata-only) flattening; the kernel works on 2-D row slabs.
    h2 = hidden_states.reshape(b * sq, d)
    kv2 = key_value_states.reshape(b * sk, d)

    kernel = functools.partial(_cross_attn_kernel,
                               n_heads=n_heads, d_kv=d_kv, eps=LN_EPS)

    out2 = pl.pallas_call(
        kernel,
        out_shape=jax.ShapeDtypeStruct((b * sq, d), hidden_states.dtype),
        grid_spec=pltpu.PrefetchScalarGridSpec(
            num_scalar_prefetch=0,
            grid=(b,),  # one batch element per step; "parallel" -> 2 TCs on v7x
            in_specs=[
                pl.BlockSpec((sq, d), lambda i: (i, 0)),                # hidden rows
                pl.BlockSpec((sk, d), lambda i: (i, 0)),                # kv rows
                pl.BlockSpec((n_heads, d, d_kv), lambda i: (0, 0, 0)),  # Wq (LN folded)
                pl.BlockSpec((2 * n_heads, d, d_kv), lambda i: (0, 0, 0)),  # Wk|Wv
                pl.BlockSpec((n_heads, d_kv, d), lambda i: (0, 0, 0)),  # Wo per head
            ],
            out_specs=pl.BlockSpec((sq, d), lambda i: (i, 0)),
        ),
        compiler_params=pltpu.CompilerParams(dimension_semantics=("parallel",)),
        input_output_aliases={0: 0},  # residual input reused as the output buffer
    )(h2, kv2, wq_h, wkv_h, wo_h)

    return out2.reshape(b, sq, d)


def _reference(hidden_states, key_value_states, wq, wk, wv, wo, ln_weight):
    """Pure-JAX reference mirroring the PyTorch forward (eval mode, no mask)."""
    h32 = hidden_states.astype(jnp.float32)
    var = jnp.mean(h32 * h32, axis=-1, keepdims=True)
    normed = h32 * jax.lax.rsqrt(var + LN_EPS) * ln_weight[0]
    q = jnp.einsum('bsd,de->bse', normed, wq, precision=_HI)
    k = jnp.einsum('bsd,de->bse', key_value_states, wk, precision=_HI)
    v = jnp.einsum('bsd,de->bse', key_value_states, wv, precision=_HI)

    def split(x):
        return x.reshape(x.shape[0], x.shape[1], N_HEADS, D_KV).transpose(0, 2, 1, 3)

    qh, kh, vh = split(q), split(k), split(v)
    scores = jnp.einsum("bhqd,bhkd->bhqk", qh, kh, precision=_HI)
    attn = jax.nn.softmax(scores, axis=-1)
    out = jnp.einsum("bhqk,bhkd->bhqd", attn, vh, precision=_HI)
    out = out.transpose(0, 2, 1, 3).reshape(hidden_states.shape[0], -1, INNER)
    return hidden_states + jnp.einsum('bse,ed->bsd', out, wo, precision=_HI)


if __name__ == "__main__":
    key = jax.random.PRNGKey(0)
    k_h, k_kv, k_q, k_k, k_v, k_o, k_ln = jax.random.split(key, 7)

    hidden_states = jax.random.normal(k_h, (B, SQ, D_MODEL), dtype=jnp.float32)
    key_value_states = jax.random.normal(k_kv, (B, SK, D_MODEL), dtype=jnp.float32)

    # Deterministic synthetic parameters (shapes from MyT5Attention / T5LayerNorm).
    scale = 1.0 / jnp.sqrt(jnp.float32(D_MODEL))
    wq = jax.random.normal(k_q, (D_MODEL, INNER), dtype=jnp.float32) * scale
    wk = jax.random.normal(k_k, (D_MODEL, INNER), dtype=jnp.float32) * scale
    wv = jax.random.normal(k_v, (D_MODEL, INNER), dtype=jnp.float32) * scale
    wo = jax.random.normal(k_o, (INNER, D_MODEL), dtype=jnp.float32) * scale
    ln_weight = (1.0 + 0.1 * jax.random.normal(k_ln, (1, D_MODEL), dtype=jnp.float32))

    # One-time weight preparation (init-time, not per forward call).
    wq_h, wkv_h, wo_h = prepare_params(wq, wk, wv, wo, ln_weight)

    out = t5_cross_attention(hidden_states, key_value_states, wq_h, wkv_h, wo_h)
    out = jax.block_until_ready(out)

    ref = _reference(hidden_states, key_value_states, wq, wk, wv, wo, ln_weight)
    assert out.shape == (B, SQ, D_MODEL)
    # Exact softmax + HIGHEST-precision matmuls on both sides -> tight tolerance.
    assert jnp.allclose(out, ref, atol=1e-4, rtol=1e-4), "mismatch vs JAX reference"

    # TODO(synk): attention_mask, relative position bias, past_key_value caching,
    # layer_head_mask and dropout(training=True) branches are not exercised
    # (module defaults / eval mode).
    print("KERNEL_OK")
</pallas_src>

<mosaic_0001>
module attributes {stable_mosaic.version = 11 : i64} {
  func.func @_cross_attn_kernel(%arg0: i32, %arg1: memref<8x32xf32, #tpu.memory_space<vmem>>, %arg2: memref<16x32xf32, #tpu.memory_space<vmem>>, %arg3: memref<4x32x8xf32, #tpu.memory_space<vmem>>, %arg4: memref<8x32x8xf32, #tpu.memory_space<vmem>>, %arg5: memref<4x8x32xf32, #tpu.memory_space<vmem>>, %arg6: memref<8x32xf32, #tpu.memory_space<vmem>>) attributes {dimension_semantics = [#tpu.dimension_semantics<parallel>], iteration_bounds = array<i64: 2>, scalar_prefetch = 0 : i64, scratch_operands = 0 : i64, tpu.core_type = #tpu.core_type<tc>, window_params = [{transform_indices = @transform_0, window_bounds = array<i64: 8, 32>}, {transform_indices = @transform_1, window_bounds = array<i64: 16, 32>}, {pipeline_mode = #tpu.pipeline_mode<synchronous>, transform_indices = @transform_2, window_bounds = array<i64: 4, 32, 8>}, {pipeline_mode = #tpu.pipeline_mode<synchronous>, transform_indices = @transform_3, window_bounds = array<i64: 8, 32, 8>}, {pipeline_mode = #tpu.pipeline_mode<synchronous>, transform_indices = @transform_4, window_bounds = array<i64: 4, 8, 32>}, {transform_indices = @transform_5, window_bounds = array<i64: 8, 32>}]} {
    %c0 = arith.constant 0 : index
    %c0_0 = arith.constant 0 : index
    %0 = vector.load %arg1[%c0, %c0_0] : memref<8x32xf32, #tpu.memory_space<vmem>>, vector<8x32xf32>
    %c0_1 = arith.constant 0 : index
    %c0_2 = arith.constant 0 : index
    %1 = vector.load %arg2[%c0_1, %c0_2] : memref<16x32xf32, #tpu.memory_space<vmem>>, vector<16x32xf32>
    %2 = arith.mulf %0, %0 : vector<8x32xf32>
    %cst = arith.constant dense<0.000000e+00> : vector<8xf32>
    %3 = vector.multi_reduction <add>, %2, %cst [1] : vector<8x32xf32> to vector<8xf32>
    %4 = vector.shape_cast %3 : vector<8xf32> to vector<8x1xf32>
    %cst_3 = arith.constant 3.200000e+01 : f32
    %5 = vector.broadcast %cst_3 : f32 to vector<8x1xf32>
    %6 = arith.divf %4, %5 : vector<8x1xf32>
    %cst_4 = arith.constant 9.99999997E-7 : f32
    %7 = vector.broadcast %cst_4 : f32 to vector<8x1xf32>
    %8 = arith.addf %6, %7 : vector<8x1xf32>
    %9 = math.rsqrt %8 : vector<8x1xf32>
    %10 = vector.broadcast %9 : vector<8x1xf32> to vector<8x32xf32>
    %11 = arith.mulf %0, %10 : vector<8x32xf32>
    %12 = vector.shape_cast %11 : vector<8x32xf32> to vector<1x8x32xf32>
    %13 = vector.shape_cast %12 : vector<1x8x32xf32> to vector<1x8x32xf32>
    %14 = vector.broadcast %13 : vector<1x8x32xf32> to vector<4x8x32xf32>
    %15 = vector.shape_cast %1 : vector<16x32xf32> to vector<1x16x32xf32>
    %16 = vector.shape_cast %15 : vector<1x16x32xf32> to vector<1x16x32xf32>
    %17 = vector.broadcast %16 : vector<1x16x32xf32> to vector<8x16x32xf32>
    %c0_5 = arith.constant 0 : index
    %c0_6 = arith.constant 0 : index
    %c0_7 = arith.constant 0 : index
    %18 = vector.load %arg3[%c0_5, %c0_6, %c0_7] : memref<4x32x8xf32, #tpu.memory_space<vmem>>, vector<4x32x8xf32>
    "tpu.trace_start"() <{level = 10 : i32, message = "hqd,hde->hqe"}> : () -> ()
    %cst_8 = arith.constant dense<0.000000e+00> : vector<4x8x8xf32>
    %19 = tpu.matmul %14, %18, %cst_8 {dimension_numbers = #tpu.dot_dimension_numbers<[2], [1], [1], [2], [0, 0, 0, 1, 1, 2], [0], [0]>, precision = #tpu.contract_precision<fp32>} : vector<4x8x32xf32>, vector<4x32x8xf32>, vector<4x8x8xf32> -> vector<4x8x8xf32>
    "tpu.trace_stop"() : () -> ()
    %c0_9 = arith.constant 0 : index
    %c0_10 = arith.constant 0 : index
    %c0_11 = arith.constant 0 : index
    %20 = vector.load %arg4[%c0_9, %c0_10, %c0_11] : memref<8x32x8xf32, #tpu.memory_space<vmem>>, vector<8x32x8xf32>
    "tpu.trace_start"() <{level = 10 : i32, message = "hkd,hde->hke"}> : () -> ()
    %cst_12 = arith.constant dense<0.000000e+00> : vector<8x16x8xf32>
    %21 = tpu.matmul %17, %20, %cst_12 {dimension_numbers = #tpu.dot_dimension_numbers<[2], [1], [1], [2], [0, 0, 0, 1, 1, 2], [0], [0]>, precision = #tpu.contract_precision<fp32>} : vector<8x16x32xf32>, vector<8x32x8xf32>, vector<8x16x8xf32> -> vector<8x16x8xf32>
    "tpu.trace_stop"() : () -> ()
    %22 = vector.extract_strided_slice %21 {offsets = [0, 0, 0], sizes = [4, 16, 8], strides = [1, 1, 1]} : vector<8x16x8xf32> to vector<4x16x8xf32>
    %23 = vector.extract_strided_slice %21 {offsets = [4, 0, 0], sizes = [4, 16, 8], strides = [1, 1, 1]} : vector<8x16x8xf32> to vector<4x16x8xf32>
    "tpu.trace_start"() <{level = 10 : i32, message = "hqe,hke->hqk"}> : () -> ()
    %cst_13 = arith.constant dense<0.000000e+00> : vector<4x8x16xf32>
    %24 = tpu.matmul %19, %22, %cst_13 {dimension_numbers = #tpu.dot_dimension_numbers<[2], [2], [1], [1], [0, 0, 0, 1, 1, 1], [0], [0]>, precision = #tpu.contract_precision<fp32>} : vector<4x8x8xf32>, vector<4x16x8xf32>, vector<4x8x16xf32> -> vector<4x8x16xf32>
    "tpu.trace_stop"() : () -> ()
    %cst_14 = arith.constant dense<0xFF800000> : vector<4x8xf32>
    %25 = vector.multi_reduction <maximumf>, %24, %cst_14 [2] : vector<4x8x16xf32> to vector<4x8xf32>
    %26 = vector.shape_cast %25 : vector<4x8xf32> to vector<4x8x1xf32>
    %27 = vector.broadcast %26 : vector<4x8x1xf32> to vector<4x8x16xf32>
    %28 = arith.subf %24, %27 : vector<4x8x16xf32>
    %29 = math.exp %28 : vector<4x8x16xf32>
    %cst_15 = arith.constant dense<0.000000e+00> : vector<4x8xf32>
    %30 = vector.multi_reduction <add>, %29, %cst_15 [2] : vector<4x8x16xf32> to vector<4x8xf32>
    %31 = vector.shape_cast %30 : vector<4x8xf32> to vector<4x8x1xf32>
    %32 = vector.broadcast %31 : vector<4x8x1xf32> to vector<4x8x16xf32>
    %33 = arith.divf %29, %32 : vector<4x8x16xf32>
    "tpu.trace_start"() <{level = 10 : i32, message = "hqk,hke->hqe"}> : () -> ()
    %cst_16 = arith.constant dense<0.000000e+00> : vector<4x8x8xf32>
    %34 = tpu.matmul %33, %23, %cst_16 {dimension_numbers = #tpu.dot_dimension_numbers<[2], [1], [1], [2], [0, 0, 0, 1, 1, 2], [0], [0]>, precision = #tpu.contract_precision<fp32>} : vector<4x8x16xf32>, vector<4x16x8xf32>, vector<4x8x8xf32> -> vector<4x8x8xf32>
    "tpu.trace_stop"() : () -> ()
    %c0_17 = arith.constant 0 : index
    %c0_18 = arith.constant 0 : index
    %c0_19 = arith.constant 0 : index
    %35 = vector.load %arg5[%c0_17, %c0_18, %c0_19] : memref<4x8x32xf32, #tpu.memory_space<vmem>>, vector<4x8x32xf32>
    "tpu.trace_start"() <{level = 10 : i32, message = "hqe,hem->hqm"}> : () -> ()
    %cst_20 = arith.constant dense<0.000000e+00> : vector<4x8x32xf32>
    %36 = tpu.matmul %34, %35, %cst_20 {dimension_numbers = #tpu.dot_dimension_numbers<[2], [1], [1], [2], [0, 0, 0, 1, 1, 2], [0], [0]>, precision = #tpu.contract_precision<fp32>} : vector<4x8x8xf32>, vector<4x8x32xf32>, vector<4x8x32xf32> -> vector<4x8x32xf32>
    "tpu.trace_stop"() : () -> ()
    %cst_21 = arith.constant dense<0.000000e+00> : vector<8x32xf32>
    %37 = vector.multi_reduction <add>, %36, %cst_21 [0] : vector<4x8x32xf32> to vector<8x32xf32>
    %38 = arith.addf %0, %37 : vector<8x32xf32>
    %c0_22 = arith.constant 0 : index
    %c0_23 = arith.constant 0 : index
    %39 = vector.load %arg6[%c0_22, %c0_23] : memref<8x32xf32, #tpu.memory_space<vmem>>, vector<8x32xf32>
    tpu.vector_store %arg6[%c0_22, %c0_23], %38 {strides = array<i32>} : memref<8x32xf32, #tpu.memory_space<vmem>>, vector<8x32xf32>,
    return
  }
  func.func @transform_0(%arg0: i32) -> (i32, i32) {
    %c0_i32 = arith.constant 0 : i32
    %c0_i32_0 = arith.constant 0 : i32
    return %arg0, %c0_i32 : i32, i32
  }
  func.func @transform_1(%arg0: i32) -> (i32, i32) {
    %c0_i32 = arith.constant 0 : i32
    %c0_i32_0 = arith.constant 0 : i32
    return %arg0, %c0_i32 : i32, i32
  }
  func.func @transform_2(%arg0: i32) -> (i32, i32, i32) {
    %c0_i32 = arith.constant 0 : i32
    %c0_i32_0 = arith.constant 0 : i32
    %c0_i32_1 = arith.constant 0 : i32
    %c0_i32_2 = arith.constant 0 : i32
    return %c0_i32, %c0_i32_0, %c0_i32_1 : i32, i32, i32
  }
  func.func @transform_3(%arg0: i32) -> (i32, i32, i32) {
    %c0_i32 = arith.constant 0 : i32
    %c0_i32_0 = arith.constant 0 : i32
    %c0_i32_1 = arith.constant 0 : i32
    %c0_i32_2 = arith.constant 0 : i32
    return %c0_i32, %c0_i32_0, %c0_i32_1 : i32, i32, i32
  }
  func.func @transform_4(%arg0: i32) -> (i32, i32, i32) {
    %c0_i32 = arith.constant 0 : i32
    %c0_i32_0 = arith.constant 0 : i32
    %c0_i32_1 = arith.constant 0 : i32
    %c0_i32_2 = arith.constant 0 : i32
    return %c0_i32, %c0_i32_0, %c0_i32_1 : i32, i32, i32
  }
  func.func @transform_5(%arg0: i32) -> (i32, i32) {
    %c0_i32 = arith.constant 0 : i32
    %c0_i32_0 = arith.constant 0 : i32
    return %arg0, %c0_i32 : i32, i32
  }
}

</mosaic_0001>

<bundles_post_ra>
// kernel: tpu_custom_call.1
= control target key start
LH: loop header
LB: loop body
LE: loop exit
PB: predicated region body
PF: predicated region fallthrough
CT: control target
= control target key end

     0   :  { %10 = vsyncpa [#allocation3], 0  ;;  %s16361_s0 = inlined_call_operand.hbm [shape: f32[16,32], index: 0, kind: input, shape index: {}, may-alias: {0,5}]   ;;  %s16362_s1 = inlined_call_operand.vmem [shape: f32[32,32], index: 1, kind: input, shape index: {}]   ;;  %s16363_s2 = inlined_call_operand.vmem [shape: f32[4,32,8], index: 2, kind: input, shape index: {}]   ;;  %s16364_s3 = inlined_call_operand.vmem [shape: f32[8,32,8], index: 3, kind: input, shape index: {}]   ;;  %s16365_s4 = inlined_call_operand.vmem [shape: f32[4,8,32], index: 4, kind: input, shape index: {}]   ;;  %s16366_s5 = inlined_call_operand.hbm [shape: f32[16,32], index: 5, kind: output, shape index: {}, may-alias: {0,5}]  }
   0x1   :  { %12 = vsyncpa [#allocation3 + $0x1], 0 }
   0x2   :  { %13 = vsyncpa [#allocation4], 0 }
   0x3   :  { %15 = vsyncpa [#allocation4 + $0x1], 0  ;;  %s14224_s18 = smov 0   ;;  %s14226_s19 = smov 0  }
   0x4   :  { %s14228_s20 = smov 0   ;;  %s14230_s21 = smov 0  }
   0x5 LB: > { %s14245_s22 = sadd.s32 4294967295, %s14188_s21   ;;  %s12167_s23 = sadd.s32 4294967294, %s14188_s21   ;;  %s14188_s21 = sphi %s14230_s21, %s16383_s21   ;;  %s14184_s20 = sphi %s14228_s20, %s16382_s20   ;;  %s14180_s19 = sphi %s14226_s19, %s16381_s19   ;;  %s14176_s18 = sphi %s14224_s18, %s16380_s18  }
   0x6   : > { %s14249_s24 = sadd.s32 1, %s14188_s21   ;;  %s28_s25 = sadd.s32 1, %s14184_s20 }
   0x7   : > { %s25_s26 = ssub.s32 %s14188_s21, %s14249_s24  ;;  %p35_p0 = scmp.ne.s32.totalorder %s14184_s20, %s14180_s19 }
   0x8   : > { %p26_p1 = scmp.eq.s32.totalorder %s25_s26, 0  ;;  %p36_p2 = scmp.eq.s32.totalorder %s14188_s21, 0 }
   0x9   : > { %p41_p3 = scmp.ne.s32.totalorder %s14180_s19, %s14176_s18  ;;  %p42_p4 = scmp.eq.s32.totalorder %s14245_s22, 0 }
   0xa   : > { %s14261_s27 = scalar_select %p26_p1, %s14184_s20, %s28_s25  }
   0xb   : > { %p14263_p5 = por %p36_p2, %p35_p0  ;;  %p14267_p6 = por %p42_p4, %p41_p3 }
   0xc   : > { %p154_p7 = scmp.eq.s32.totalorder %s14245_s22, 1  ;;  %p160_p8 = scmp.eq.s32.totalorder %s12167_s23, 1 }
   0xd   : > { %s16370_s29 = scalar_select %p14267_p6, 1, 0 }
   0xe   : > { %p14041_p10 = scmp.lt.s32.totalorder %s14188_s21, 2  ;;  %p14274_p11 = por %p154_p7, %p35_p0 }
   0xf   : > { %p14278_p12 = por %p160_p8, %p41_p3  ;;  %s189_s7 = sand.u32 1, %s14184_s20  }
  0x10   : > { %s16371_s30 = scalar_select %p14274_p11, 1, 0 }
  0x11   : > { %s16372_s6 = scalar_select %p14278_p12, 1, 0 }
  0x12   : > { %s12171_s8 = sshll.u32 %s14188_s21, 7  ;;  %s12170_s9 = sshll.u32 %s189_s7, 3 }
  0x13   : > { %s14287_s12 = scalar_lea.hbm %s16361_s0, %s12171_s8  ;;  %s193_s13 = scalar_lea.vmem [#allocation2], %s12170_s9 }
  0x14   : > { %s200_s14 = sshll.u32 %s193_s13, 4  ;;  %p14291_p13 = pnand %p14041_p10, %p14263_p5  ;;  %s14295_s14 = int_to_ptr.vmem [resolvable:$true] %s200_s14 }
  0x15   : > { %s190_s16 = scalar_lea.sflag [#allocation3], %s189_s7  ;;  %s14096_s17 = scalar_lea.hbm %s14287_s12, 128 }
  0x16   : > { %p14097_p2 = scmp.ne.s32.totalorder %s14287_s12, %s14096_s17  ;;  %p14098_p3 = pneg %p14291_p13 }
  0x17   : > { %s14101_s26 = scalar_lea.hbm %s16361_s0, 256  ;;  %p14102_p5 = scmp.lt.s32.totalorder %s14287_s12, %s16361_s0 }
  0x18   : > { %p14099_p4 = pnand %p14098_p3, %p14097_p2  ;;  %p14103_p8 = scmp.lt.s32.totalorder %s14101_s26, %s14096_s17 }
  0x1a   : > { %p14100_p7 = pneg %p14099_p4  ;;  %p14104_p10 = por %p14103_p8, %p14102_p5 }
  0x1c   : > { %p14105_p9 = pnand %p14104_p10, %p14100_p7 }
  0x1e   : > { %14108 = shalt.err (!%p14105_p9)
}
  0x1f   : > { %s14109_s7 = scalar_lea.vmem %s14295_s14, 128  ;;  %s14190_s9 = smov [#allocation2]  }
  0x20   : > { %p14110_p0 = scmp.ne.s32.totalorder %s14295_s14, %s14109_s7  ;;  %s14114_s10 = sshll.u32 %s14190_s9, 4  ;;  %s14115_s10 = int_to_ptr.vmem [resolvable:$false] %s14114_s10 }
  0x21   : > { %s14116_s11 = scalar_lea.vmem %s14115_s10, 256  ;;  %p14117_p4 = scmp.lt.s32.totalorder %s14295_s14, %s14115_s10 }
  0x22   : > { %p14112_p1 = pnand %p14110_p0, %p14098_p3  ;;  %p14118_p12 = scmp.lt.s32.totalorder %s14116_s11, %s14109_s7 }
  0x24   : > { %p14113_p2 = pneg %p14112_p1  ;;  %p14119_p11 = por %p14118_p12, %p14117_p4 }
  0x26   : > { %p14120_p6 = pnand %p14119_p11, %p14113_p2 }
  0x28   : > { %14123 = shalt.err (!%p14120_p6)
}
  0x29   : > { %14036 = dma.hbm_to_vmem [thread:$0]  (!%p14291_p13), %s14287_s12, 128, %s14295_s14, %s190_s16  }
  0x2a   : > { %p16374_p9 = scmp.lt.s32.totalorder %s14188_s21, 3  ;;  %p16375_p7 = scmp.ge.s32.totalorder %s14188_s21, 1 }
  0x2c   : > { %p215_p0 = pnand %p16375_p7, %p16374_p9 }
  0x2d   : > { %s14322_s13 = sand.u32 (!%p215_p0), 1, %s14180_s19   ;;  %p16376_p6 = scmp.ne.s32.totalorder (!%p215_p0), %s16370_s29, 0 }
  0x2e   : > { %218 = sbr.rel (%p215_p0) target bundleno = 1637 (0x665), region = 40  ;;  %s12173_s17 = sshll.u32 (!%p215_p0), %s14322_s13, 3 }
  0x2f   : > { %s221_s23 = scalar_lea.sflag (!%p215_p0), [#allocation3], %s14322_s13  ;;  %s14328_s15 = scalar_lea.vmem (!%p215_p0), [#allocation2], %s12173_s17 }
  0x33   : > { %14167 = dma.done.wait (%p16376_p6), %s221_s23, 128  }
  0x34   : > { %14169 = vsyncadd (%p16376_p6), %s221_s23, 4294967168  ;;  %v262_v0 = vld [vmem:[%s14328_s15] sm:$0xff]  ;;  %vm266_vm0 = vcmask 261120   ;;  %v278_v3 = vld [vmem:[%s16363_s2 + $0x18] sm:$0xff]  ;;  %v14191_v20 = vmov 0.0   ;;  %vm14192_vm1 = vmmov 0  }
  0x35   : > { %v265_v1 = vmul.f32 %v262_v0, %v262_v0  ;;  %v14339_v4 = vand.u32 4294901760, %v278_v3  ;;  %v277_v5 = vld [vmem:[%s16363_s2 + $0x10] sm:$0xff]  ;;  %v276_v8 = vld [vmem:[%s16363_s2 + $0x8] sm:$0xff]  ;;  %v275_v12 = vld [vmem:[%s16363_s2] sm:$0xff]  ;;  %12792 = vmatprep.subr.mxu1 %v14191_v20  ;;  %12781 = vmatprep.subr.mxu0 %v14191_v20  ;;  %s12175_s28 = sshll.u32 %s14245_s22, 1  ;;  %vm6496_vm2 = vcmask 64512  }
  0x36   : > { %v14347_v7 = vand.u32 4294901760, %v277_v5  ;;  %v14356_v11 = vand.u32 4294901760, %v276_v8  ;;  %v14368_v16 = vand.u32 4294901760, %v275_v12  ;;  %12800 = vmatprep.mubr.msk.f32.mxu1 %vm14192_vm1, %v14191_v20  ;;  %12789 = vmatprep.mubr.msk.f32.mxu0 %vm14192_vm1, %v14191_v20  ;;  %v282_v34 = vld [vmem:[%s16363_s2 + $0x38] sm:$0xff]  ;;  %v281_v36 = vld [vmem:[%s16363_s2 + $0x30] sm:$0xff]  ;;  %v280_v39 = vld [vmem:[%s16363_s2 + $0x28] sm:$0xff] }
  0x37   : > { %v267_v2 = vsel %vm266_vm0, %v265_v1, 0.0  ;;  %v14345_v6 = vsub.f32 %v278_v3, %v14339_v4  ;;  %12782 = vmatpush3.msra.mxu0 %v14339_v4  ;;  %v14415_v38 = vand.u32 4294901760, %v282_v34  ;;  %v14427_v41 = vand.u32 4294901760, %v281_v36  ;;  %v279_v42 = vld [vmem:[%s16363_s2 + $0x20] sm:$0xff]  ;;  %v286_v63 = vld [vmem:[%s16363_s2 + $0x58] sm:$0xff]  ;;  %p257_p11 = scmp.lt.s32.totalorder %s12175_s28, 3 }
  0x38   : > { %268 = vadd.xlane.f32.xlu0 %v267_v2  ;;  %v14354_v10 = vsub.f32 %v277_v5, %v14347_v7  ;;  %v14366_v15 = vsub.f32 %v276_v8, %v14356_v11  ;;  %v14376_v21 = vsub.f32 %v275_v12, %v14368_v16  ;;  %12783 = vmatprep.subr.mxu0 %v14191_v20  ;;  %v14439_v45 = vand.u32 4294901760, %v280_v39  ;;  %v284_v2 = vld [vmem:[%s16363_s2 + $0x48] sm:$0xff]  ;;  %s12178_s26 = sshll.u32 %s14245_s22, 7  ;;  %s12072_s11 = scalar_lea.sflag [#allocation4], %s14322_s13 }
  0x39   : > { %v400_v9 = vand.u32 4294901760, %v14345_v6  ;;  %12784 = vmatpush3.msra.mxu0 %v14347_v7  ;;  %v14437_v44 = vsub.f32 %v282_v34, %v14415_v38  ;;  %v14446_v47 = vsub.f32 %v281_v36, %v14427_v41  ;;  %v14448_v48 = vand.u32 4294901760, %v279_v42  ;;  %s16385_s28 = smov (!%p257_p11, %s12175_s28), 3  ;;  %s12083_s10 = scalar_lea.hbm %s16366_s5, %s12178_s26 }
  0x3a   : > { %v407_v14 = vand.u32 4294901760, %v14354_v10  ;;  %v414_v19 = vand.u32 4294901760, %v14366_v15  ;;  %v421_v24 = vand.u32 4294901760, %v14376_v21  ;;  %12785 = vmatprep.subr.mxu0 %v14191_v20  ;;  %v14455_v50 = vsub.f32 %v280_v39, %v14439_v45  ;;  %s12176_s8 = sshll.u32 %s16385_s28, 3  ;;  %s255_s28 = scalar_lea.vmem [#allocation5], %s12173_s17 }
  0x3b   : > { %v401_v13 = vsub.f32 %v14345_v6, %v400_v9  ;;  %12786 = vmatpush3.msra.mxu0 %v14356_v11  ;;  %v885_v49 = vand.u32 4294901760, %v14437_v44  ;;  %v892_v51 = vand.u32 4294901760, %v14446_v47  ;;  %v14463_v52 = vsub.f32 %v279_v42, %v14448_v48  ;;  %s260_s23 = scalar_lea.vmem %s16362_s1, %s12176_s8  ;;  %s12085_s8 = sshll.u32 %s255_s28, 4  ;;  %s12086_s8 = int_to_ptr.vmem [resolvable:$true] %s12085_s8 }
  0x3c   : > { %v408_v18 = vsub.f32 %v14354_v10, %v407_v14  ;;  %v415_v23 = vsub.f32 %v14366_v15, %v414_v19  ;;  %v422_v26 = vsub.f32 %v14376_v21, %v421_v24  ;;  %12787 = vmatprep.subr.mxu0 %v14191_v20  ;;  %v899_v54 = vand.u32 4294901760, %v14455_v50  ;;  %p16377_p13 = scmp.ne.s32.totalorder %s16371_s30, 0  ;;  %s14193_s22 = smov [#allocation5]  }
  0x3d   : > { %v402_v17 = vand.u32 4294901760, %v401_v13  ;;  %12788 = vmatpush3.msra.mxu0 %v14368_v16  ;;  %v886_v53 = vsub.f32 %v14437_v44, %v885_v49  ;;  %v893_v55 = vsub.f32 %v14446_v47, %v892_v51  ;;  %v906_v56 = vand.u32 4294901760, %v14463_v52  ;;  %s14128_s12 = sshll.u32 %s14193_s22, 4  ;;  %s14129_s12 = int_to_ptr.vmem [resolvable:$false] %s14128_s12 }
  0x3e   : > { %v409_v22 = vand.u32 4294901760, %v408_v18  ;;  %v416_v25 = vand.u32 4294901760, %v415_v23  ;;  %v423_v27 = vand.u32 4294901760, %v422_v26  ;;  %12803 = vmatprep.subr.mxu0 %v14191_v20  ;;  %v900_v58 = vsub.f32 %v14455_v50, %v899_v54  ;;  %s14130_s17 = scalar_lea.vmem %s14129_s12, 256  ;;  %p14131_p5 = scmp.lt.s32.totalorder %s12086_s8, %s14129_s12 }
  0x3f   : > { %12793 = vmatpush3.msra.mxu1 %v402_v17  ;;  %v887_v57 = vand.u32 4294901760, %v886_v53  ;;  %v894_v59 = vand.u32 4294901760, %v893_v55  ;;  %v907_v60 = vsub.f32 %v14463_v52, %v906_v56  ;;  %v14529_v1 = vand.u32 4294901760, %v286_v63  ;;  %v2236_v53 = vld [vmem:[%s16364_s3 + $0x10] sm:$0xff]  ;;  %v2235_v55 = vld [vmem:[%s16364_s3 + $0x8] sm:$0xff] }
  0x40   : > { %12794 = vmatprep.subr.mxu1 %v14191_v20  ;;  %v901_v61 = vand.u32 4294901760, %v900_v58  ;;  %vm8369_vm3 = vcmask 130048  }
  0x41   : > { %12795 = vmatpush3.msra.mxu1 %v409_v22  ;;  %v908_v62 = vand.u32 4294901760, %v907_v60  ;;  %v14548_v5 = vsub.f32 %v286_v63, %v14529_v1  ;;  %v2234_v60 = vld [vmem:[%s16364_s3] sm:$0xff] }
  0x42   : > { %12796 = vmatprep.subr.mxu1 %v14191_v20  ;;  %v14796_v63 = vand.u32 4294901760, %v2234_v60 }
  0x43   : > { %12797 = vmatpush3.msra.mxu1 %v416_v25  ;;  %v289_v25 = vld [vmem:[%s16363_s2 + $0x70] sm:$0xff] }
  0x44   : > { %12798 = vmatprep.subr.mxu1 %v14191_v20 }
  0x45   : > { %12799 = vmatpush3.msra.mxu1 %v423_v27  ;;  %v288_v27 = vld [vmem:[%s16363_s2 + $0x68] sm:$0xff] }
  0x46   : > { %12814 = vmatprep.subr.mxu1 %v14191_v20 }
  0xc1   : > { %v269_v28 = vpop.xlane.xlu0 %268 }
  0xc2   : > { %v271_v29 = vmul.f32 0.03125, %v269_v28  ;;  %v14652_v28 = vand.u32 4294901760, %v289_v25 }
  0xc4   : > { %v272_v30 = vadd.f32 1e-06, %v271_v29  ;;  %v287_v29 = vld [vmem:[%s16363_s2 + $0x60] sm:$0xff] }
  0xc6   : > { %14077 = vrsqrt.f32 %v272_v30 }
  0xd3   : > { %v14078_v31 = vpop.eup %14077 }
  0xd4   : > { %v274_v32 = vmul.f32 %v14078_v31, %v262_v0  ;;  %v285_v0 = vld [vmem:[%s16363_s2 + $0x50] sm:$0xff]  ;;  %v14664_v31 = vand.u32 4294901760, %v288_v27 }
  0xd5   : > { %v14538_v3 = vand.u32 4294901760, %v285_v0 }
  0xd6   : > { %v292_v33 = vsel %vm266_vm0, %v274_v32, 0  ;;  %v14672_v32 = vsub.f32 %v289_v25, %v14652_v28  ;;  %v14683_v36 = vsub.f32 %v288_v27, %v14664_v31 }
  0xd7   : > { %v14406_v35 = vand.u32 4294901760, %v292_v33 }
  0xd8   : > { %v1869_v42 = vand.u32 4294901760, %v14683_v36 }
  0xd9   : > { %v14412_v37 = vsub.f32 %v292_v33, %v14406_v35  ;;  %12801 = vmatmul.mubr.f32.vlgmr.msra.gmra.mxu1 %v14406_v35  ;;  %v14674_v33 = vand.u32 4294901760, %v287_v29 }
  0xda   : > { %12815 = vmatpush3.msra.mxu1 %v14339_v4  ;;  %12822 = vmatprep.mubr.msk.f32.mxu1 %vm14192_vm1, %v14191_v20 }
  0xdb   : > { %12816 = vmatprep.subr.mxu1 %v14191_v20  ;;  %v14425_v40 = vand.u32 4294901760, %v14412_v37  ;;  %v14691_v39 = vsub.f32 %v287_v29, %v14674_v33 }
  0xdc   : > { %12817 = vmatpush3.msra.mxu1 %v14347_v7 }
  0xdd   : > { %12818 = vmatprep.subr.mxu1 %v14191_v20  ;;  %v366_v43 = vsub.f32 %v14412_v37, %v14425_v40 }
  0xde   : > { %12819 = vmatpush3.msra.mxu1 %v14356_v11 }
  0xdf   : > { %12820 = vmatprep.subr.mxu1 %v14191_v20  ;;  %v14443_v46 = vand.u32 4294901760, %v366_v43 }
  0xe0   : > { %12821 = vmatpush3.msra.mxu1 %v14368_v16 }
  0xe1   : > { %12823 = vmatmul.mubr.f32.vlgmr.msra.gmra.mxu1 %v14425_v40  ;;  %12836 = vmatprep.subr.mxu1 %v14191_v20 }
  0xe2   : > { %12790 = vmatmul.mubr.f32.vlgmr.msra.gmra.mxu0 %v14443_v46  ;;  %12837 = vmatpush3.msra.mxu1 %v14339_v4  ;;  %v283_v4 = vld [vmem:[%s16363_s2 + $0x40] sm:$0xff] }
  0xe3   : > { %12804 = vmatpush3.msra.mxu0 %v14345_v6  ;;  %12838 = vmatprep.subr.mxu1 %v14191_v20  ;;  %v14550_v6 = vand.u32 4294901760, %v284_v2  ;;  %v14560_v8 = vand.u32 4294901760, %v283_v4 }
  0xe4   : > { %12805 = vmatprep.subr.mxu0 %v14191_v20  ;;  %12839 = vmatpush3.msra.mxu1 %v14347_v7  ;;  %v14558_v7 = vsub.f32 %v285_v0, %v14538_v3  ;;  %v264_v0 = vld [vmem:[%s260_s23 + $0x8] sm:$0xff] }
  0xe5   : > { %12806 = vmatpush3.msra.mxu0 %v14354_v10  ;;  %12840 = vmatprep.subr.mxu1 %v14191_v20  ;;  %v14569_v10 = vsub.f32 %v284_v2, %v14550_v6  ;;  %v14577_v12 = vsub.f32 %v283_v4, %v14560_v8  ;;  %v2270_v4 = vsel %vm266_vm0, %v264_v0, 0 }
  0xe6   : > { %12807 = vmatprep.subr.mxu0 %v14191_v20  ;;  %12841 = vmatpush3.msra.mxu1 %v14356_v11  ;;  %v1377_v11 = vand.u32 4294901760, %v14558_v7 }
  0xe7   : > { %12808 = vmatpush3.msra.mxu0 %v14366_v15  ;;  %12842 = vmatprep.subr.mxu1 %v14191_v20 }
  0xe8   : > { %12809 = vmatprep.subr.mxu0 %v14191_v20  ;;  %12811 = vmatprep.mubr.msk.f32.mxu0 %vm14192_vm1, %v14191_v20  ;;  %v1378_v15 = vsub.f32 %v14558_v7, %v1377_v11 }
  0xe9   : > { %12810 = vmatpush3.msra.mxu0 %v14376_v21  ;;  %12843 = vmatpush3.msra.mxu1 %v14368_v16  ;;  %v1391_v16 = vand.u32 4294901760, %v14577_v12 }
  0xea   : > { %12844 = vmatprep.mubr.msk.f32.mxu1 %vm14192_vm1, %v14191_v20  ;;  %12812 = vmatmul.mubr.f32.vlgmr.msra.gmra.mxu0 %v14412_v37 }
  0xeb   : > { %12825 = vmatprep.subr.mxu0 %v14191_v20  ;;  %12845 = vmatmul.mubr.f32.vlgmr.msra.gmra.mxu1 %v14406_v35  ;;  %v1392_v21 = vsub.f32 %v14577_v12, %v1391_v16 }
  0xec   : > { %12858 = vmatprep.subr.mxu1 %v14191_v20  ;;  %12826 = vmatpush3.msra.mxu0 %v400_v9  ;;  %v1370_v9 = vand.u32 4294901760, %v14548_v5 }
  0xed   : > { %12859 = vmatpush3.msra.mxu1 %v887_v57  ;;  %12827 = vmatprep.subr.mxu0 %v14191_v20  ;;  %v1393_v23 = vand.u32 4294901760, %v1392_v21  ;;  %v14770_v57 = vand.u32 4294901760, %v2236_v53 }
  0xee   : > { %12860 = vmatprep.subr.mxu1 %v14191_v20  ;;  %12828 = vmatpush3.msra.mxu0 %v407_v14  ;;  %v1371_v13 = vsub.f32 %v14548_v5, %v1370_v9  ;;  %v1384_v14 = vand.u32 4294901760, %v14569_v10 }
  0xef   : > { %12861 = vmatpush3.msra.mxu1 %v894_v59  ;;  %12829 = vmatprep.subr.mxu0 %v14191_v20  ;;  %v14779_v59 = vand.u32 4294901760, %v2235_v55 }
  0xf0   : > { %12862 = vmatprep.subr.mxu1 %v14191_v20  ;;  %12830 = vmatpush3.msra.mxu0 %v414_v19  ;;  %v1372_v17 = vand.u32 4294901760, %v1371_v13  ;;  %v1385_v18 = vsub.f32 %v14569_v10, %v1384_v14  ;;  %v1379_v19 = vand.u32 4294901760, %v1378_v15 }
  0xf1   : > { %12863 = vmatpush3.msra.mxu1 %v901_v61  ;;  %12831 = vmatprep.subr.mxu0 %v14191_v20 }
  0xf2   : > { %12864 = vmatprep.subr.mxu1 %v14191_v20  ;;  %12832 = vmatpush3.msra.mxu0 %v421_v24  ;;  %v1386_v22 = vand.u32 4294901760, %v1385_v18  ;;  %v290_v24 = vld [vmem:[%s16363_s2 + $0x78] sm:$0xff] }
  0xf3   : > { %12833 = vmatprep.mubr.msk.f32.mxu0 %vm14192_vm1, %v14191_v20  ;;  %12865 = vmatpush3.msra.mxu1 %v908_v62  ;;  %v14643_v26 = vand.u32 4294901760, %v290_v24  ;;  %v14791_v62 = vsub.f32 %v2236_v53, %v14770_v57 }
  0xf4   : > { %12866 = vmatprep.mubr.msk.f32.mxu1 %vm14192_vm1, %v14191_v20  ;;  %12834 = vmatmul.mubr.f32.vlgmr.msra.gmra.mxu0 %v14406_v35 }
  0xf5   : > { %12847 = vmatprep.subr.mxu0 %v14191_v20  ;;  %12867 = vmatmul.mubr.f32.vlgmr.msra.gmra.mxu1 %v14406_v35  ;;  %v14662_v30 = vsub.f32 %v290_v24, %v14643_v26  ;;  %v2240_v24 = vld [vmem:[%s16364_s3 + $0x30] sm:$0xff] }
  0xf6   : > { %12880 = vmatprep.subr.mxu1 %v14191_v20  ;;  %12848 = vmatpush3.msra.mxu0 %v14415_v38  ;;  %v14917_v27 = vand.u32 4294901760, %v2240_v24 }
  0xf7   : > { %12881 = vmatpush3.msra.mxu1 %v14415_v38  ;;  %12849 = vmatprep.subr.mxu0 %v14191_v20  ;;  %v1855_v34 = vand.u32 4294901760, %v14662_v30 }
  0xf8   : > { %12882 = vmatprep.subr.mxu1 %v14191_v20  ;;  %12850 = vmatpush3.msra.mxu0 %v14427_v41 }
  0xf9   : > { %12883 = vmatpush3.msra.mxu1 %v14427_v41  ;;  %12851 = vmatprep.subr.mxu0 %v14191_v20 }
  0xfa   : > { %12884 = vmatprep.subr.mxu1 %v14191_v20  ;;  %12852 = vmatpush3.msra.mxu0 %v14439_v45 }
  0xfb   : > { %12885 = vmatpush3.msra.mxu1 %v14439_v45  ;;  %12853 = vmatprep.subr.mxu0 %v14191_v20 }
  0xfc   : > { %12886 = vmatprep.subr.mxu1 %v14191_v20  ;;  %12854 = vmatpush3.msra.mxu0 %v14448_v48 }
  0xfd   : > { %12855 = vmatprep.mubr.msk.f32.mxu0 %vm14192_vm1, %v14191_v20  ;;  %12887 = vmatpush3.msra.mxu1 %v14448_v48 }
  0xfe   : > { %12888 = vmatprep.mubr.msk.f32.mxu1 %vm14192_vm1, %v14191_v20  ;;  %12856 = vmatmul.mubr.f32.vlgmr.msra.gmra.mxu0 %v14443_v46 }
  0xff   : > { %12869 = vmatprep.subr.mxu0 %v14191_v20  ;;  %12889 = vmatmul.mubr.f32.vlgmr.msra.gmra.mxu1 %v14425_v40 }
 0x100   : > { %12902 = vmatprep.subr.mxu1 %v14191_v20  ;;  %12870 = vmatpush3.msra.mxu0 %v14437_v44  ;;  %v1876_v44 = vand.u32 4294901760, %v14691_v39 }
 0x101   : > { %12903 = vmatpush3.msra.mxu1 %v14415_v38  ;;  %12871 = vmatprep.subr.mxu0 %v14191_v20  ;;  %v1862_v38 = vand.u32 4294901760, %v14672_v32 }
 0x102   : > { %12904 = vmatprep.subr.mxu1 %v14191_v20  ;;  %12872 = vmatpush3.msra.mxu0 %v14446_v47  ;;  %v1870_v47 = vsub.f32 %v14683_v36, %v1869_v42 }
 0x103   : > { %12905 = vmatpush3.msra.mxu1 %v14427_v41  ;;  %12873 = vmatprep.subr.mxu0 %v14191_v20  ;;  %v1856_v41 = vsub.f32 %v14662_v30, %v1855_v34  ;;  %v1863_v43 = vsub.f32 %v14672_v32, %v1862_v38 }
 0x104   : > { %12906 = vmatprep.subr.mxu1 %v14191_v20  ;;  %12874 = vmatpush3.msra.mxu0 %v14455_v50  ;;  %v1871_v50 = vand.u32 4294901760, %v1870_v47 }
 0x105   : > { %12907 = vmatpush3.msra.mxu1 %v14439_v45  ;;  %12875 = vmatprep.subr.mxu0 %v14191_v20  ;;  %v1857_v45 = vand.u32 4294901760, %v1856_v41 }
 0x106   : > { %12908 = vmatprep.subr.mxu1 %v14191_v20  ;;  %12876 = vmatpush3.msra.mxu0 %v14463_v52  ;;  %v2237_v52 = vld [vmem:[%s16364_s3 + $0x18] sm:$0xff] }
 0x107   : > { %12877 = vmatprep.mubr.msk.f32.mxu0 %vm14192_vm1, %v14191_v20  ;;  %12909 = vmatpush3.msra.mxu1 %v14448_v48  ;;  %v1864_v48 = vand.u32 4294901760, %v1863_v43 }
 0x108   : > { %12910 = vmatprep.mubr.msk.f32.mxu1 %vm14192_vm1, %v14191_v20  ;;  %12878 = vmatmul.mubr.f32.vlgmr.msra.gmra.mxu0 %v14412_v37 }
 0x109   : > { %12891 = vmatprep.subr.mxu0 %v14191_v20  ;;  %12911 = vmatmul.mubr.f32.vlgmr.msra.gmra.mxu1 %v14406_v35 }
 0x10a   : > { %12924 = vmatprep.subr.mxu1 %v14191_v20  ;;  %12892 = vmatpush3.msra.mxu0 %v885_v49  ;;  %v1877_v49 = vsub.f32 %v14691_v39, %v1876_v44 }
 0x10b   : > { %12925 = vmatpush3.msra.mxu1 %v1372_v17  ;;  %12893 = vmatprep.subr.mxu0 %v14191_v20 }
 0x10c   : > { %12926 = vmatprep.subr.mxu1 %v14191_v20  ;;  %12894 = vmatpush3.msra.mxu0 %v892_v51  ;;  %v1878_v51 = vand.u32 4294901760, %v1877_v49 }
 0x10d   : > { %12927 = vmatpush3.msra.mxu1 %v1379_v19  ;;  %12895 = vmatprep.subr.mxu0 %v14191_v20 }
 0x10e   : > { %12928 = vmatprep.subr.mxu1 %v14191_v20  ;;  %12896 = vmatpush3.msra.mxu0 %v899_v54  ;;  %v14761_v54 = vand.u32 4294901760, %v2237_v52 }
 0x10f   : > { %12929 = vmatpush3.msra.mxu1 %v1386_v22  ;;  %12897 = vmatprep.subr.mxu0 %v14191_v20 }
 0x110   : > { %12930 = vmatprep.subr.mxu1 %v14191_v20  ;;  %12898 = vmatpush3.msra.mxu0 %v906_v56  ;;  %v263_v56 = vld [vmem:[%s260_s23] sm:$0xff]  ;;  %v14777_v58 = vsub.f32 %v2237_v52, %v14761_v54  ;;  %v2244_v52 = vld [vmem:[%s16364_s3 + $0x50] sm:$0xff]  ;;  %s14124_s23 = scalar_lea.vmem %s12086_s8, 128 }
 0x111   : > { %12899 = vmatprep.mubr.msk.f32.mxu0 %vm14192_vm1, %v14191_v20  ;;  %12931 = vmatpush3.msra.mxu1 %v1393_v23  ;;  %v2267_v61 = vsel %vm266_vm0, %v263_v56, 0  ;;  %v2241_v23 = vld [vmem:[%s16364_s3 + $0x38] sm:$0xff]  ;;  %v2242_v56 = vld [vmem:[%s16364_s3 + $0x40] sm:$0xff]  ;;  %p14125_p12 = scmp.ne.s32.totalorder %s12086_s8, %s14124_s23  ;;  %p14132_p8 = scmp.lt.s32.totalorder %s14130_s17, %s14124_s23 }
 0x112   : > { %12932 = vmatprep.mubr.msk.f32.mxu1 %vm14192_vm1, %v14191_v20  ;;  %12900 = vmatmul.mubr.f32.vlgmr.msra.gmra.mxu0 %v14406_v35  ;;  %v14803_v2 = vand.u32 4294901760, %v14777_v58  ;;  %v14908_v25 = vand.u32 4294901760, %v2241_v23 }
 0x113   : > { %12913 = vmatprep.subr.mxu0 %v14191_v20  ;;  %12933 = vmatmul.mubr.f32.vlgmr.msra.gmra.mxu1 %v14406_v35  ;;  %p14126_p1 = pnand %p14125_p12, %p16377_p13  ;;  %p14133_p10 = por %p14132_p8, %p14131_p5 }
 0x114   : > { %12946 = vmatprep.subr.mxu1 %v14191_v20  ;;  %12914 = vmatpush3.msra.mxu0 %v14529_v1  ;;  %v14927_v29 = vsub.f32 %v2241_v23, %v14908_v25 }
 0x115   : > { %12947 = vmatpush3.msra.mxu1 %v14529_v1  ;;  %12915 = vmatprep.subr.mxu0 %v14191_v20  ;;  %p14127_p3 = pneg %p14126_p1 }
 0x116   : > { %12948 = vmatprep.subr.mxu1 %v14191_v20  ;;  %12916 = vmatpush3.msra.mxu0 %v14538_v3 }
 0x117   : > { %12949 = vmatpush3.msra.mxu1 %v14538_v3  ;;  %12917 = vmatprep.subr.mxu0 %v14191_v20  ;;  %p14134_p2 = pnand %p14133_p10, %p14127_p3 }
 0x118   : > { %12950 = vmatprep.subr.mxu1 %v14191_v20  ;;  %12918 = vmatpush3.msra.mxu0 %v14550_v6 }
 0x119   : > { %12951 = vmatpush3.msra.mxu1 %v14550_v6  ;;  %12919 = vmatprep.subr.mxu0 %v14191_v20 }
 0x11a   : > { %12952 = vmatprep.subr.mxu1 %v14191_v20  ;;  %12920 = vmatpush3.msra.mxu0 %v14560_v8 }
 0x11b   : > { %12921 = vmatprep.mubr.msk.f32.mxu0 %vm14192_vm1, %v14191_v20  ;;  %12953 = vmatpush3.msra.mxu1 %v14560_v8 }
 0x11c   : > { %12954 = vmatprep.mubr.msk.f32.mxu1 %vm14192_vm1, %v14191_v20  ;;  %12922 = vmatmul.mubr.f32.vlgmr.msra.gmra.mxu0 %v14443_v46 }
 0x11d   : > { %12935 = vmatprep.subr.mxu0 %v14191_v20  ;;  %12955 = vmatmul.mubr.f32.vlgmr.msra.gmra.mxu1 %v14425_v40 }
 0x11e   : > { %12968 = vmatprep.subr.mxu1 %v14191_v20  ;;  %12936 = vmatpush3.msra.mxu0 %v14548_v5 }
 0x11f   : > { %12969 = vmatpush3.msra.mxu1 %v14529_v1  ;;  %12937 = vmatprep.subr.mxu0 %v14191_v20  ;;  %v14798_v1 = vand.u32 4294901760, %v2267_v61 }
 0x120   : > { %12970 = vmatprep.subr.mxu1 %v14191_v20  ;;  %12938 = vmatpush3.msra.mxu0 %v14558_v7 }
 0x121   : > { %12971 = vmatpush3.msra.mxu1 %v14538_v3  ;;  %12939 = vmatprep.subr.mxu0 %v14191_v20  ;;  %v14806_v3 = vsub.f32 %v2235_v55, %v14779_v59  ;;  %v14822_v5 = vsub.f32 %v2267_v61, %v14798_v1  ;;  %v15021_v55 = vand.u32 4294901760, %v2244_v52 }
 0x122   : > { %12972 = vmatprep.subr.mxu1 %v14191_v20  ;;  %12940 = vmatpush3.msra.mxu0 %v14569_v10 }
 0x123   : > { %12973 = vmatpush3.msra.mxu1 %v14550_v6  ;;  %12941 = vmatprep.subr.mxu0 %v14191_v20  ;;  %v2389_v6 = vsub.f32 %v14777_v58, %v14803_v2  ;;  %v14829_v7 = vand.u32 4294901760, %v14806_v3  ;;  %v14850_v13 = vand.u32 4294901760, %v14822_v5 }
 0x124   : > { %12974 = vmatprep.subr.mxu1 %v14191_v20  ;;  %12942 = vmatpush3.msra.mxu0 %v14577_v12 }
 0x125   : > { %12943 = vmatprep.mubr.msk.f32.mxu0 %vm14192_vm1, %v14191_v20  ;;  %12975 = vmatpush3.msra.mxu1 %v14560_v8  ;;  %v14833_v8 = vand.u32 4294901760, %v2270_v4  ;;  %v2403_v12 = vsub.f32 %v14806_v3, %v14829_v7  ;;  %v2344_v17 = vsub.f32 %v14822_v5, %v14850_v13 }
 0x126   : > { %12976 = vmatprep.mubr.msk.f32.mxu1 %vm14192_vm1, %v14191_v20  ;;  %12944 = vmatmul.mubr.f32.vlgmr.msra.gmra.mxu0 %v14412_v37 }
 0x127   : > { %12957 = vmatprep.subr.mxu0 %v14191_v20  ;;  %12977 = vmatmul.mubr.f32.vlgmr.msra.gmra.mxu1 %v14406_v35  ;;  %v14878_v21 = vand.u32 4294901760, %v2344_v17 }
 0x128   : > { %12990 = vmatprep.subr.mxu1 %v14191_v20  ;;  %12958 = vmatpush3.msra.mxu0 %v1370_v9 }
 0x129   : > { %12991 = vmatpush3.msra.mxu1 %v1857_v45  ;;  %12959 = vmatprep.subr.mxu0 %v14191_v20 }
 0x12a   : > { %12992 = vmatprep.subr.mxu1 %v14191_v20  ;;  %12960 = vmatpush3.msra.mxu0 %v1377_v11  ;;  %v2390_v11 = vand.u32 4294901760, %v2389_v6 }
 0x12b   : > { %12993 = vmatpush3.msra.mxu1 %v1864_v48  ;;  %12961 = vmatprep.subr.mxu0 %v14191_v20 }
 0x12c   : > { %12994 = vmatprep.subr.mxu1 %v14191_v20  ;;  %12962 = vmatpush3.msra.mxu0 %v1384_v14  ;;  %v14856_v14 = vsub.f32 %v2270_v4, %v14833_v8 }
 0x12d   : > { %12995 = vmatpush3.msra.mxu1 %v1871_v50  ;;  %12963 = vmatprep.subr.mxu0 %v14191_v20 }
 0x12e   : > { %12996 = vmatprep.subr.mxu1 %v14191_v20  ;;  %12964 = vmatpush3.msra.mxu0 %v1391_v16  ;;  %v14873_v18 = vand.u32 4294901760, %v14856_v14 }
 0x12f   : > { %12965 = vmatprep.mubr.msk.f32.mxu0 %vm14192_vm1, %v14191_v20  ;;  %12997 = vmatpush3.msra.mxu1 %v1878_v51  ;;  %v2245_v51 = vld [vmem:[%s16364_s3 + $0x58] sm:$0xff] }
 0x130   : > { %12998 = vmatprep.mubr.msk.f32.mxu1 %vm14192_vm1, %v14191_v20  ;;  %12966 = vmatmul.mubr.f32.vlgmr.msra.gmra.mxu0 %v14406_v35  ;;  %v2354_v22 = vsub.f32 %v14856_v14, %v14873_v18  ;;  %v15012_v53 = vand.u32 4294901760, %v2245_v51 }
 0x131   : > { %12979 = vmatprep.subr.mxu0 %v14191_v20  ;;  %12999 = vmatmul.mubr.f32.vlgmr.msra.gmra.mxu1 %v14406_v35 }
 0x132   : > { %13012 = vmatprep.subr.mxu1 %v14191_v20  ;;  %12980 = vmatpush3.msra.mxu0 %v14643_v26 }
 0x133   : > { %13013 = vmatpush3.msra.mxu1 %v14643_v26  ;;  %12981 = vmatprep.subr.mxu0 %v14191_v20 }
 0x134   : > { %13014 = vmatprep.subr.mxu1 %v14191_v20  ;;  %12982 = vmatpush3.msra.mxu0 %v14652_v28 }
 0x135   : > { %13015 = vmatpush3.msra.mxu1 %v14652_v28  ;;  %12983 = vmatprep.subr.mxu0 %v14191_v20 }
 0x136   : > { %13016 = vmatprep.subr.mxu1 %v14191_v20  ;;  %12984 = vmatpush3.msra.mxu0 %v14664_v31 }
 0x137   : > { %13017 = vmatpush3.msra.mxu1 %v14664_v31  ;;  %12985 = vmatprep.subr.mxu0 %v14191_v20 }
 0x138   : > { %13018 = vmatprep.subr.mxu1 %v14191_v20  ;;  %12986 = vmatpush3.msra.mxu0 %v14674_v33 }
 0x139   : > { %12987 = vmatprep.mubr.msk.f32.mxu0 %vm14192_vm1, %v14191_v20  ;;  %13019 = vmatpush3.msra.mxu1 %v14674_v33 }
 0x13a   : > { %13020 = vmatprep.mubr.msk.f32.mxu1 %vm14192_vm1, %v14191_v20  ;;  %12988 = vmatmul.mubr.f32.vlgmr.msra.gmra.mxu0 %v14443_v46  ;;  %v14813_v46 = vand.u32 4294901760, %v14791_v62 }
 0x13b   : > { %13001 = vmatprep.subr.mxu0 %v14191_v20  ;;  %13021 = vmatmul.mubr.f32.vlgmr.msra.gmra.mxu1 %v14425_v40  ;;  %v14819_v40 = vsub.f32 %v2234_v60, %v14796_v63  ;;  %v15042_v60 = vand.u32 4294901760, %v2242_v56 }
 0x13c   : > { %13034 = vmatprep.subr.mxu1 %v14191_v20  ;;  %13002 = vmatpush3.msra.mxu0 %v14662_v30  ;;  %v2396_v9 = vsub.f32 %v14791_v62, %v14813_v46 }
 0x13d   : > { %13035 = vmatpush3.msra.mxu1 %v14643_v26  ;;  %13003 = vmatprep.subr.mxu0 %v14191_v20  ;;  %v14842_v10 = vand.u32 4294901760, %v14819_v40  ;;  %v2239_v26 = vld [vmem:[%s16364_s3 + $0x28] sm:$0xff]  ;;  %v15062_v0 = vsub.f32 %v2242_v56, %v15042_v60 }
 0x13e   : > { %13036 = vmatprep.subr.mxu1 %v14191_v20  ;;  %13004 = vmatpush3.msra.mxu0 %v14672_v32  ;;  %v2397_v15 = vand.u32 4294901760, %v2396_v9  ;;  %v14929_v30 = vand.u32 4294901760, %v2239_v26 }
 0x13f   : > { %13037 = vmatpush3.msra.mxu1 %v14652_v28  ;;  %13005 = vmatprep.subr.mxu0 %v14191_v20  ;;  %v2410_v16 = vsub.f32 %v14819_v40, %v14842_v10  ;;  %v2238_v28 = vld [vmem:[%s16364_s3 + $0x20] sm:$0xff]  ;;  %v15080_v4 = vand.u32 4294901760, %v15062_v0 }
 0x140   : > { %13038 = vmatprep.subr.mxu1 %v14191_v20  ;;  %13006 = vmatpush3.msra.mxu0 %v14683_v36  ;;  %v14938_v32 = vand.u32 4294901760, %v2238_v28 }
 0x141   : > { %13039 = vmatpush3.msra.mxu1 %v14664_v31  ;;  %13007 = vmatprep.subr.mxu0 %v14191_v20  ;;  %v2411_v19 = vand.u32 4294901760, %v2410_v16  ;;  %v14936_v31 = vsub.f32 %v2240_v24, %v14917_v27  ;;  %v3466_v9 = vsub.f32 %v15062_v0, %v15080_v4 }
 0x142   : > { %13040 = vmatprep.subr.mxu1 %v14191_v20  ;;  %13008 = vmatpush3.msra.mxu0 %v14691_v39 }
 0x143   : > { %13009 = vmatprep.mubr.msk.f32.mxu0 %vm14192_vm1, %v14191_v20  ;;  %13041 = vmatpush3.msra.mxu1 %v14674_v33  ;;  %v14945_v33 = vand.u32 4294901760, %v14927_v29  ;;  %v14955_v36 = vand.u32 4294901760, %v14936_v31 }
 0x144   : > { %13042 = vmatprep.mubr.msk.f32.mxu1 %vm14192_vm1, %v14191_v20  ;;  %13010 = vmatmul.mubr.f32.vlgmr.msra.gmra.mxu0 %v14412_v37  ;;  %v2404_v37 = vand.u32 4294901760, %v2403_v12  ;;  %v2249_v12 = vld [vmem:[%s16364_s3 + $0x78] sm:$0xff] }
 0x145   : > { %13023 = vmatprep.subr.mxu0 %v14191_v20  ;;  %13043 = vmatmul.mubr.f32.vlgmr.msra.gmra.mxu1 %v14406_v35  ;;  %v2917_v39 = vsub.f32 %v14927_v29, %v14945_v33  ;;  %v15116_v16 = vand.u32 4294901760, %v2249_v12 }
 0x146   : > { %13024 = vmatpush3.msra.mxu0 %v1855_v34  ;;  %13031 = vmatprep.mubr.msk.f32.mxu0 %vm14192_vm1, %v14191_v20  ;;  %v14948_v34 = vsub.f32 %v2239_v26, %v14929_v30 }
 0x147   : > { %13025 = vmatprep.subr.mxu0 %v14191_v20  ;;  %13056 = vmatprep.subr.mxu1 %v2390_v11 }
 0x148   : > { %13026 = vmatpush3.msra.mxu0 %v1862_v38  ;;  %13057 = vmatpush3.msra.mxu1 %v2390_v11  ;;  %v14958_v38 = vsub.f32 %v2238_v28, %v14938_v32  ;;  %v14967_v41 = vand.u32 4294901760, %v14948_v34  ;;  %v3467_v11 = vand.u32 4294901760, %v3466_v9 }
 0x149   : > { %13027 = vmatprep.subr.mxu0 %v14191_v20  ;;  %13058 = vmatprep.subr.mxu1 %v2397_v15 }
 0x14a   : > { %13028 = vmatpush3.msra.mxu0 %v1869_v42  ;;  %13059 = vmatpush3.msra.mxu1 %v2397_v15  ;;  %v2924_v42 = vsub.f32 %v14936_v31, %v14955_v36  ;;  %v14976_v43 = vand.u32 4294901760, %v14958_v38  ;;  %v2931_v45 = vsub.f32 %v14948_v34, %v14967_v41  ;;  %v2248_v15 = vld [vmem:[%s16364_s3 + $0x70] sm:$0xff] }
 0x14b   : > { %13029 = vmatprep.subr.mxu0 %v14191_v20  ;;  %13060 = vmatprep.subr.mxu1 %v2404_v37  ;;  %v15125_v17 = vand.u32 4294901760, %v2248_v15 }
 0x14c   : > { %13030 = vmatpush3.msra.mxu0 %v1876_v44  ;;  %13061 = vmatpush3.msra.mxu1 %v2404_v37  ;;  %v2918_v44 = vand.u32 4294901760, %v2917_v39  ;;  %v2925_v47 = vand.u32 4294901760, %v2924_v42  ;;  %v2938_v48 = vsub.f32 %v14958_v38, %v14976_v43  ;;  %v2932_v49 = vand.u32 4294901760, %v2931_v45  ;;  %v2247_v37 = vld [vmem:[%s16364_s3 + $0x68] sm:$0xff] }
 0x14d   : > { %13032 = vmatmul.mubr.f32.vlgmr.msra.gmra.mxu0 %v14406_v35  ;;  %13045 = vmatprep.subr.mxu0 %v14761_v54  ;;  %v14892_v35 = vand.u32 4294901760, %v2354_v22  ;;  %v15135_v22 = vsub.f32 %v2249_v12, %v15116_v16  ;;  %v15137_v23 = vand.u32 4294901760, %v2247_v37  ;;  %v15144_v24 = vsub.f32 %v2248_v15, %v15125_v17 }
 0x14e   : > { %13046 = vmatpush3.msra.mxu0 %v14761_v54  ;;  %13062 = vmatprep.subr.mxu1 %v2411_v19  ;;  %v2939_v50 = vand.u32 4294901760, %v2938_v48 }
 0x14f   : > { %13047 = vmatprep.subr.mxu0 %v14770_v57  ;;  %13053 = vmatprep.mubr.f32.mxu0 %v14878_v21  ;;  %v15153_v26 = vand.u32 4294901760, %v15135_v22 }
 0x150   : > { %13048 = vmatpush3.msra.mxu0 %v14770_v57  ;;  %13063 = vmatpush3.msra.mxu1 %v2411_v19  ;;  %v2246_v19 = vld [vmem:[%s16364_s3 + $0x60] sm:$0xff] }
 0x151   : > { %13049 = vmatprep.subr.mxu0 %v14779_v59  ;;  %13064 = vmatprep.mubr.f32.mxu1 %v14798_v1 }
 0x152   : > { %13050 = vmatpush3.msra.mxu0 %v14779_v59  ;;  %13065 = vmatmul.mubr.f32.vlgmr.msra.gmra.mxu1 %v14833_v8 }
 0x153   : > { %13051 = vmatprep.subr.mxu0 %v14796_v63  ;;  %13078 = vmatprep.subr.mxu1 %v14761_v54 }
 0x154   : > { %13052 = vmatpush3.msra.mxu0 %v14796_v63  ;;  %13079 = vmatpush3.msra.mxu1 %v14761_v54 }
 0x155   : > { %13054 = vmatmul.mubr.f32.vlgmr.msra.gmra.mxu0 %v14892_v35  ;;  %13067 = vmatprep.subr.mxu0 %v14777_v58 }
 0x156   : > { %13068 = vmatpush3.msra.mxu0 %v14777_v58  ;;  %13080 = vmatprep.subr.mxu1 %v14770_v57 }
 0x157   : > { %13069 = vmatprep.subr.mxu0 %v14791_v62  ;;  %13081 = vmatpush3.msra.mxu1 %v14770_v57 }
 0x158   : > { %13070 = vmatpush3.msra.mxu0 %v14791_v62  ;;  %13082 = vmatprep.subr.mxu1 %v14779_v59 }
 0x159   : > { %13071 = vmatprep.subr.mxu0 %v14806_v3  ;;  %13083 = vmatpush3.msra.mxu1 %v14779_v59 }
 0x15a   : > { %13072 = vmatpush3.msra.mxu0 %v14806_v3  ;;  %13084 = vmatprep.subr.mxu1 %v14796_v63 }
 0x15b   : > { %13073 = vmatprep.subr.mxu0 %v14819_v40  ;;  %13075 = vmatprep.mubr.f32.mxu0 %v14822_v5 }
 0x15c   : > { %13074 = vmatpush3.msra.mxu0 %v14819_v40  ;;  %13085 = vmatpush3.msra.mxu1 %v14796_v63 }
 0x15d   : > { %13076 = vmatmul.mubr.f32.vlgmr.msra.gmra.mxu0 %v14856_v14  ;;  %13086 = vmatprep.mubr.f32.mxu1 %v14850_v13 }
 0x15e   : > { %13089 = vmatprep.subr.mxu0 %v14803_v2  ;;  %13100 = vmatprep.subr.mxu1 %v14761_v54 }
 0x15f   : > { %13087 = vmatmul.mubr.f32.vlgmr.msra.gmra.mxu1 %v14873_v18  ;;  %13090 = vmatpush3.msra.mxu0 %v14803_v2 }
 0x160   : > { %13101 = vmatpush3.msra.mxu1 %v14761_v54  ;;  %13091 = vmatprep.subr.mxu0 %v14813_v46  ;;  %v2243_v54 = vld [vmem:[%s16364_s3 + $0x48] sm:$0xff] }
 0x161   : > { %13102 = vmatprep.subr.mxu1 %v14770_v57  ;;  %13092 = vmatpush3.msra.mxu0 %v14813_v46  ;;  %v15033_v58 = vand.u32 4294901760, %v2243_v54 }
 0x162   : > { %13103 = vmatpush3.msra.mxu1 %v14770_v57  ;;  %13093 = vmatprep.subr.mxu0 %v14829_v7  ;;  %v15031_v57 = vsub.f32 %v2245_v51, %v15012_v53 }
 0x163   : > { %13104 = vmatprep.subr.mxu1 %v14779_v59  ;;  %13094 = vmatpush3.msra.mxu0 %v14829_v7  ;;  %v15052_v62 = vsub.f32 %v2243_v54, %v15033_v58 }
 0x164   : > { %13105 = vmatpush3.msra.mxu1 %v14779_v59  ;;  %13095 = vmatprep.subr.mxu0 %v14842_v10  ;;  %v15040_v59 = vsub.f32 %v2244_v52, %v15021_v55  ;;  %v15049_v61 = vand.u32 4294901760, %v15031_v57 }
 0x165   : > { %13106 = vmatprep.subr.mxu1 %v14796_v63  ;;  %13096 = vmatpush3.msra.mxu0 %v14842_v10  ;;  %v15071_v3 = vand.u32 4294901760, %v15052_v62 }
 0x166   : > { %13097 = vmatprep.mubr.f32.mxu0 %v14798_v1  ;;  %13107 = vmatpush3.msra.mxu1 %v14796_v63  ;;  %v15059_v63 = vand.u32 4294901760, %v15040_v59  ;;  %v3445_v2 = vsub.f32 %v15031_v57, %v15049_v61 }
 0x167   : > { %13108 = vmatprep.mubr.f32.mxu1 %v14798_v1  ;;  %13098 = vmatmul.mubr.f32.vlgmr.msra.gmra.mxu0 %v14833_v8  ;;  %v3459_v6 = vsub.f32 %v15052_v62, %v15071_v3 }
 0x168   : > { %13109 = vmatmul.mubr.f32.vlgmr.msra.gmra.mxu1 %v14833_v8  ;;  %13111 = vmatprep.subr.mxu0 %v14908_v25  ;;  %v3452_v46 = vsub.f32 %v15040_v59, %v15059_v63  ;;  %v3446_v40 = vand.u32 4294901760, %v3445_v2 }
 0x169   : > { %13122 = vmatprep.subr.mxu1 %v2918_v44  ;;  %13112 = vmatpush3.msra.mxu0 %v14908_v25  ;;  %v3460_v10 = vand.u32 4294901760, %v3459_v6 }
 0x16a   : > { %13123 = vmatpush3.msra.mxu1 %v2918_v44  ;;  %13113 = vmatprep.subr.mxu0 %v14917_v27  ;;  %v3453_v7 = vand.u32 4294901760, %v3452_v46 }
 0x16b   : > { %13124 = vmatprep.subr.mxu1 %v2925_v47  ;;  %13114 = vmatpush3.msra.mxu0 %v14917_v27 }
 0x16c   : > { %13125 = vmatpush3.msra.mxu1 %v2925_v47  ;;  %13115 = vmatprep.subr.mxu0 %v14929_v30 }
 0x16d   : > { %13126 = vmatprep.subr.mxu1 %v2932_v49  ;;  %13116 = vmatpush3.msra.mxu0 %v14929_v30 }
 0x16e   : > { %13127 = vmatpush3.msra.mxu1 %v2932_v49  ;;  %13117 = vmatprep.subr.mxu0 %v14938_v32 }
 0x16f   : > { %13128 = vmatprep.subr.mxu1 %v2939_v50  ;;  %13118 = vmatpush3.msra.mxu0 %v14938_v32 }
 0x170   : > { %13119 = vmatprep.mubr.f32.mxu0 %v14878_v21  ;;  %13129 = vmatpush3.msra.mxu1 %v2939_v50 }
 0x171   : > { %13130 = vmatprep.mubr.f32.mxu1 %v14798_v1  ;;  %13120 = vmatmul.mubr.f32.vlgmr.msra.gmra.mxu0 %v14892_v35 }
 0x172   : > { %13131 = vmatmul.mubr.f32.vlgmr.msra.gmra.mxu1 %v14833_v8  ;;  %13133 = vmatprep.subr.mxu0 %v14927_v29 }
 0x173   : > { %13144 = vmatprep.subr.mxu1 %v14908_v25  ;;  %13134 = vmatpush3.msra.mxu0 %v14927_v29  ;;  %v15163_v29 = vand.u32 4294901760, %v15144_v24 }
 0x174   : > { %13145 = vmatpush3.msra.mxu1 %v14908_v25  ;;  %13135 = vmatprep.subr.mxu0 %v14936_v31 }
 0x175   : > { %13146 = vmatprep.subr.mxu1 %v14917_v27  ;;  %13136 = vmatpush3.msra.mxu0 %v14936_v31 }
 0x176   : > { %13147 = vmatpush3.msra.mxu1 %v14917_v27  ;;  %13137 = vmatprep.subr.mxu0 %v14948_v34 }
 0x177   : > { %13148 = vmatprep.subr.mxu1 %v14929_v30  ;;  %13138 = vmatpush3.msra.mxu0 %v14948_v34  ;;  %v3980_v34 = vsub.f32 %v15144_v24, %v15163_v29 }
 0x178   : > { %13149 = vmatpush3.msra.mxu1 %v14929_v30  ;;  %13139 = vmatprep.subr.mxu0 %v14958_v38 }
 0x179   : > { %13150 = vmatprep.subr.mxu1 %v14938_v32  ;;  %13140 = vmatpush3.msra.mxu0 %v14958_v38 }
 0x17a   : > { %13141 = vmatprep.mubr.f32.mxu0 %v14822_v5  ;;  %13151 = vmatpush3.msra.mxu1 %v14938_v32 }
 0x17b   : > { %13142 = vmatmul.mubr.f32.vlgmr.msra.gmra.mxu0 %v14856_v14  ;;  %13152 = vmatprep.mubr.f32.mxu1 %v14850_v13 }
 0x17c   : > { %13155 = vmatprep.subr.mxu0 %v14945_v33  ;;  %13166 = vmatprep.subr.mxu1 %v14908_v25 }
 0x17d   : > { %13153 = vmatmul.mubr.f32.vlgmr.msra.gmra.mxu1 %v14873_v18  ;;  %13156 = vmatpush3.msra.mxu0 %v14945_v33 }
 0x17e   : > { %13167 = vmatpush3.msra.mxu1 %v14908_v25  ;;  %13157 = vmatprep.subr.mxu0 %v14955_v36  ;;  %v15146_v25 = vand.u32 4294901760, %v2246_v19 }
 0x17f   : > { %13168 = vmatprep.subr.mxu1 %v14917_v27  ;;  %13158 = vmatpush3.msra.mxu0 %v14955_v36 }
 0x180   : > { %13169 = vmatpush3.msra.mxu1 %v14917_v27  ;;  %13159 = vmatprep.subr.mxu0 %v14967_v41  ;;  %v15156_v27 = vsub.f32 %v2247_v37, %v15137_v23 }
 0x181   : > { %13170 = vmatprep.subr.mxu1 %v14929_v30  ;;  %13160 = vmatpush3.msra.mxu0 %v14967_v41 }
 0x182   : > { %13171 = vmatpush3.msra.mxu1 %v14929_v30  ;;  %13161 = vmatprep.subr.mxu0 %v14976_v43  ;;  %v15166_v30 = vsub.f32 %v2246_v19, %v15146_v25  ;;  %v15175_v33 = vand.u32 4294901760, %v15156_v27 }
 0x183   : > { %13172 = vmatprep.subr.mxu1 %v14938_v32  ;;  %13162 = vmatpush3.msra.mxu0 %v14976_v43  ;;  %v3981_v43 = vand.u32 4294901760, %v3980_v34 }
 0x184   : > { %13163 = vmatprep.mubr.f32.mxu0 %v14798_v1  ;;  %13173 = vmatpush3.msra.mxu1 %v14938_v32  ;;  %v3973_v32 = vsub.f32 %v15135_v22, %v15153_v26  ;;  %v15184_v36 = vand.u32 4294901760, %v15166_v30  ;;  %v3987_v39 = vsub.f32 %v15156_v27, %v15175_v33 }
 0x185   : > { %13174 = vmatprep.mubr.f32.mxu1 %v14798_v1  ;;  %13164 = vmatmul.mubr.f32.vlgmr.msra.gmra.mxu0 %v14833_v8 }
 0x186   : > { %13175 = vmatmul.mubr.f32.vlgmr.msra.gmra.mxu1 %v14833_v8  ;;  %13177 = vmatprep.subr.mxu0 %v15012_v53  ;;  %v3974_v38 = vand.u32 4294901760, %v3973_v32  ;;  %v3994_v44 = vsub.f32 %v15166_v30, %v15184_v36  ;;  %v3988_v49 = vand.u32 4294901760, %v3987_v39 }
 0x187   : > { %13188 = vmatprep.subr.mxu1 %v3446_v40  ;;  %13178 = vmatpush3.msra.mxu0 %v15012_v53 }
 0x188   : > { %13189 = vmatpush3.msra.mxu1 %v3446_v40  ;;  %13179 = vmatprep.subr.mxu0 %v15021_v55  ;;  %v3995_v50 = vand.u32 4294901760, %v3994_v44 }
 0x189   : > { %13190 = vmatprep.subr.mxu1 %v3453_v7  ;;  %13180 = vmatpush3.msra.mxu0 %v15021_v55 }
 0x18a   : > { %13191 = vmatpush3.msra.mxu1 %v3453_v7  ;;  %13181 = vmatprep.subr.mxu0 %v15033_v58 }
 0x18b   : > { %13192 = vmatprep.subr.mxu1 %v3460_v10  ;;  %13182 = vmatpush3.msra.mxu0 %v15033_v58 }
 0x18c   : > { %13193 = vmatpush3.msra.mxu1 %v3460_v10  ;;  %13183 = vmatprep.subr.mxu0 %v15042_v60 }
 0x18d   : > { %13194 = vmatprep.subr.mxu1 %v3467_v11  ;;  %13184 = vmatpush3.msra.mxu0 %v15042_v60 }
 0x18e   : > { %13185 = vmatprep.mubr.f32.mxu0 %v14878_v21  ;;  %13195 = vmatpush3.msra.mxu1 %v3467_v11 }
 0x18f   : > { %13196 = vmatprep.mubr.f32.mxu1 %v14798_v1  ;;  %13186 = vmatmul.mubr.f32.vlgmr.msra.gmra.mxu0 %v14892_v35 }
 0x190   : > { %13197 = vmatmul.mubr.f32.vlgmr.msra.gmra.mxu1 %v14833_v8  ;;  %13199 = vmatprep.subr.mxu0 %v15031_v57 }
 0x191   : > { %13210 = vmatprep.subr.mxu1 %v15012_v53  ;;  %13200 = vmatpush3.msra.mxu0 %v15031_v57 }
 0x192   : > { %13211 = vmatpush3.msra.mxu1 %v15012_v53  ;;  %13201 = vmatprep.subr.mxu0 %v15040_v59 }
 0x193   : > { %13212 = vmatprep.subr.mxu1 %v15021_v55  ;;  %13202 = vmatpush3.msra.mxu0 %v15040_v59 }
 0x194   : > { %13213 = vmatpush3.msra.mxu1 %v15021_v55  ;;  %13203 = vmatprep.subr.mxu0 %v15052_v62 }
 0x195   : > { %13214 = vmatprep.subr.mxu1 %v15033_v58  ;;  %13204 = vmatpush3.msra.mxu0 %v15052_v62 }
 0x196   : > { %13215 = vmatpush3.msra.mxu1 %v15033_v58  ;;  %13205 = vmatprep.subr.mxu0 %v15062_v0 }
 0x197   : > { %13216 = vmatprep.subr.mxu1 %v15042_v60  ;;  %13206 = vmatpush3.msra.mxu0 %v15062_v0  ;;  %v2250_v0 = vld [vmem:[%s16364_s3 + $0x80] sm:$0xff] }
 0x198   : > { %13207 = vmatprep.mubr.f32.mxu0 %v14822_v5  ;;  %13217 = vmatpush3.msra.mxu1 %v15042_v60  ;;  %v15252_v6 = vand.u32 4294901760, %v2250_v0 }
 0x199   : > { %13208 = vmatmul.mubr.f32.vlgmr.msra.gmra.mxu0 %v14856_v14  ;;  %13218 = vmatprep.mubr.f32.mxu1 %v14850_v13  ;;  %v460_v28 = vpop.f32.mrf.mxu1 }
 0x19a   : > { %13221 = vmatprep.subr.mxu0 %v15049_v61  ;;  %13232 = vmatprep.subr.mxu1 %v15012_v53  ;;  %v15274_v15 = vsub.f32 %v2250_v0, %v15252_v6 }
 0x19b   : > { %13219 = vmatmul.mubr.f32.vlgmr.msra.gmra.mxu1 %v14873_v18  ;;  %13222 = vmatpush3.msra.mxu0 %v15049_v61  ;;  %v12802_v31 = vpop.f32.mrf.mxu1 }
 0x19c   : > { %13233 = vmatpush3.msra.mxu1 %v15012_v53  ;;  %13223 = vmatprep.subr.mxu0 %v15059_v63 }
 0x19d   : > { %13234 = vmatprep.subr.mxu1 %v15021_v55  ;;  %13224 = vmatpush3.msra.mxu0 %v15059_v63 }
 0x19e   : > { %13235 = vmatpush3.msra.mxu1 %v15021_v55  ;;  %13225 = vmatprep.subr.mxu0 %v15071_v3  ;;  %v2253_v55 = vld [vmem:[%s16364_s3 + $0x98] sm:$0xff] }
 0x19f   : > { %13236 = vmatprep.subr.mxu1 %v15033_v58  ;;  %13226 = vmatpush3.msra.mxu0 %v15071_v3  ;;  %v15220_v59 = vand.u32 4294901760, %v2253_v55 }
 0x1a0   : > { %13237 = vmatpush3.msra.mxu1 %v15033_v58  ;;  %13227 = vmatprep.subr.mxu0 %v15080_v4  ;;  %v2252_v58 = vld [vmem:[%s16364_s3 + $0x90] sm:$0xff] }
 0x1a1   : > { %13238 = vmatprep.subr.mxu1 %v15042_v60  ;;  %13228 = vmatpush3.msra.mxu0 %v15080_v4  ;;  %v617_v41 = vpop.f32.mrf.mxu1  ;;  %v15229_v61 = vand.u32 4294901760, %v2252_v58  ;;  %v15236_v62 = vsub.f32 %v2253_v55, %v15220_v59 }
 0x1a2   : > { %13229 = vmatprep.mubr.f32.mxu0 %v14798_v1  ;;  %13239 = vmatpush3.msra.mxu1 %v15042_v60  ;;  %v369_v42 = vpop.f32.mrf.mxu0  ;;  %v2251_v60 = vld [vmem:[%s16364_s3 + $0x88] sm:$0xff] }
 0x1a3   : > { %13240 = vmatprep.mubr.f32.mxu1 %v14798_v1  ;;  %13230 = vmatmul.mubr.f32.vlgmr.msra.gmra.mxu0 %v14833_v8  ;;  %v461_v45 = vadd.f32 %v460_v28, %v369_v42  ;;  %v12824_v47 = vpop.f32.mrf.mxu1  ;;  %v15238_v63 = vand.u32 4294901760, %v2251_v60  ;;  %v15248_v4 = vsub.f32 %v2252_v58, %v15229_v61  ;;  %v15259_v9 = vand.u32 4294901760, %v15236_v62 }
 0x1a4   : > { %13241 = vmatmul.mubr.f32.vlgmr.msra.gmra.mxu1 %v14833_v8  ;;  %13243 = vmatprep.subr.mxu0 %v15116_v16  ;;  %v12791_v48 = vpop.f32.mrf.mxu0 }
 0x1a5   : > { %13254 = vmatprep.subr.mxu1 %v3974_v38  ;;  %13244 = vmatpush3.msra.mxu0 %v15116_v16  ;;  %v15262_v11 = vsub.f32 %v2251_v60, %v15238_v63  ;;  %v15269_v12 = vand.u32 4294901760, %v15248_v4  ;;  %v4501_v37 = vsub.f32 %v15236_v62, %v15259_v9  ;;  %v2254_v48 = vld [vmem:[%s16364_s3 + $0xa0] sm:$0xff] }
 0x1a6   : > { %13255 = vmatpush3.msra.mxu1 %v3974_v38  ;;  %13245 = vmatprep.subr.mxu0 %v15125_v17 }
 0x1a7   : > { %13256 = vmatprep.subr.mxu1 %v3981_v43  ;;  %13246 = vmatpush3.msra.mxu0 %v15125_v17  ;;  %v15281_v19 = vand.u32 4294901760, %v15262_v11 }
 0x1a8   : > { %13257 = vmatpush3.msra.mxu1 %v3981_v43  ;;  %13247 = vmatprep.subr.mxu0 %v15137_v23  ;;  %v2256_v43 = vld [vmem:[%s16364_s3 + $0xb0] sm:$0xff] }
 0x1a9   : > { %13258 = vmatprep.subr.mxu1 %v3988_v49  ;;  %13248 = vmatpush3.msra.mxu0 %v15137_v23  ;;  %v15337_v47 = vand.u32 4294901760, %v2256_v43 }
 0x1aa   : > { %13259 = vmatpush3.msra.mxu1 %v3988_v49  ;;  %13249 = vmatprep.subr.mxu0 %v15146_v25  ;;  %v540_v51 = vpop.f32.mrf.mxu0 }
 0x1ab   : > { %13260 = vmatprep.subr.mxu1 %v3995_v50  ;;  %13250 = vmatpush3.msra.mxu0 %v15146_v25  ;;  %v541_v52 = vadd.f32 %v540_v51, %v461_v45  ;;  %v775_v53 = vpop.f32.mrf.mxu1  ;;  %v2255_v45 = vld [vmem:[%s16364_s3 + $0xa8] sm:$0xff]  ;;  %v15356_v55 = vsub.f32 %v2256_v43, %v15337_v47 }
 0x1ac   : > { %13251 = vmatprep.mubr.f32.mxu0 %v14878_v21  ;;  %13261 = vmatpush3.msra.mxu1 %v3995_v50  ;;  %v12813_v54 = vpop.f32.mrf.mxu0  ;;  %v15349_v51 = vand.u32 4294901760, %v2255_v45 }
 0x1ad   : > { %13262 = vmatprep.mubr.f32.mxu1 %v14798_v1  ;;  %13252 = vmatmul.mubr.f32.vlgmr.msra.gmra.mxu0 %v14892_v35  ;;  %v12846_v56 = vpop.f32.mrf.mxu1  ;;  %v618_v57 = vadd.f32 %v617_v41, %v541_v52  ;;  %v2257_v41 = vld [vmem:[%s16364_s3 + $0xb8] sm:$0xff]  ;;  %v15377_v0 = vand.u32 4294901760, %v15356_v55 }
 0x1ae   : > { %13263 = vmatmul.mubr.f32.vlgmr.msra.gmra.mxu1 %v14833_v8  ;;  %13265 = vmatprep.subr.mxu0 %v15135_v22  ;;  %v15328_v44 = vand.u32 4294901760, %v2257_v41  ;;  %v15358_v56 = vand.u32 4294901760, %v2254_v48 }
 0x1af   : > { %13276 = vmatprep.subr.mxu1 %v15116_v16  ;;  %13266 = vmatpush3.msra.mxu0 %v15135_v22  ;;  %v15292_v22 = vand.u32 4294901760, %v15274_v15 }
 0x1b0   : > { %13277 = vmatpush3.msra.mxu1 %v15116_v16  ;;  %13267 = vmatprep.subr.mxu0 %v15144_v24  ;;  %v15347_v50 = vsub.f32 %v2257_v41, %v15328_v44 }
 0x1b1   : > { %13278 = vmatprep.subr.mxu1 %v15125_v17  ;;  %13268 = vmatpush3.msra.mxu0 %v15144_v24  ;;  %v4522_v31 = vsub.f32 %v15274_v15, %v15292_v22 }
 0x1b2   : > { %13279 = vmatpush3.msra.mxu1 %v15125_v17  ;;  %13269 = vmatprep.subr.mxu0 %v15156_v27  ;;  %v15367_v60 = vand.u32 4294901760, %v15347_v50 }
 0x1b3   : > { %13280 = vmatprep.subr.mxu1 %v15137_v23  ;;  %13270 = vmatpush3.msra.mxu0 %v15156_v27 }
 0x1b4   : > { %13281 = vmatpush3.msra.mxu1 %v15137_v23  ;;  %13271 = vmatprep.subr.mxu0 %v15166_v30  ;;  %v700_v2 = vpop.f32.mrf.mxu0 }
 0x1b5   : > { %13282 = vmatprep.subr.mxu1 %v15146_v25  ;;  %13272 = vmatpush3.msra.mxu0 %v15166_v30  ;;  %v701_v3 = vadd.f32 %v700_v2, %v618_v57  ;;  %v945_v46 = vpop.f32.mrf.mxu1  ;;  %v15380_v2 = vsub.f32 %v2254_v48, %v15358_v56 }
 0x1b6   : > { %13273 = vmatprep.mubr.f32.mxu0 %v14822_v5  ;;  %13283 = vmatpush3.msra.mxu1 %v15146_v25  ;;  %v12835_v40 = vpop.f32.mrf.mxu0 }
 0x1b7   : > { %13274 = vmatmul.mubr.f32.vlgmr.msra.gmra.mxu0 %v14856_v14  ;;  %13284 = vmatprep.mubr.f32.mxu1 %v14850_v13  ;;  %v15256_v7 = vadd.f32 %v775_v53, %v701_v3  ;;  %v12868_v10 = vpop.f32.mrf.mxu1  ;;  %v5029_v3 = vsub.f32 %v15347_v50, %v15367_v60 }
 0x1b8   : > { %13287 = vmatprep.subr.mxu0 %v15153_v26  ;;  %13298 = vmatprep.subr.mxu1 %v15116_v16 }
 0x1b9   : > { %13285 = vmatmul.mubr.f32.vlgmr.msra.gmra.mxu1 %v14873_v18  ;;  %13288 = vmatpush3.msra.mxu0 %v15153_v26  ;;  %v4515_v26 = vsub.f32 %v15262_v11, %v15281_v19 }
 0x1ba   : > { %13299 = vmatpush3.msra.mxu1 %v15116_v16  ;;  %13289 = vmatprep.subr.mxu0 %v15163_v29  ;;  %v4508_v16 = vsub.f32 %v15248_v4, %v15269_v12 }
 0x1bb   : > { %13300 = vmatprep.subr.mxu1 %v15125_v17  ;;  %13290 = vmatpush3.msra.mxu0 %v15163_v29  ;;  %v4516_v32 = vand.u32 4294901760, %v4515_v26 }
 0x1bc   : > { %13301 = vmatpush3.msra.mxu1 %v15125_v17  ;;  %13291 = vmatprep.subr.mxu0 %v15175_v33  ;;  %v4502_v17 = vand.u32 4294901760, %v4501_v37  ;;  %v4509_v29 = vand.u32 4294901760, %v4508_v16 }
 0x1bd   : > { %13302 = vmatprep.subr.mxu1 %v15137_v23  ;;  %13292 = vmatpush3.msra.mxu0 %v15175_v33 }
 0x1be   : > { %13303 = vmatpush3.msra.mxu1 %v15137_v23  ;;  %13293 = vmatprep.subr.mxu0 %v15184_v36  ;;  %v854_v24 = vpop.f32.mrf.mxu0 }
 0x1bf   : > { %13304 = vmatprep.subr.mxu1 %v15146_v25  ;;  %13294 = vmatpush3.msra.mxu0 %v15184_v36  ;;  %v946_v27 = vadd.f32 %v945_v46, %v854_v24  ;;  %v1102_v28 = vpop.f32.mrf.mxu1 }
 0x1c0   : > { %13295 = vmatprep.mubr.f32.mxu0 %v14798_v1  ;;  %13305 = vmatpush3.msra.mxu1 %v15146_v25  ;;  %v12857_v23 = vpop.f32.mrf.mxu0  ;;  %v4523_v25 = vand.u32 4294901760, %v4522_v31 }
 0x1c1   : > { %13306 = vmatprep.mubr.f32.mxu1 %v14798_v1  ;;  %13296 = vmatmul.mubr.f32.vlgmr.msra.gmra.mxu0 %v14833_v8  ;;  %v12890_v30 = vpop.f32.mrf.mxu1  ;;  %v2260_v23 = vld [vmem:[%s16364_s3 + $0xd0] sm:$0xff] }
 0x1c2   : > { %13307 = vmatmul.mubr.f32.vlgmr.msra.gmra.mxu1 %v14833_v8  ;;  %13309 = vmatprep.subr.mxu0 %v15220_v59  ;;  %v2259_v30 = vld [vmem:[%s16364_s3 + $0xc8] sm:$0xff]  ;;  %v15443_v31 = vand.u32 4294901760, %v2260_v23 }
 0x1c3   : > { %13310 = vmatpush3.msra.mxu0 %v15220_v59  ;;  %13320 = vmatprep.subr.mxu1 %v4502_v17 }
 0x1c4   : > { %13311 = vmatprep.subr.mxu0 %v15229_v61  ;;  %13321 = vmatpush3.msra.mxu1 %v4502_v17  ;;  %v15462_v41 = vsub.f32 %v2260_v23, %v15443_v31 }
 0x1c5   : > { %13312 = vmatpush3.msra.mxu0 %v15229_v61  ;;  %13322 = vmatprep.subr.mxu1 %v4509_v29 }
 0x1c6   : > { %13313 = vmatprep.subr.mxu0 %v15238_v63  ;;  %13323 = vmatpush3.msra.mxu1 %v4509_v29 }
 0x1c7   : > { %13314 = vmatpush3.msra.mxu0 %v15238_v63  ;;  %13324 = vmatprep.subr.mxu1 %v4516_v32 }
 0x1c8   : > { %13315 = vmatprep.subr.mxu0 %v15252_v6  ;;  %13325 = vmatpush3.msra.mxu1 %v4516_v32  ;;  %v1025_v33 = vpop.f32.mrf.mxu0  ;;  %v2258_v32 = vld [vmem:[%s16364_s3 + $0xc0] sm:$0xff] }
 0x1c9   : > { %13316 = vmatpush3.msra.mxu0 %v15252_v6  ;;  %13317 = vmatprep.mubr.f32.mxu0 %v14878_v21  ;;  %v1026_v34 = vadd.f32 %v1025_v33, %v946_v27  ;;  %v1260_v36 = vpop.f32.mrf.mxu1  ;;  %v2261_v27 = vld [vmem:[%s16364_s3 + $0xd8] sm:$0xff] }
 0x1ca   : > { %13326 = vmatprep.subr.mxu1 %v4523_v25  ;;  %13331 = vmatprep.subr.mxu0 %v15236_v62  ;;  %v12879_v38 = vpop.f32.mrf.mxu0  ;;  %v15434_v29 = vand.u32 4294901760, %v2261_v27 }
 0x1cb   : > { %13318 = vmatmul.mubr.f32.vlgmr.msra.gmra.mxu0 %v14892_v35  ;;  %13327 = vmatpush3.msra.mxu1 %v4523_v25  ;;  %v12912_v39 = vpop.f32.mrf.mxu1  ;;  %v1103_v42 = vadd.f32 %v1102_v28, %v1026_v34  ;;  %v15455_v34 = vand.u32 4294901760, %v2259_v30 }
 0x1cc   : > { %13332 = vmatpush3.msra.mxu0 %v15236_v62  ;;  %13328 = vmatprep.mubr.f32.mxu1 %v14798_v1  ;;  %v15370_v62 = vsub.f32 %v2255_v45, %v15349_v51  ;;  %v15453_v33 = vsub.f32 %v2261_v27, %v15434_v29 }
 0x1cd   : > { %13333 = vmatprep.subr.mxu0 %v15248_v4  ;;  %13342 = vmatprep.subr.mxu1 %v15220_v59 }
 0x1ce   : > { %13329 = vmatmul.mubr.f32.vlgmr.msra.gmra.mxu1 %v14833_v8  ;;  %13334 = vmatpush3.msra.mxu0 %v15248_v4  ;;  %v15389_v46 = vand.u32 4294901760, %v15370_v62  ;;  %v15398_v4 = vand.u32 4294901760, %v15380_v2  ;;  %v15473_v48 = vand.u32 4294901760, %v15453_v33 }
 0x1cf   : > { %13343 = vmatpush3.msra.mxu1 %v15220_v59  ;;  %13335 = vmatprep.subr.mxu0 %v15262_v11 }
 0x1d0   : > { %13344 = vmatprep.subr.mxu1 %v15229_v61  ;;  %13336 = vmatpush3.msra.mxu0 %v15262_v11  ;;  %v5043_v11 = vsub.f32 %v15370_v62, %v15389_v46  ;;  %v5050_v37 = vsub.f32 %v15380_v2, %v15398_v4 }
 0x1d1   : > { %13345 = vmatpush3.msra.mxu1 %v15229_v61  ;;  %13337 = vmatprep.subr.mxu0 %v15274_v15 }
 0x1d2   : > { %13346 = vmatprep.subr.mxu1 %v15238_v63  ;;  %13338 = vmatpush3.msra.mxu0 %v15274_v15  ;;  %v1185_v49 = vpop.f32.mrf.mxu0 }
 0x1d3   : > { %13347 = vmatpush3.msra.mxu1 %v15238_v63  ;;  %13339 = vmatprep.mubr.f32.mxu0 %v14822_v5  ;;  %v1186_v52 = vadd.f32 %v1185_v49, %v1103_v42  ;;  %v1430_v53 = vpop.f32.mrf.mxu1  ;;  %v15464_v42 = vand.u32 4294901760, %v2258_v32  ;;  %v15476_v49 = vsub.f32 %v2259_v30, %v15455_v34 }
 0x1d4   : > { %13348 = vmatprep.subr.mxu1 %v15252_v6  ;;  %13353 = vmatprep.subr.mxu0 %v15259_v9  ;;  %v12901_v54 = vpop.f32.mrf.mxu0 }
 0x1d5   : > { %13340 = vmatmul.mubr.f32.vlgmr.msra.gmra.mxu0 %v14856_v14  ;;  %13349 = vmatpush3.msra.mxu1 %v15252_v6  ;;  %v15362_v57 = vadd.f32 %v1260_v36, %v1186_v52  ;;  %v12934_v58 = vpop.f32.mrf.mxu1  ;;  %v15486_v52 = vsub.f32 %v2258_v32, %v15464_v42  ;;  %v15495_v54 = vand.u32 4294901760, %v15476_v49 }
 0x1d6   : > { %13354 = vmatpush3.msra.mxu0 %v15259_v9  ;;  %13350 = vmatprep.mubr.f32.mxu1 %v14850_v13 }
 0x1d7   : > { %13355 = vmatprep.subr.mxu0 %v15269_v12  ;;  %13364 = vmatprep.subr.mxu1 %v15220_v59 }
 0x1d8   : > { %13351 = vmatmul.mubr.f32.vlgmr.msra.gmra.mxu1 %v14873_v18  ;;  %13356 = vmatpush3.msra.mxu0 %v15269_v12 }
 0x1d9   : > { %13365 = vmatpush3.msra.mxu1 %v15220_v59  ;;  %13357 = vmatprep.subr.mxu0 %v15281_v19  ;;  %v5036_v59 = vsub.f32 %v15356_v55, %v15377_v0 }
 0x1da   : > { %13366 = vmatprep.subr.mxu1 %v15229_v61  ;;  %13358 = vmatpush3.msra.mxu0 %v15281_v19  ;;  %v5044_v19 = vand.u32 4294901760, %v5043_v11  ;;  %v2265_v11 = vld [vmem:[%s16364_s3 + $0xf8] sm:$0xff] }
 0x1db   : > { %13367 = vmatpush3.msra.mxu1 %v15229_v61  ;;  %13359 = vmatprep.subr.mxu0 %v15292_v22  ;;  %v5030_v61 = vand.u32 4294901760, %v5029_v3 }
 0x1dc   : > { %13368 = vmatprep.subr.mxu1 %v15238_v63  ;;  %13360 = vmatpush3.msra.mxu0 %v15292_v22  ;;  %v1339_v40 = vpop.f32.mrf.mxu0 }
 0x1dd   : > { %13361 = vmatprep.mubr.f32.mxu0 %v14798_v1  ;;  %13369 = vmatpush3.msra.mxu1 %v15238_v63  ;;  %v1431_v9 = vadd.f32 %v1430_v53, %v1339_v40  ;;  %v1587_v10 = vpop.f32.mrf.mxu1  ;;  %v5037_v63 = vand.u32 4294901760, %v5036_v59  ;;  %v5557_v53 = vsub.f32 %v15453_v33, %v15473_v48 }
 0x1de   : > { %13362 = vmatmul.mubr.f32.vlgmr.msra.gmra.mxu0 %v14833_v8  ;;  %13370 = vmatprep.subr.mxu1 %v15252_v6  ;;  %v12923_v12 = vpop.f32.mrf.mxu0 }
 0x1df   : > { %13375 = vmatprep.subr.mxu0 %v15328_v44  ;;  %13371 = vmatpush3.msra.mxu1 %v15252_v6  ;;  %v12956_v15 = vpop.f32.mrf.mxu1  ;;  %v5051_v6 = vand.u32 4294901760, %v5050_v37  ;;  %v2263_v37 = vld [vmem:[%s16364_s3 + $0xe8] sm:$0xff] }
 0x1e0   : > { %13372 = vmatprep.mubr.f32.mxu1 %v14798_v1  ;;  %13376 = vmatpush3.msra.mxu0 %v15328_v44  ;;  %v2264_v15 = vld [vmem:[%s16364_s3 + $0xf0] sm:$0xff] }
 0x1e1   : > { %13373 = vmatmul.mubr.f32.vlgmr.msra.gmra.mxu1 %v14833_v8  ;;  %13377 = vmatprep.subr.mxu0 %v15337_v47 }
 0x1e2   : > { %13386 = vmatprep.subr.mxu1 %v5030_v61  ;;  %13378 = vmatpush3.msra.mxu0 %v15337_v47 }
 0x1e3   : > { %13387 = vmatpush3.msra.mxu1 %v5030_v61  ;;  %13379 = vmatprep.subr.mxu0 %v15349_v51 }
 0x1e4   : > { %13388 = vmatprep.subr.mxu1 %v5037_v63  ;;  %13380 = vmatpush3.msra.mxu0 %v15349_v51 }
 0x1e5   : > { %13389 = vmatpush3.msra.mxu1 %v5037_v63  ;;  %13381 = vmatprep.subr.mxu0 %v15358_v56  ;;  %v15540_v63 = vand.u32 4294901760, %v2265_v11 }
 0x1e6   : > { %13390 = vmatprep.subr.mxu1 %v5044_v19  ;;  %13382 = vmatpush3.msra.mxu0 %v15358_v56  ;;  %v1510_v16 = vpop.f32.mrf.mxu0 }
 0x1e7   : > { %13391 = vmatpush3.msra.mxu1 %v5044_v19  ;;  %13383 = vmatprep.mubr.f32.mxu0 %v14878_v21  ;;  %v1511_v22 = vadd.f32 %v1510_v16, %v1431_v9  ;;  %v1745_v24 = vpop.f32.mrf.mxu1  ;;  %v15549_v19 = vand.u32 4294901760, %v2264_v15  ;;  %v2262_v16 = vld [vmem:[%s16364_s3 + $0xe0] sm:$0xff] }
 0x1e8   : > { %13392 = vmatprep.subr.mxu1 %v5051_v6  ;;  %13397 = vmatprep.subr.mxu0 %v15347_v50  ;;  %v12945_v17 = vpop.f32.mrf.mxu0  ;;  %v15572_v23 = vand.u32 4294901760, %v2262_v16 }
 0x1e9   : > { %13384 = vmatmul.mubr.f32.vlgmr.msra.gmra.mxu0 %v14892_v35  ;;  %13393 = vmatpush3.msra.mxu1 %v5051_v6  ;;  %v12978_v26 = vpop.f32.mrf.mxu1  ;;  %v1588_v28 = vadd.f32 %v1587_v10, %v1511_v22  ;;  %v15561_v17 = vand.u32 4294901760, %v2263_v37 }
 0x1ea   : > { %13398 = vmatpush3.msra.mxu0 %v15347_v50  ;;  %13394 = vmatprep.mubr.f32.mxu1 %v14798_v1  ;;  %v15483_v50 = vand.u32 4294901760, %v15462_v41 }
 0x1eb   : > { %13399 = vmatprep.subr.mxu0 %v15356_v55  ;;  %13408 = vmatprep.subr.mxu1 %v15328_v44  ;;  %v15582_v32 = vsub.f32 %v2263_v37, %v15561_v17 }
 0x1ec   : > { %13395 = vmatmul.mubr.f32.vlgmr.msra.gmra.mxu1 %v14833_v8  ;;  %13400 = vmatpush3.msra.mxu0 %v15356_v55  ;;  %v15504_v55 = vand.u32 4294901760, %v15486_v52 }
 0x1ed   : > { %13409 = vmatpush3.msra.mxu1 %v15328_v44  ;;  %13401 = vmatprep.subr.mxu0 %v15370_v62 }
 0x1ee   : > { %13410 = vmatprep.subr.mxu1 %v15337_v47  ;;  %13402 = vmatpush3.msra.mxu0 %v15370_v62 }
 0x1ef   : > { %13411 = vmatpush3.msra.mxu1 %v15337_v47  ;;  %13403 = vmatprep.subr.mxu0 %v15380_v2 }
 0x1f0   : > { %13412 = vmatprep.subr.mxu1 %v15349_v51  ;;  %13404 = vmatpush3.msra.mxu0 %v15380_v2  ;;  %v1670_v25 = vpop.f32.mrf.mxu0 }
 0x1f1   : > { %13413 = vmatpush3.msra.mxu1 %v15349_v51  ;;  %13405 = vmatprep.mubr.f32.mxu0 %v14822_v5  ;;  %v1671_v36 = vadd.f32 %v1670_v25, %v1588_v28  ;;  %v1915_v38 = vpop.f32.mrf.mxu1  ;;  %v15570_v28 = vsub.f32 %v2264_v15, %v15549_v19 }
 0x1f2   : > { %13414 = vmatprep.subr.mxu1 %v15358_v56  ;;  %13419 = vmatprep.subr.mxu0 %v15367_v60  ;;  %v12967_v39 = vpop.f32.mrf.mxu0 }
 0x1f3   : > { %13406 = vmatmul.mubr.f32.vlgmr.msra.gmra.mxu0 %v14856_v14  ;;  %13415 = vmatpush3.msra.mxu1 %v15358_v56  ;;  %v15468_v43 = vadd.f32 %v1745_v24, %v1671_v36  ;;  %v13000_v45 = vpop.f32.mrf.mxu1  ;;  %v15559_v24 = vsub.f32 %v2265_v11, %v15540_v63  ;;  %v15589_v25 = vand.u32 4294901760, %v15570_v28 }
 0x1f4   : > { %13420 = vmatpush3.msra.mxu0 %v15367_v60  ;;  %13416 = vmatprep.mubr.f32.mxu1 %v14850_v13 }
 0x1f5   : > { %13421 = vmatprep.subr.mxu0 %v15377_v0  ;;  %13430 = vmatprep.subr.mxu1 %v15328_v44  ;;  %v15579_v30 = vand.u32 4294901760, %v15559_v24 }
 0x1f6   : > { %13417 = vmatmul.mubr.f32.vlgmr.msra.gmra.mxu1 %v14873_v18  ;;  %13422 = vmatpush3.msra.mxu0 %v15377_v0  ;;  %v5571_v0 = vsub.f32 %v15476_v49, %v15495_v54 }
 0x1f7   : > { %13431 = vmatpush3.msra.mxu1 %v15328_v44  ;;  %13423 = vmatprep.subr.mxu0 %v15389_v46  ;;  %v5564_v44 = vsub.f32 %v15462_v41, %v15483_v50  ;;  %v6085_v36 = vsub.f32 %v15559_v24, %v15579_v30 }
 0x1f8   : > { %13432 = vmatprep.subr.mxu1 %v15337_v47  ;;  %13424 = vmatpush3.msra.mxu0 %v15389_v46  ;;  %v5578_v46 = vsub.f32 %v15486_v52, %v15504_v55  ;;  %v5572_v59 = vand.u32 4294901760, %v5571_v0 }
 0x1f9   : > { %13433 = vmatpush3.msra.mxu1 %v15337_v47  ;;  %13425 = vmatprep.subr.mxu0 %v15398_v4  ;;  %v5558_v47 = vand.u32 4294901760, %v5557_v53 }
 0x1fa   : > { %13434 = vmatprep.subr.mxu1 %v15349_v51  ;;  %13426 = vmatpush3.msra.mxu0 %v15398_v4  ;;  %v1824_v58 = vpop.f32.mrf.mxu0 }
 0x1fb   : > { %13427 = vmatprep.mubr.f32.mxu0 %v14798_v1  ;;  %13435 = vmatpush3.msra.mxu1 %v15349_v51  ;;  %v1916_v60 = vadd.f32 %v1915_v38, %v1824_v58  ;;  %v2072_v62 = vpop.f32.mrf.mxu1  ;;  %v5565_v51 = vand.u32 4294901760, %v5564_v44  ;;  %v15601_v38 = vand.u32 4294901760, %v15582_v32 }
 0x1fc   : > { %13428 = vmatmul.mubr.f32.vlgmr.msra.gmra.mxu0 %v14833_v8  ;;  %13436 = vmatprep.subr.mxu1 %v15358_v56  ;;  %v12989_v2 = vpop.f32.mrf.mxu0 }
 0x1fd   : > { %13441 = vmatprep.subr.mxu0 %v15434_v29  ;;  %13437 = vmatpush3.msra.mxu1 %v15358_v56  ;;  %v13022_v3 = vpop.f32.mrf.mxu1  ;;  %v5579_v56 = vand.u32 4294901760, %v5578_v46  ;;  %v6099_v45 = vsub.f32 %v15582_v32, %v15601_v38 }
 0x1fe   : > { %13438 = vmatprep.mubr.f32.mxu1 %v14798_v1  ;;  %13442 = vmatpush3.msra.mxu0 %v15434_v29 }
 0x1ff   : > { %13439 = vmatmul.mubr.f32.vlgmr.msra.gmra.mxu1 %v14833_v8  ;;  %13443 = vmatprep.subr.mxu0 %v15443_v31  ;;  %v6100_v53 = vand.u32 4294901760, %v6099_v45 }
 0x200   : > { %13452 = vmatprep.subr.mxu1 %v5558_v47  ;;  %13444 = vmatpush3.msra.mxu0 %v15443_v31 }
 0x201   : > { %13453 = vmatpush3.msra.mxu1 %v5558_v47  ;;  %13445 = vmatprep.subr.mxu0 %v15455_v34 }
 0x202   : > { %13454 = vmatprep.subr.mxu1 %v5565_v51  ;;  %13446 = vmatpush3.msra.mxu0 %v15455_v34 }
 0x203   : > { %13455 = vmatpush3.msra.mxu1 %v5565_v51  ;;  %13447 = vmatprep.subr.mxu0 %v15464_v42 }
 0x204   : > { %13456 = vmatprep.subr.mxu1 %v5572_v59  ;;  %13448 = vmatpush3.msra.mxu0 %v15464_v42  ;;  %v1995_v4 = vpop.f32.mrf.mxu0 }
 0x205   : > { %13457 = vmatpush3.msra.mxu1 %v5572_v59  ;;  %13449 = vmatprep.mubr.f32.mxu0 %v14878_v21  ;;  %v1996_v40 = vadd.f32 %v1995_v4, %v1916_v60  ;;  %v2230_v9 = vpop.f32.mrf.mxu1 }
 0x206   : > { %13458 = vmatprep.subr.mxu1 %v5579_v56  ;;  %13463 = vmatprep.subr.mxu0 %v15453_v33  ;;  %v13011_v10 = vpop.f32.mrf.mxu0 }
 0x207   : > { %13450 = vmatmul.mubr.f32.vlgmr.msra.gmra.mxu0 %v14892_v35  ;;  %13459 = vmatpush3.msra.mxu1 %v5579_v56  ;;  %v13044_v61 = vpop.f32.mrf.mxu1  ;;  %v2073_v12 = vadd.f32 %v2072_v62, %v1996_v40  ;;  %v6498_v10 = vsel %vm6496_vm2, %v15256_v7, 0 }
 0x208   : > { %13464 = vmatpush3.msra.mxu0 %v15453_v33  ;;  %13460 = vmatprep.mubr.f32.mxu1 %v14798_v1  ;;  %v15592_v33 = vsub.f32 %v2262_v16, %v15572_v23  ;;  %v15665_v15 = vand.u32 4294901760, %v6498_v10 }
 0x209   : > { %13465 = vmatprep.subr.mxu0 %v15462_v41  ;;  %13474 = vmatprep.subr.mxu1 %v15434_v29 }
 0x20a   : > { %13461 = vmatmul.mubr.f32.vlgmr.msra.gmra.mxu1 %v14833_v8  ;;  %13466 = vmatpush3.msra.mxu0 %v15462_v41  ;;  %v15610_v41 = vand.u32 4294901760, %v15592_v33  ;;  %v15680_v37 = vsub.f32 %v6498_v10, %v15665_v15 }
 0x20b   : > { %13475 = vmatpush3.msra.mxu1 %v15434_v29  ;;  %13467 = vmatprep.subr.mxu0 %v15476_v49 }
 0x20c   : > { %13476 = vmatprep.subr.mxu1 %v15443_v31  ;;  %13468 = vmatpush3.msra.mxu0 %v15476_v49 }
 0x20d   : > { %13477 = vmatpush3.msra.mxu1 %v15443_v31  ;;  %13469 = vmatprep.subr.mxu0 %v15486_v52  ;;  %v2155_v6 = vpop.f32.mrf.mxu0 }
 0x20e   : > { %13478 = vmatprep.subr.mxu1 %v15455_v34  ;;  %13470 = vmatpush3.msra.mxu0 %v15486_v52  ;;  %v2156_v22 = vadd.f32 %v2155_v6, %v2073_v12 }
 0x20f   : > { %13479 = vmatpush3.msra.mxu1 %v15455_v34  ;;  %13471 = vmatprep.mubr.f32.mxu0 %v14822_v5  ;;  %v13033_v26 = vpop.f32.mrf.mxu0 }
 0x210   : > { %13480 = vmatprep.subr.mxu1 %v15464_v42  ;;  %13485 = vmatprep.subr.mxu0 %v15473_v48  ;;  %v15567_v27 = vadd.f32 %v2230_v9, %v2156_v22 }
 0x211   : > { %13472 = vmatmul.mubr.f32.vlgmr.msra.gmra.mxu0 %v14856_v14  ;;  %13481 = vmatpush3.msra.mxu1 %v15464_v42 }
 0x212   : > { %13486 = vmatpush3.msra.mxu0 %v15473_v48  ;;  %13482 = vmatprep.mubr.f32.mxu1 %v14850_v13  ;;  %v13066_v48 = vpop.f32.mrf.mxu1 }
 0x213   : > { %13487 = vmatprep.subr.mxu0 %v15483_v50  ;;  %13496 = vmatprep.subr.mxu1 %v15434_v29 }
 0x214   : > { %13483 = vmatmul.mubr.f32.vlgmr.msra.gmra.mxu1 %v14873_v18  ;;  %13488 = vmatpush3.msra.mxu0 %v15483_v50 }
 0x215   : > { %13497 = vmatpush3.msra.mxu1 %v15434_v29  ;;  %13489 = vmatprep.subr.mxu0 %v15495_v54  ;;  %v13055_v39 = vpop.f32.mrf.mxu0  ;;  %v6092_v29 = vsub.f32 %v15570_v28, %v15589_v25 }
 0x216   : > { %13498 = vmatprep.subr.mxu1 %v15443_v31  ;;  %13490 = vmatpush3.msra.mxu0 %v15495_v54  ;;  %v2455_v44 = vadd.f32 %v13066_v48, %v13055_v39 }
 0x217   : > { %13499 = vmatpush3.msra.mxu1 %v15443_v31  ;;  %13491 = vmatprep.subr.mxu0 %v15504_v55  ;;  %v6086_v31 = vand.u32 4294901760, %v6085_v36  ;;  %v2347_v49 = vpop.f32.mrf.mxu0  ;;  %v6093_v50 = vand.u32 4294901760, %v6092_v29  ;;  %v6966_v29 = vsel %vm6496_vm2, %v15362_v57, 0 }
 0x218   : > { %13500 = vmatprep.subr.mxu1 %v15455_v34  ;;  %13492 = vmatpush3.msra.mxu0 %v15504_v55 }
 0x219   : > { %13493 = vmatprep.mubr.f32.mxu0 %v14798_v1  ;;  %13501 = vmatpush3.msra.mxu1 %v15455_v34  ;;  %v6106_v34 = vsub.f32 %v15592_v33, %v15610_v41 }
 0x21a   : > { %13494 = vmatmul.mubr.f32.vlgmr.msra.gmra.mxu0 %v14833_v8  ;;  %13502 = vmatprep.subr.mxu1 %v15464_v42 }
 0x21b   : > { %13507 = vmatprep.subr.mxu0 %v15540_v63  ;;  %13503 = vmatpush3.msra.mxu1 %v15464_v42  ;;  %v2448_v42 = vpop.f32.mrf.mxu1  ;;  %v6107_v54 = vand.u32 4294901760, %v6106_v34 }
 0x21c   : > { %13504 = vmatprep.mubr.f32.mxu1 %v14798_v1  ;;  %13508 = vmatpush3.msra.mxu0 %v15540_v63  ;;  %v2449_v60 = vadd.f32 %v2448_v42, %v2347_v49 }
 0x21d   : > { %13505 = vmatmul.mubr.f32.vlgmr.msra.gmra.mxu1 %v14833_v8  ;;  %13509 = vmatprep.subr.mxu0 %v15549_v19  ;;  %v13077_v52 = vpop.f32.mrf.mxu0 }
 0x21e   : > { %13518 = vmatprep.subr.mxu1 %v6086_v31  ;;  %13510 = vmatpush3.msra.mxu0 %v15549_v19  ;;  %v2542_v62 = vadd.f32 %v13077_v52, %v2455_v44 }
 0x21f   : > { %13519 = vmatpush3.msra.mxu1 %v6086_v31  ;;  %13511 = vmatprep.subr.mxu0 %v15561_v17  ;;  %v13088_v55 = vpop.f32.mrf.mxu1  ;;  %v2534_v58 = vpop.f32.mrf.mxu0 }
 0x220   : > { %13520 = vmatprep.subr.mxu1 %v6093_v50  ;;  %13512 = vmatpush3.msra.mxu0 %v15561_v17  ;;  %v2535_v47 = vadd.f32 %v2534_v58, %v2449_v60  ;;  %v2627_v2 = vadd.f32 %v13088_v55, %v2542_v62 }
 0x221   : > { %13521 = vmatpush3.msra.mxu1 %v6093_v50  ;;  %13513 = vmatprep.subr.mxu0 %v15572_v23  ;;  %v2618_v0 = vpop.f32.mrf.mxu1  ;;  %v15730_v50 = vand.u32 4294901760, %v6966_v29 }
 0x222   : > { %13522 = vmatprep.subr.mxu1 %v6100_v53  ;;  %13514 = vmatpush3.msra.mxu0 %v15572_v23 }
 0x223   : > { %13523 = vmatpush3.msra.mxu1 %v6100_v53  ;;  %13515 = vmatprep.mubr.f32.mxu0 %v14878_v21  ;;  %v2619_v21 = vadd.f32 %v2618_v0, %v2535_v47  ;;  %v15744_v44 = vsub.f32 %v6966_v29, %v15730_v50 }
 0x224   : > { %13524 = vmatprep.subr.mxu1 %v6107_v54  ;;  %13529 = vmatprep.subr.mxu0 %v15559_v24 }
 0x225   : > { %13516 = vmatmul.mubr.f32.vlgmr.msra.gmra.mxu0 %v14892_v35  ;;  %13525 = vmatpush3.msra.mxu1 %v6107_v54  ;;  %v7043_v0 = vand.u32 4294901760, %v15744_v44 }
 0x226   : > { %13530 = vmatpush3.msra.mxu0 %v15559_v24  ;;  %13526 = vmatprep.mubr.f32.mxu1 %v14798_v1 }
 0x227   : > { %13531 = vmatprep.subr.mxu0 %v15570_v28  ;;  %13540 = vmatprep.subr.mxu1 %v15540_v63  ;;  %v13099_v3 = vpop.f32.mrf.mxu0 }
 0x228   : > { %13527 = vmatmul.mubr.f32.vlgmr.msra.gmra.mxu1 %v14833_v8  ;;  %13532 = vmatpush3.msra.mxu0 %v15570_v28  ;;  %v2716_v51 = vadd.f32 %v13099_v3, %v2627_v2  ;;  %v13110_v46 = vpop.f32.mrf.mxu1 }
 0x229   : > { %13541 = vmatpush3.msra.mxu1 %v15540_v63  ;;  %13533 = vmatprep.subr.mxu0 %v15582_v32  ;;  %v2709_v35 = vpop.f32.mrf.mxu0 }
 0x22a   : > { %13542 = vmatprep.subr.mxu1 %v15549_v19  ;;  %13534 = vmatpush3.msra.mxu0 %v15582_v32  ;;  %v2797_v59 = vadd.f32 %v13110_v46, %v2716_v51  ;;  %v2710_v56 = vadd.f32 %v2709_v35, %v2619_v21  ;;  %v2790_v4 = vpop.f32.mrf.mxu1  ;;  %v7044_v35 = vsub.f32 %v15744_v44, %v7043_v0 }
 0x22b   : > { %13543 = vmatpush3.msra.mxu1 %v15549_v19  ;;  %13535 = vmatprep.subr.mxu0 %v15592_v33 }
 0x22c   : > { %13544 = vmatprep.subr.mxu1 %v15561_v17  ;;  %13536 = vmatpush3.msra.mxu0 %v15592_v33  ;;  %v6504_v40 = vsel %vm6496_vm2, %v2797_v59, 0  ;;  %v2791_v9 = vadd.f32 %v2790_v4, %v2710_v56 }
 0x22d   : > { %13545 = vmatpush3.msra.mxu1 %v15561_v17  ;;  %13537 = vmatprep.mubr.f32.mxu0 %v14822_v5  ;;  %v15653_v61 = vand.u32 4294901760, %v6504_v40 }
 0x22e   : > { %13546 = vmatprep.subr.mxu1 %v15572_v23  ;;  %13551 = vmatprep.subr.mxu0 %v15579_v30  ;;  %v6501_v11 = vsel %vm6496_vm2, %v2791_v9, 0 }
 0x22f   : > { %13538 = vmatmul.mubr.f32.vlgmr.msra.gmra.mxu0 %v14856_v14  ;;  %13547 = vmatpush3.msra.mxu1 %v15572_v23  ;;  %v15661_v12 = vsub.f32 %v6504_v40, %v15653_v61  ;;  %v15663_v7 = vand.u32 4294901760, %v6501_v11  ;;  %v7045_v40 = vand.u32 4294901760, %v7044_v35 }
 0x230   : > { %13552 = vmatpush3.msra.mxu0 %v15579_v30  ;;  %13548 = vmatprep.mubr.f32.mxu1 %v14850_v13 }
 0x231   : > { %13553 = vmatprep.subr.mxu0 %v15589_v25  ;;  %13562 = vmatprep.subr.mxu1 %v15540_v63  ;;  %v6614_v5 = vand.u32 4294901760, %v15661_v12  ;;  %v15677_v14 = vsub.f32 %v6501_v11, %v15663_v7  ;;  %v13121_v13 = vpop.f32.mrf.mxu0  ;;  %v7434_v11 = vsel %vm6496_vm2, %v15468_v43, 0 }
 0x232   : > { %13549 = vmatmul.mubr.f32.vlgmr.msra.gmra.mxu1 %v14873_v18  ;;  %13554 = vmatpush3.msra.mxu0 %v15589_v25  ;;  %v13132_v6 = vpop.f32.mrf.mxu1 }
 0x233   : > { %13563 = vmatpush3.msra.mxu1 %v15540_v63  ;;  %13555 = vmatprep.subr.mxu0 %v15601_v38  ;;  %v6615_v18 = vsub.f32 %v15661_v12, %v6614_v5  ;;  %v6621_v63 = vand.u32 4294901760, %v15677_v14  ;;  %v2875_v16 = vpop.f32.mrf.mxu0  ;;  %v2983_v26 = vadd.f32 %v13132_v6, %v13121_v13 }
 0x234   : > { %13564 = vmatprep.subr.mxu1 %v15549_v19  ;;  %13556 = vmatpush3.msra.mxu0 %v15601_v38 }
 0x235   : > { %13565 = vmatpush3.msra.mxu1 %v15549_v19  ;;  %13557 = vmatprep.subr.mxu0 %v15610_v41  ;;  %v6575_v19 = vand.u32 4294901760, %v15680_v37  ;;  %v6616_v22 = vand.u32 4294901760, %v6615_v18 }
 0x236   : > { %13566 = vmatprep.subr.mxu1 %v15561_v17  ;;  %13558 = vmatpush3.msra.mxu0 %v15610_v41 }
 0x237   : > { %13559 = vmatprep.mubr.f32.mxu0 %v14798_v1  ;;  %13567 = vmatpush3.msra.mxu1 %v15561_v17  ;;  %v6622_v17 = vsub.f32 %v15677_v14, %v6621_v63 }
 0x238   : > { %13560 = vmatmul.mubr.f32.vlgmr.msra.gmra.mxu0 %v14833_v8  ;;  %13568 = vmatprep.subr.mxu1 %v15572_v23 }
 0x239   : > { %13569 = vmatpush3.msra.mxu1 %v15572_v23  ;;  %13570 = vmatprep.mubr.f32.mxu1 %v14798_v1  ;;  %v6576_v1 = vsub.f32 %v15680_v37, %v6575_v19  ;;  %v6623_v30 = vand.u32 4294901760, %v6622_v17 }
 0x23a   : > { %13571 = vmatmul.mubr.f32.vlgmr.msra.gmra.mxu1 %v14833_v8  ;;  %13573 = vmatprep.subr.mxu0 %v14191_v20  ;;  %v2976_v8 = vpop.f32.mrf.mxu1 }
 0x23b   : > { %13574 = vmatpush3.xpose.msra.mxu0 %v15653_v61  ;;  %13577 = vmatprep.mubr.msk.f32.mxu0 %vm14192_vm1, %v14191_v20  ;;  %v13143_v24 = vpop.f32.mrf.mxu0  ;;  %v2977_v32 = vadd.f32 %v2976_v8, %v2875_v16  ;;  %v6577_v25 = vand.u32 4294901760, %v6576_v1 }
 0x23c   : > { %13575 = vmatprep.subr.mxu0 %v14191_v20  ;;  %13580 = vmatprep.subr.mxu1 %v14191_v20  ;;  %v3070_v33 = vadd.f32 %v13143_v24, %v2983_v26 }
 0x23d   : > { %13581 = vmatpush3.xpose.msra.mxu1 %v6616_v22  ;;  %13584 = vmatprep.mubr.msk.f32.mxu1 %vm14192_vm1, %v14191_v20  ;;  %v13154_v28 = vpop.f32.mrf.mxu1  ;;  %v3062_v23 = vpop.f32.mrf.mxu0 }
 0x23e   : > { %13582 = vmatprep.subr.mxu1 %v14191_v20  ;;  %v3063_v36 = vadd.f32 %v3062_v23, %v2977_v32  ;;  %v3155_v39 = vadd.f32 %v13154_v28, %v3070_v33 }
 0x23f   : > { %13576 = vmatpush3.xpose.msra.mxu0 %v15663_v7  ;;  %v3146_v38 = vpop.f32.mrf.mxu1 }
 0x240   : > { %13587 = vmatprep.subr.mxu0 %v14191_v20  ;;  %v3147_v31 = vadd.f32 %v3146_v38, %v3063_v36 }
 0x241   : > { %13583 = vmatpush3.xpose.msra.mxu1 %v6623_v30 }
 0x242   : > { %13578 = vmatmul.mubr.f32.vlgmr.msra.gmra.mxu0 %v6577_v25  ;;  %13594 = vmatprep.subr.mxu1 %v14191_v20 }
 0x243   : > { %13588 = vmatpush3.xpose.msra.mxu0 %v15661_v12  ;;  %13591 = vmatprep.mubr.msk.f32.mxu0 %vm14192_vm1, %v14191_v20 }
 0x244   : > { %13589 = vmatprep.subr.mxu0 %v14191_v20  ;;  %13585 = vmatmul.mubr.f32.vlgmr.msra.gmra.mxu1 %v15665_v15 }
 0x245   : > { %v13165_v41 = vpop.f32.mrf.mxu0  ;;  %13595 = vmatpush3.xpose.msra.mxu1 %v15653_v61  ;;  %13598 = vmatprep.mubr.msk.f32.mxu1 %vm14192_vm1, %v14191_v20 }
 0x246   : > { %v3244_v45 = vadd.f32 %v13165_v41, %v3155_v39  ;;  %v13176_v48 = vpop.f32.mrf.mxu1  ;;  %13596 = vmatprep.subr.mxu1 %v14191_v20 }
 0x247   : > { %13590 = vmatpush3.xpose.msra.mxu0 %v15677_v14  ;;  %v3237_v49 = vpop.f32.mrf.mxu0  ;;  %v15794_v14 = vand.u32 4294901760, %v7434_v11 }
 0x248   : > { %13601 = vmatprep.subr.mxu0 %v14191_v20  ;;  %v3325_v34 = vadd.f32 %v13176_v48, %v3244_v45  ;;  %v3238_v57 = vadd.f32 %v3237_v49, %v3147_v31  ;;  %v3318_v52 = vpop.f32.mrf.mxu1 }
 0x249   : > { %13597 = vmatpush3.xpose.msra.mxu1 %v15663_v7 }
 0x24a   : > { %13592 = vmatmul.mubr.f32.vlgmr.msra.gmra.mxu0 %v15680_v37  ;;  %v6972_v53 = vsel %vm6496_vm2, %v3325_v34, 0  ;;  %v3319_v42 = vadd.f32 %v3318_v52, %v3238_v57  ;;  %13608 = vmatprep.subr.mxu1 %v14191_v20 }
 0x24b   : > { %v15737_v54 = vand.u32 4294901760, %v6972_v53  ;;  %13602 = vmatpush3.xpose.msra.mxu0 %v6614_v5  ;;  %13605 = vmatprep.mubr.msk.f32.mxu0 %vm14192_vm1, %v14191_v20 }
 0x24c   : > { %v6969_v55 = vsel %vm6496_vm2, %v3319_v42, 0  ;;  %13603 = vmatprep.subr.mxu0 %v14191_v20  ;;  %13599 = vmatmul.mubr.f32.vlgmr.msra.gmra.mxu1 %v6575_v19  ;;  %v7902_v42 = vsel %vm6496_vm2, %v15567_v27, 0 }
 0x24d   : > { %v7081_v58 = vsub.f32 %v6972_v53, %v15737_v54  ;;  %v15751_v60 = vand.u32 4294901760, %v6969_v55  ;;  %13609 = vmatpush3.xpose.msra.mxu1 %v15653_v61  ;;  %13612 = vmatprep.mubr.msk.f32.mxu1 %vm14192_vm1, %v14191_v20 }
 0x24e   : > { %13610 = vmatprep.subr.mxu1 %v14191_v20 }
 0x24f   : > { %v7082_v62 = vand.u32 4294901760, %v7081_v58  ;;  %v15758_v47 = vsub.f32 %v6969_v55, %v15751_v60  ;;  %13604 = vmatpush3.xpose.msra.mxu0 %v6621_v63  ;;  %v13187_v21 = vpop.f32.mrf.mxu0  ;;  %v15803_v63 = vsub.f32 %v7434_v11, %v15794_v14 }
 0x250   : > { %13615 = vmatprep.subr.mxu0 %v14191_v20  ;;  %v13198_v59 = vpop.f32.mrf.mxu1 }
 0x251   : > { %v7089_v2 = vand.u32 4294901760, %v15758_v47  ;;  %13611 = vmatpush3.xpose.msra.mxu1 %v15663_v7  ;;  %v7083_v3 = vsub.f32 %v7081_v58, %v7082_v62  ;;  %v3403_v56 = vpop.f32.mrf.mxu0  ;;  %v3511_v61 = vadd.f32 %v13198_v59, %v13187_v21  ;;  %v7511_v28 = vand.u32 4294901760, %v15803_v63 }
 0x252   : > { %13606 = vmatmul.mubr.f32.vlgmr.msra.gmra.mxu0 %v15665_v15  ;;  %13622 = vmatprep.subr.mxu1 %v14191_v20  ;;  %v3504_v10 = vpop.f32.mrf.mxu1 }
 0x253   : > { %13616 = vmatpush3.xpose.msra.mxu0 %v15737_v54  ;;  %13619 = vmatprep.mubr.msk.f32.mxu0 %vm14192_vm1, %v14191_v20  ;;  %v7084_v51 = vand.u32 4294901760, %v7083_v3  ;;  %v7090_v46 = vsub.f32 %v15758_v47, %v7089_v2  ;;  %v7512_v33 = vsub.f32 %v15803_v63, %v7511_v28 }
 0x254   : > { %13617 = vmatprep.subr.mxu0 %v14191_v20  ;;  %13613 = vmatmul.mubr.f32.vlgmr.msra.gmra.mxu1 %v15665_v15  ;;  %v3505_v15 = vadd.f32 %v3504_v10, %v3403_v56 }
 0x255   : > { %13623 = vmatpush3.xpose.msra.mxu1 %v7084_v51  ;;  %13626 = vmatprep.mubr.msk.f32.mxu1 %vm14192_vm1, %v14191_v20  ;;  %v7091_v4 = vand.u32 4294901760, %v7090_v46  ;;  %v7513_v41 = vand.u32 4294901760, %v7512_v33 }
 0x256   : > { %13624 = vmatprep.subr.mxu1 %v14191_v20 }
 0x257   : > { %13618 = vmatpush3.xpose.msra.mxu0 %v15751_v60 }
 0x258   : > { %13629 = vmatprep.subr.mxu0 %v14191_v20 }
 0x259   : > { %v13209_v9 = vpop.f32.mrf.mxu0  ;;  %13625 = vmatpush3.xpose.msra.mxu1 %v7091_v4 }
 0x25a   : > { %13620 = vmatmul.mubr.f32.vlgmr.msra.gmra.mxu0 %v7045_v40  ;;  %13636 = vmatprep.subr.mxu1 %v14191_v20  ;;  %v3598_v5 = vadd.f32 %v13209_v9, %v3511_v61 }
 0x25b   : > { %13630 = vmatpush3.xpose.msra.mxu0 %v7081_v58  ;;  %13633 = vmatprep.mubr.msk.f32.mxu0 %vm14192_vm1, %v14191_v20  ;;  %v13220_v12 = vpop.f32.mrf.mxu1  ;;  %v3590_v7 = vpop.f32.mrf.mxu0 }
 0x25c   : > { %13631 = vmatprep.subr.mxu0 %v14191_v20  ;;  %13627 = vmatmul.mubr.f32.vlgmr.msra.gmra.mxu1 %v15730_v50  ;;  %v3591_v37 = vadd.f32 %v3590_v7, %v3505_v15  ;;  %v3683_v43 = vadd.f32 %v13220_v12, %v3598_v5 }
 0x25d   : > { %13637 = vmatpush3.xpose.msra.mxu1 %v15737_v54  ;;  %13640 = vmatprep.mubr.msk.f32.mxu1 %vm14192_vm1, %v14191_v20  ;;  %v3674_v13 = vpop.f32.mrf.mxu1 }
 0x25e   : > { %13638 = vmatprep.subr.mxu1 %v14191_v20  ;;  %v3675_v19 = vadd.f32 %v3674_v13, %v3591_v37 }
 0x25f   : > { %13632 = vmatpush3.xpose.msra.mxu0 %v15758_v47 }
 0x260   : > { %13643 = vmatprep.subr.mxu0 %v14191_v20 }
 0x261   : > { %13639 = vmatpush3.xpose.msra.mxu1 %v15751_v60 }
 0x262   : > { %13634 = vmatmul.mubr.f32.vlgmr.msra.gmra.mxu0 %v15744_v44  ;;  %13650 = vmatprep.subr.mxu1 %v14191_v20 }
 0x263   : > { %v13231_v18 = vpop.f32.mrf.mxu0  ;;  %13644 = vmatpush3.xpose.msra.mxu0 %v7082_v62  ;;  %13647 = vmatprep.mubr.msk.f32.mxu0 %vm14192_vm1, %v14191_v20 }
 0x264   : > { %v3772_v6 = vadd.f32 %v13231_v18, %v3683_v43  ;;  %v13242_v16 = vpop.f32.mrf.mxu1  ;;  %13645 = vmatprep.subr.mxu0 %v14191_v20  ;;  %13641 = vmatmul.mubr.f32.vlgmr.msra.gmra.mxu1 %v7043_v0 }
 0x265   : > { %v3765_v22 = vpop.f32.mrf.mxu0  ;;  %13651 = vmatpush3.xpose.msra.mxu1 %v15737_v54  ;;  %13654 = vmatprep.mubr.msk.f32.mxu1 %vm14192_vm1, %v14191_v20 }
 0x266   : > { %v3853_v24 = vadd.f32 %v13242_v16, %v3772_v6  ;;  %v3766_v17 = vadd.f32 %v3765_v22, %v3675_v19  ;;  %13652 = vmatprep.subr.mxu1 %v14191_v20  ;;  %v3846_v1 = vpop.f32.mrf.mxu1 }
 0x267   : > { %13646 = vmatpush3.xpose.msra.mxu0 %v7089_v2 }
 0x268   : > { %v7440_v8 = vsel %vm6496_vm2, %v3853_v24, 0  ;;  %v3847_v26 = vadd.f32 %v3846_v1, %v3766_v17  ;;  %13657 = vmatprep.subr.mxu0 %v14191_v20 }
 0x269   : > { %v15815_v23 = vand.u32 4294901760, %v7440_v8  ;;  %13653 = vmatpush3.xpose.msra.mxu1 %v15751_v60  ;;  %v15854_v60 = vand.u32 4294901760, %v7902_v42 }
 0x26a   : > { %v7437_v30 = vsel %vm6496_vm2, %v3847_v26, 0  ;;  %13648 = vmatmul.mubr.f32.vlgmr.msra.gmra.mxu0 %v15730_v50  ;;  %13664 = vmatprep.subr.mxu1 %v14191_v20 }
 0x26b   : > { %v7549_v32 = vsub.f32 %v7440_v8, %v15815_v23  ;;  %v15822_v25 = vand.u32 4294901760, %v7437_v30  ;;  %13658 = vmatpush3.xpose.msra.mxu0 %v15815_v23  ;;  %13661 = vmatprep.mubr.msk.f32.mxu0 %vm14192_vm1, %v14191_v20  ;;  %v15860_v2 = vsub.f32 %v7902_v42, %v15854_v60 }
 0x26c   : > { %13659 = vmatprep.subr.mxu0 %v14191_v20  ;;  %13655 = vmatmul.mubr.f32.vlgmr.msra.gmra.mxu1 %v15730_v50 }
 0x26d   : > { %v7550_v36 = vand.u32 4294901760, %v7549_v32  ;;  %v7556_v38 = vsub.f32 %v7437_v30, %v15822_v25  ;;  %13668 = vmatprep.mubr.msk.f32.mxu1 %vm14192_vm1, %v14191_v20  ;;  %v13253_v31 = vpop.f32.mrf.mxu0  ;;  %v7979_v9 = vand.u32 4294901760, %v15860_v2 }
 0x26e   : > { %v13264_v49 = vpop.f32.mrf.mxu1 }
 0x26f   : > { %v7557_v39 = vand.u32 4294901760, %v7556_v38  ;;  %13660 = vmatpush3.xpose.msra.mxu0 %v15822_v25  ;;  %v7551_v29 = vsub.f32 %v7549_v32, %v7550_v36  ;;  %v3931_v50 = vpop.f32.mrf.mxu0  ;;  %v4039_v53 = vadd.f32 %v13264_v49, %v13253_v31  ;;  %v7980_v7 = vsub.f32 %v15860_v2, %v7979_v9 }
 0x270   : > { %13671 = vmatprep.subr.mxu0 %v14191_v20  ;;  %v4032_v52 = vpop.f32.mrf.mxu1 }
 0x271   : > { %v7552_v45 = vand.u32 4294901760, %v7551_v29  ;;  %v7558_v48 = vsub.f32 %v7556_v38, %v7557_v39  ;;  %v4033_v55 = vadd.f32 %v4032_v52, %v3931_v50  ;;  %v7981_v18 = vand.u32 4294901760, %v7980_v7 }
 0x272   : > { %13662 = vmatmul.mubr.f32.vlgmr.msra.gmra.mxu0 %v7513_v41 }
 0x273   : > { %13665 = vmatpush3.xpose.msra.mxu1 %v7552_v45  ;;  %13672 = vmatpush3.xpose.msra.mxu0 %v7549_v32  ;;  %v7559_v34 = vand.u32 4294901760, %v7558_v48 }
 0x274   : > { %13666 = vmatprep.subr.mxu1 %v14191_v20  ;;  %13673 = vmatprep.subr.mxu0 %v14191_v20 }
 0x275   : > { %13675 = vmatprep.mubr.msk.f32.mxu0 %vm14192_vm1, %v14191_v20 }
 0x277   : > { %v13275_v57 = vpop.f32.mrf.mxu0  ;;  %13667 = vmatpush3.xpose.msra.mxu1 %v7559_v34  ;;  %13674 = vmatpush3.xpose.msra.mxu0 %v7556_v38 }
 0x278   : > { %13678 = vmatprep.subr.mxu1 %v14191_v20  ;;  %13685 = vmatprep.subr.mxu0 %v14191_v20  ;;  %v4126_v58 = vadd.f32 %v13275_v57, %v4039_v53 }
 0x279   : > { %v13286_v54 = vpop.f32.mrf.mxu1  ;;  %v4118_v44 = vpop.f32.mrf.mxu0 }
 0x27a   : > { %13669 = vmatmul.mubr.f32.vlgmr.msra.gmra.mxu1 %v15794_v14  ;;  %13676 = vmatmul.mubr.f32.vlgmr.msra.gmra.mxu0 %v15803_v63  ;;  %v4119_v27 = vadd.f32 %v4118_v44, %v4033_v55  ;;  %v4211_v47 = vadd.f32 %v13286_v54, %v4126_v58 }
 0x27b   : > { %13679 = vmatpush3.xpose.msra.mxu1 %v15815_v23  ;;  %13686 = vmatpush3.xpose.msra.mxu0 %v7550_v36  ;;  %v4202_v62 = vpop.f32.mrf.mxu1 }
 0x27c   : > { %13680 = vmatprep.subr.mxu1 %v14191_v20  ;;  %13687 = vmatprep.subr.mxu0 %v14191_v20  ;;  %v4203_v3 = vadd.f32 %v4202_v62, %v4119_v27 }
 0x27d   : > { %13682 = vmatprep.mubr.msk.f32.mxu1 %vm14192_vm1, %v14191_v20  ;;  %13689 = vmatprep.mubr.msk.f32.mxu0 %vm14192_vm1, %v14191_v20 }
 0x27f   : > { %13681 = vmatpush3.xpose.msra.mxu1 %v15822_v25  ;;  %13688 = vmatpush3.xpose.msra.mxu0 %v7557_v39 }
 0x280   : > { %13692 = vmatprep.subr.mxu1 %v14191_v20  ;;  %13699 = vmatprep.subr.mxu0 %v14191_v20 }
 0x281   : > { %v13297_v0 = vpop.f32.mrf.mxu0 }
 0x282   : > { %v4300_v21 = vadd.f32 %v13297_v0, %v4211_v47  ;;  %v13308_v51 = vpop.f32.mrf.mxu1  ;;  %13683 = vmatmul.mubr.f32.vlgmr.msra.gmra.mxu1 %v7511_v28  ;;  %13690 = vmatmul.mubr.f32.vlgmr.msra.gmra.mxu0 %v15794_v14 }
 0x283   : > { %v4293_v46 = vpop.f32.mrf.mxu0  ;;  %13693 = vmatpush3.xpose.msra.mxu1 %v15815_v23  ;;  %13696 = vmatprep.mubr.msk.f32.mxu1 %vm14192_vm1, %v14191_v20 }
 0x284   : > { %v4381_v35 = vadd.f32 %v13308_v51, %v4300_v21  ;;  %v4294_v59 = vadd.f32 %v4293_v46, %v4203_v3  ;;  %13694 = vmatprep.subr.mxu1 %v14191_v20  ;;  %13703 = vmatprep.mubr.msk.f32.mxu0 %vm14192_vm1, %v14191_v20  ;;  %v4374_v56 = vpop.f32.mrf.mxu1 }
 0x286   : > { %v7908_v4 = vsel %vm6496_vm2, %v4381_v35, 0  ;;  %v4375_v40 = vadd.f32 %v4374_v56, %v4294_v59 }
 0x287   : > { %v7939_v10 = vand.u32 4294901760, %v7908_v4  ;;  %13695 = vmatpush3.xpose.msra.mxu1 %v15822_v25 }
 0x288   : > { %v7905_v61 = vsel %vm6496_vm2, %v4375_v40, 0  ;;  %13706 = vmatprep.subr.mxu1 %v14191_v20 }
 0x289   : > { %v8017_v11 = vsub.f32 %v7908_v4, %v7939_v10  ;;  %v15876_v12 = vand.u32 4294901760, %v7905_v61  ;;  %13700 = vmatpush3.xpose.msra.mxu0 %v7939_v10 }
 0x28a   : > { %13701 = vmatprep.subr.mxu0 %v14191_v20  ;;  %13697 = vmatmul.mubr.f32.vlgmr.msra.gmra.mxu1 %v15794_v14 }
 0x28b   : > { %v8018_v15 = vand.u32 4294901760, %v8017_v11  ;;  %v8024_v5 = vsub.f32 %v7905_v61, %v15876_v12  ;;  %13710 = vmatprep.mubr.msk.f32.mxu1 %vm14192_vm1, %v14191_v20  ;;  %v13319_v43 = vpop.f32.mrf.mxu0 }
 0x28d   : > { %v8025_v37 = vand.u32 4294901760, %v8024_v5  ;;  %13702 = vmatpush3.xpose.msra.mxu0 %v15876_v12  ;;  %v8019_v13 = vsub.f32 %v8017_v11, %v8018_v15  ;;  %v4459_v14 = vpop.f32.mrf.mxu0 }
 0x28e   : > { %13713 = vmatprep.subr.mxu0 %v14191_v20  ;;  %v13330_v63 = vpop.f32.mrf.mxu1 }
 0x28f   : > { %v8020_v19 = vand.u32 4294901760, %v8019_v13  ;;  %v8026_v6 = vsub.f32 %v8024_v5, %v8025_v37  ;;  %v4567_v24 = vadd.f32 %v13330_v63, %v13319_v43 }
 0x290   : > { %13704 = vmatmul.mubr.f32.vlgmr.msra.gmra.mxu0 %v7981_v18  ;;  %v4560_v16 = vpop.f32.mrf.mxu1 }
 0x291   : > { %13707 = vmatpush3.xpose.msra.mxu1 %v8020_v19  ;;  %13714 = vmatpush3.xpose.msra.mxu0 %v8017_v11  ;;  %v8027_v22 = vand.u32 4294901760, %v8026_v6  ;;  %v4561_v17 = vadd.f32 %v4560_v16, %v4459_v14 }
 0x292   : > { %13708 = vmatprep.subr.mxu1 %v14191_v20  ;;  %13715 = vmatprep.subr.mxu0 %v14191_v20 }
 0x293   : > { %13717 = vmatprep.mubr.msk.f32.mxu0 %vm14192_vm1, %v14191_v20 }
 0x295   : > { %13709 = vmatpush3.xpose.msra.mxu1 %v8027_v22  ;;  %13716 = vmatpush3.xpose.msra.mxu0 %v8024_v5  ;;  %v13341_v1 = vpop.f32.mrf.mxu0 }
 0x296   : > { %13720 = vmatprep.subr.mxu1 %v14191_v20  ;;  %13727 = vmatprep.subr.mxu0 %v14191_v20  ;;  %v4654_v8 = vadd.f32 %v13341_v1, %v4567_v24 }
 0x297   : > { %v4646_v26 = vpop.f32.mrf.mxu0 }
 0x298   : > { %13711 = vmatmul.mubr.f32.vlgmr.msra.gmra.mxu1 %v15854_v60  ;;  %13718 = vmatmul.mubr.f32.vlgmr.msra.gmra.mxu0 %v15860_v2  ;;  %v13352_v28 = vpop.f32.mrf.mxu1  ;;  %v4647_v23 = vadd.f32 %v4646_v26, %v4561_v17 }
 0x299   : > { %13721 = vmatpush3.xpose.msra.mxu1 %v7939_v10  ;;  %13728 = vmatpush3.xpose.msra.mxu0 %v8018_v15  ;;  %v4739_v32 = vadd.f32 %v13352_v28, %v4654_v8 }
 0x29a   : > { %13722 = vmatprep.subr.mxu1 %v14191_v20  ;;  %13729 = vmatprep.subr.mxu0 %v14191_v20  ;;  %v4730_v30 = vpop.f32.mrf.mxu1 }
 0x29b   : > { %13724 = vmatprep.mubr.msk.f32.mxu1 %vm14192_vm1, %v14191_v20  ;;  %13731 = vmatprep.mubr.msk.f32.mxu0 %vm14192_vm1, %v14191_v20  ;;  %v4731_v25 = vadd.f32 %v4730_v30, %v4647_v23 }
 0x29d   : > { %13723 = vmatpush3.xpose.msra.mxu1 %v15876_v12  ;;  %13730 = vmatpush3.xpose.msra.mxu0 %v8025_v37 }
 0x29e   : > { %13734 = vmatprep.subr.mxu1 %v14191_v20  ;;  %v13363_v33 = vpop.f32.mrf.mxu0  ;;  %13741 = vmatprep.subr.mxu0 %v14191_v20 }
 0x29f   : > { %v4828_v36 = vadd.f32 %v13363_v33, %v4739_v32 }
 0x2a0   : > { %13725 = vmatmul.mubr.f32.vlgmr.msra.gmra.mxu1 %v7979_v9  ;;  %13732 = vmatmul.mubr.f32.vlgmr.msra.gmra.mxu0 %v15854_v60  ;;  %v4821_v38 = vpop.f32.mrf.mxu0 }
 0x2a1   : > { %13735 = vmatpush3.xpose.msra.mxu1 %v7939_v10  ;;  %13738 = vmatprep.mubr.msk.f32.mxu1 %vm14192_vm1, %v14191_v20  ;;  %v4822_v39 = vadd.f32 %v4821_v38, %v4731_v25  ;;  %v13374_v29 = vpop.f32.mrf.mxu1 }
 0x2a2   : > { %13736 = vmatprep.subr.mxu1 %v14191_v20  ;;  %v4909_v41 = vadd.f32 %v13374_v29, %v4828_v36  ;;  %13745 = vmatprep.mubr.msk.f32.mxu0 %vm14192_vm1, %v14191_v20 }
 0x2a3   : > { %v4902_v31 = vpop.f32.mrf.mxu1 }
 0x2a4   : > { %v15909_v45 = vand.u32 4294901760, %v4909_v41  ;;  %v4903_v48 = vadd.f32 %v4902_v31, %v4822_v39 }
 0x2a5   : > { %13737 = vmatpush3.xpose.msra.mxu1 %v15876_v12 }
 0x2a6   : > { %v15913_v49 = vsub.f32 %v4909_v41, %v15909_v45  ;;  %v15915_v50 = vand.u32 4294901760, %v4903_v48  ;;  %13742 = vmatpush3.msra.mxu0 %v15909_v45  ;;  %13748 = vmatprep.subr.mxu1 %v14191_v20 }
 0x2a7   : > { %13743 = vmatprep.subr.mxu0 %v14191_v20 }
 0x2a8   : > { %13739 = vmatmul.mubr.f32.vlgmr.msra.gmra.mxu1 %v15854_v60  ;;  %v8525_v34 = vand.u32 4294901760, %v15913_v49  ;;  %v15923_v57 = vsub.f32 %v4903_v48, %v15915_v50  ;;  %13744 = vmatpush3.msra.mxu0 %v15915_v50 }
 0x2a9   : > { %13752 = vmatprep.mubr.msk.f32.mxu1 %vm14192_vm1, %v14191_v20  ;;  %13755 = vmatprep.subr.mxu0 %v14191_v20  ;;  %v13385_v42 = vpop.f32.mrf.mxu0 }
 0x2aa   : > { %v8526_v52 = vsub.f32 %v15913_v49, %v8525_v34  ;;  %v8532_v53 = vand.u32 4294901760, %v15923_v57 }
 0x2ab   : > { %v4987_v27 = vpop.f32.mrf.mxu0 }
 0x2ac   : > { %v8533_v54 = vsub.f32 %v15923_v57, %v8532_v53  ;;  %v8527_v44 = vand.u32 4294901760, %v8526_v52  ;;  %v13396_v55 = vpop.f32.mrf.mxu1 }
 0x2ad   : > { %v5095_v58 = vadd.f32 %v13396_v55, %v13385_v42 }
 0x2ae   : > { %13749 = vmatpush3.msra.mxu1 %v8527_v44  ;;  %v8534_v60 = vand.u32 4294901760, %v8533_v54  ;;  %v5088_v62 = vpop.f32.mrf.mxu1 }
 0x2af   : > { %13750 = vmatprep.subr.mxu1 %v14191_v20  ;;  %v5089_v47 = vadd.f32 %v5088_v62, %v4987_v27 }
 0x2b0   : > { %13751 = vmatpush3.msra.mxu1 %v8534_v60 }
 0x2b1   : > { %13762 = vmatprep.subr.mxu1 %v14191_v20 }
 0x2b3   : > { %v13407_v0 = vpop.f32.mrf.mxu0 }
 0x2b4   : > { %v5182_v2 = vadd.f32 %v13407_v0, %v5095_v58 }
 0x2b5   : > { %v5174_v3 = vpop.f32.mrf.mxu0 }
 0x2b6   : > { %v5175_v21 = vadd.f32 %v5174_v3, %v5089_v47  ;;  %v13418_v51 = vpop.f32.mrf.mxu1 }
 0x2b7   : > { %v5267_v46 = vadd.f32 %v13418_v51, %v5182_v2 }
 0x2b8   : > { %v5258_v35 = vpop.f32.mrf.mxu1 }
 0x2b9   : > { %v5259_v59 = vadd.f32 %v5258_v35, %v5175_v21 }
 0x2bc   : > { %v13429_v56 = vpop.f32.mrf.mxu0 }
 0x2bd   : > { %v5356_v4 = vadd.f32 %v13429_v56, %v5267_v46 }
 0x2be   : > { %v5349_v40 = vpop.f32.mrf.mxu0 }
 0x2bf   : > { %v5350_v9 = vadd.f32 %v5349_v40, %v5259_v59  ;;  %v13440_v10 = vpop.f32.mrf.mxu1 }
 0x2c0   : > { %v15938_v61 = vadd.f32 %v13440_v10, %v5356_v4 }
 0x2c1   : > { %v5430_v11 = vpop.f32.mrf.mxu1 }
 0x2c2   : > { %v15940_v12 = vadd.f32 %v5430_v11, %v5350_v9 }
 0x2c7   : > { %v13451_v7 = vpop.f32.mrf.mxu0 }
 0x2c9   : > { %v5515_v37 = vpop.f32.mrf.mxu0 }
 0x2ca   : > { %v13462_v15 = vpop.f32.mrf.mxu1 }
 0x2cb   : > { %v5623_v5 = vadd.f32 %v13462_v15, %v13451_v7 }
 0x2cc   : > { %v5616_v13 = vpop.f32.mrf.mxu1 }
 0x2cd   : > { %v5617_v43 = vadd.f32 %v5616_v13, %v5515_v37 }
 0x2d1   : > { %v13473_v18 = vpop.f32.mrf.mxu0 }
 0x2d2   : > { %v5710_v63 = vadd.f32 %v13473_v18, %v5623_v5 }
 0x2d3   : > { %v5702_v19 = vpop.f32.mrf.mxu0 }
 0x2d4   : > { %v5703_v6 = vadd.f32 %v5702_v19, %v5617_v43  ;;  %v13484_v14 = vpop.f32.mrf.mxu1 }
 0x2d5   : > { %v5795_v16 = vadd.f32 %v13484_v14, %v5710_v63 }
 0x2d6   : > { %v5786_v22 = vpop.f32.mrf.mxu1 }
 0x2d7   : > { %v5787_v24 = vadd.f32 %v5786_v22, %v5703_v6 }
 0x2da   : > { %v13495_v17 = vpop.f32.mrf.mxu0 }
 0x2db   : > { %v5884_v1 = vadd.f32 %v13495_v17, %v5795_v16 }
 0x2dc   : > { %v5877_v8 = vpop.f32.mrf.mxu0 }
 0x2dd   : > { %v5878_v26 = vadd.f32 %v5877_v8, %v5787_v24  ;;  %v13506_v28 = vpop.f32.mrf.mxu1 }
 0x2de   : > { %v15942_v23 = vadd.f32 %v13506_v28, %v5884_v1 }
 0x2df   : > { %v5958_v30 = vpop.f32.mrf.mxu1 }
 0x2e0   : > { %v15944_v32 = vadd.f32 %v5958_v30, %v5878_v26 }
 0x2e5   : > { %v13517_v25 = vpop.f32.mrf.mxu0 }
 0x2e7   : > { %v6043_v38 = vpop.f32.mrf.mxu0 }
 0x2e8   : > { %v13528_v33 = vpop.f32.mrf.mxu1 }
 0x2e9   : > { %v6151_v36 = vadd.f32 %v13528_v33, %v13517_v25 }
 0x2ea   : > { %v6144_v39 = vpop.f32.mrf.mxu1 }
 0x2eb   : > { %v6145_v29 = vadd.f32 %v6144_v39, %v6043_v38 }
 0x2ef   : > { %v13539_v41 = vpop.f32.mrf.mxu0 }
 0x2f0   : > { %v6238_v31 = vadd.f32 %v13539_v41, %v6151_v36 }
 0x2f1   : > { %v6230_v48 = vpop.f32.mrf.mxu0 }
 0x2f2   : > { %v6231_v52 = vadd.f32 %v6230_v48, %v6145_v29  ;;  %v13550_v42 = vpop.f32.mrf.mxu1 }
 0x2f3   : > { %v6323_v54 = vadd.f32 %v13550_v42, %v6238_v31 }
 0x2f4   : > { %v6314_v44 = vpop.f32.mrf.mxu1 }
 0x2f5   : > { %v6315_v55 = vadd.f32 %v6314_v44, %v6231_v52 }
 0x2f8   : > { %v13561_v58 = vpop.f32.mrf.mxu0 }
 0x2f9   : > { %v6412_v60 = vadd.f32 %v13561_v58, %v6323_v54 }
 0x2fa   : > { %v6405_v27 = vpop.f32.mrf.mxu0  ;;  %v13572_v62 = vpop.f32.mrf.mxu1 }
 0x2fb   : > { %v6406_v47 = vadd.f32 %v6405_v27, %v6315_v55  ;;  %v15946_v0 = vadd.f32 %v13572_v62, %v6412_v60 }
 0x2fc   : > { %v6486_v2 = vpop.f32.mrf.mxu1 }
 0x2fd   : > { %v15948_v3 = vadd.f32 %v6486_v2, %v6406_v47 }
 0x302   : > { %v6579_v21 = vpop.f32.mrf.mxu0 }
 0x304   : > { %v13579_v51 = vpop.f32.mrf.mxu0  ;;  %v6660_v46 = vpop.f32.mrf.mxu1 }
 0x305   : > { %v6661_v59 = vadd.f32 %v6660_v46, %v6579_v21 }
 0x306   : > { %v13586_v35 = vpop.f32.mrf.mxu1 }
 0x30a   : > { %v6736_v56 = vpop.f32.mrf.mxu0 }
 0x30b   : > { %v6737_v9 = vadd.f32 %v6736_v56, %v6661_v59 }
 0x30c   : > { %v13593_v4 = vpop.f32.mrf.mxu0  ;;  %v6811_v40 = vpop.f32.mrf.mxu1 }
 0x30d   : > { %v6812_v11 = vadd.f32 %v6811_v40, %v6737_v9 }
 0x30e   : > { %v13600_v10 = vpop.f32.mrf.mxu1 }
 0x312   : > { %v6888_v7 = vpop.f32.mrf.mxu0 }
 0x313   : > { %v6889_v15 = vadd.f32 %v6888_v7, %v6812_v11 }
 0x314   : > { %v13607_v5 = vpop.f32.mrf.mxu0  ;;  %v6961_v37 = vpop.f32.mrf.mxu1 }
 0x315   : > { %v15950_v13 = vadd.f32 %v6961_v37, %v6889_v15 }
 0x316   : > { %v13614_v43 = vpop.f32.mrf.mxu1 }
 0x317   : > { %v8370_v18 = vsel %vm8369_vm3, %v15950_v13, -inf }
 0x318   : > { %8371 = vmax.xlane.f32.xlu0 %v8370_v18 }
 0x31a   : > { %v7047_v63 = vpop.f32.mrf.mxu0 }
 0x31c   : > { %v13621_v19 = vpop.f32.mrf.mxu0  ;;  %v7128_v6 = vpop.f32.mrf.mxu1 }
 0x31d   : > { %v7129_v16 = vadd.f32 %v7128_v6, %v7047_v63 }
 0x31e   : > { %v13628_v14 = vpop.f32.mrf.mxu1 }
 0x322   : > { %v7204_v22 = vpop.f32.mrf.mxu0 }
 0x323   : > { %v7205_v1 = vadd.f32 %v7204_v22, %v7129_v16 }
 0x324   : > { %v13635_v24 = vpop.f32.mrf.mxu0  ;;  %v7279_v17 = vpop.f32.mrf.mxu1 }
 0x325   : > { %v7280_v26 = vadd.f32 %v7279_v17, %v7205_v1 }
 0x326   : > { %v13642_v8 = vpop.f32.mrf.mxu1 }
 0x32a   : > { %v7356_v28 = vpop.f32.mrf.mxu0 }
 0x32b   : > { %v7357_v30 = vadd.f32 %v7356_v28, %v7280_v26 }
 0x32c   : > { %v13649_v25 = vpop.f32.mrf.mxu0  ;;  %v7429_v33 = vpop.f32.mrf.mxu1 }
 0x32d   : > { %v7430_v36 = vadd.f32 %v7429_v33, %v7357_v30 }
 0x32e   : > { %v13656_v38 = vpop.f32.mrf.mxu1 }
 0x32f   : > { %v8373_v39 = vsel %vm8369_vm3, %v7430_v36, -inf }
 0x330   : > { %8374 = vmax.xlane.f32.xlu1 %v8373_v39 }
 0x332   : > { %v7515_v29 = vpop.f32.mrf.mxu0 }
 0x334   : > { %v13663_v41 = vpop.f32.mrf.mxu0 }
 0x33a   : > { %v7596_v31 = vpop.f32.mrf.mxu1  ;;  %v7672_v48 = vpop.f32.mrf.mxu0 }
 0x33b   : > { %v7597_v54 = vadd.f32 %v7596_v31, %v7515_v29 }
 0x33c   : > { %v13670_v52 = vpop.f32.mrf.mxu1  ;;  %v13677_v42 = vpop.f32.mrf.mxu0 }
 0x33d   : > { %v7673_v58 = vadd.f32 %v7672_v48, %v7597_v54  ;;  %v15972_v54 = vand.u32 4294901760, %v15938_v61 }
 0x342   : > { %v7747_v44 = vpop.f32.mrf.mxu1  ;;  %v7824_v55 = vpop.f32.mrf.mxu0 }
 0x343   : > { %v7748_v62 = vadd.f32 %v7747_v44, %v7673_v58 }
 0x344   : > { %v13684_v60 = vpop.f32.mrf.mxu1  ;;  %v13691_v27 = vpop.f32.mrf.mxu0 }
 0x345   : > { %v7825_v47 = vadd.f32 %v7824_v55, %v7748_v62  ;;  %v15975_v55 = vand.u32 4294901760, %v15940_v12  ;;  %v15979_v60 = vsub.f32 %v15938_v61, %v15972_v54 }
 0x347   : > { %v15984_v62 = vsub.f32 %v15940_v12, %v15975_v55 }
 0x34a   : > { %v7897_v2 = vpop.f32.mrf.mxu1 }
 0x34b   : > { %v7898_v21 = vadd.f32 %v7897_v2, %v7825_v47  ;;  %v8987_v2 = vand.u32 4294901760, %v15979_v60 }
 0x34c   : > { %v13698_v51 = vpop.f32.mrf.mxu1 }
 0x34d   : > { %v8376_v46 = vsel %vm8369_vm3, %v7898_v21, -inf  ;;  %v8994_v51 = vand.u32 4294901760, %v15984_v62  ;;  %v8988_v12 = vsub.f32 %v15979_v60, %v8987_v2 }
 0x34e   : > { %8377 = vmax.xlane.f32.xlu1 %v8376_v46 }
 0x350   : > { %v7983_v35 = vpop.f32.mrf.mxu0 }
 0x352   : > { %v13705_v59 = vpop.f32.mrf.mxu0 }
 0x353   : > { %v8995_v59 = vsub.f32 %v15984_v62, %v8994_v51 }
 0x358   : > { %v8064_v56 = vpop.f32.mrf.mxu1  ;;  %v8140_v4 = vpop.f32.mrf.mxu0 }
 0x359   : > { %v8065_v10 = vadd.f32 %v8064_v56, %v7983_v35 }
 0x35a   : > { %v13712_v40 = vpop.f32.mrf.mxu1  ;;  %v13719_v9 = vpop.f32.mrf.mxu0 }
 0x35b   : > { %v8141_v15 = vadd.f32 %v8140_v4, %v8065_v10  ;;  %v8989_v4 = vand.u32 4294901760, %v8988_v12 }
 0x360   : > { %v8215_v11 = vpop.f32.mrf.mxu1  ;;  %v8292_v7 = vpop.f32.mrf.mxu0 }
 0x361   : > { %v8216_v43 = vadd.f32 %v8215_v11, %v8141_v15 }
 0x362   : > { %v13726_v5 = vpop.f32.mrf.mxu1  ;;  %v13733_v37 = vpop.f32.mrf.mxu0 }
 0x363   : > { %v8293_v18 = vadd.f32 %v8292_v7, %v8216_v43 }
 0x368   : > { %v8365_v63 = vpop.f32.mrf.mxu1 }
 0x369   : > { %v8366_v19 = vadd.f32 %v8365_v63, %v8293_v18 }
 0x36a   : > { %v13740_v6 = vpop.f32.mrf.mxu1 }
 0x36b   : > { %v8379_v14 = vsel %vm8369_vm3, %v8366_v19, -inf  ;;  %v16091_v6 = vand.u32 4294901760, %v15946_v0 }
 0x36c   : > { %8380 = vmax.xlane.f32.xlu0 %v8379_v14 }
 0x3a1   : > { %v8372_v16 = vpop.xlane.xlu0 %8371 }
 0x3a2   : > { %v8382_v22 = vsub.f32 %v15950_v13, %v8372_v16  ;;  %v16094_v16 = vand.u32 4294901760, %v15948_v3 }
 0x3a4   : > { %v8386_v24 = vmul.f32 1.442695, %v8382_v22 }
 0x3a6   : > { %14079 = vpow2.f32 %v8386_v24  ;;  %v16099_v24 = vsub.f32 %v15946_v0, %v16091_v6 }
 0x3b3   : > { %v14080_v17 = vpop.eup %14079 }
 0x3b4   : > { %v8394_v1 = vsel %vm8369_vm3, %v14080_v17, 0.0 }
 0x3b5   : > { %8395 = vadd.xlane.f32.xlu1 %v8394_v1  ;;  %v16104_v1 = vsub.f32 %v15948_v3, %v16094_v16 }
 0x3b9   : > { %v8375_v8 = vpop.xlane.xlu1 %8374 }
 0x3ba   : > { %v8383_v26 = vsub.f32 %v7430_v36, %v8375_v8 }
 0x3bc   : > { %v8388_v28 = vmul.f32 1.442695, %v8383_v26  ;;  %v9911_v26 = vand.u32 4294901760, %v16099_v24 }
 0x3be   : > { %14081 = vpow2.f32 %v8388_v28  ;;  %v9912_v3 = vsub.f32 %v16099_v24, %v9911_v26 }
 0x3cb   : > { %v15959_v30 = vpop.eup %14081 }
 0x3cc   : > { %v8397_v25 = vsel %vm8369_vm3, %v15959_v30, 0.0 }
 0x3cd   : > { %8398 = vadd.xlane.f32.xlu0 %v8397_v25 }
 0x3d7   : > { %v8378_v33 = vpop.xlane.xlu1 %8377 }
 0x3d8   : > { %v8384_v38 = vsub.f32 %v7898_v21, %v8378_v33 }
 0x3da   : > { %v8390_v39 = vmul.f32 1.442695, %v8384_v38 }
 0x3dc   : > { %14083 = vpow2.f32 %v8390_v39  ;;  %v9913_v39 = vand.u32 4294901760, %v9912_v3 }
 0x3e9   : > { %v15963_v13 = vpop.eup %14083 }
 0x3ea   : > { %v8400_v29 = vsel %vm8369_vm3, %v15963_v13, 0.0 }
 0x3eb   : > { %8401 = vadd.xlane.f32.xlu1 %v8400_v29 }
 0x3f5   : > { %v8381_v41 = vpop.xlane.xlu0 %8380 }
 0x3f6   : > { %v8385_v36 = vsub.f32 %v8366_v19, %v8381_v41 }
 0x3f8   : > { %v8392_v31 = vmul.f32 1.442695, %v8385_v36 }
 0x3fa   : > { %14085 = vpow2.f32 %v8392_v31 }
 0x407   : > { %v15967_v48 = vpop.eup %14085 }
 0x408   : > { %v8403_v52 = vsel %vm8369_vm3, %v15967_v48, 0.0 }
 0x409   : > { %8404 = vadd.xlane.f32.xlu0 %v8403_v52 }
 0x43e   : > { %v8396_v42 = vpop.xlane.xlu1 %8395 }
 0x43f   : > { %14087 = vrcp.f32 %v8396_v42 }
 0x44c   : > { %v14088_v44 = vpop.eup %14087 }
 0x44d   : > { %v8407_v58 = vmul.f32 %v14088_v44, %v14080_v17 }
 0x44f   : > { %v8415_v27 = vsel %vm8369_vm3, %v8407_v58, 0 }
 0x450   : > { %v8484_v47 = vand.u32 4294901760, %v8415_v27 }
 0x452   : > { %v8485_v21 = vsub.f32 %v8415_v27, %v8484_v47  ;;  %13753 = vmatmul.mubr.f32.vlgmr.msra.gmra.mxu1 %v8484_v47 }
 0x453   : > { %13763 = vmatpush3.msra.mxu1 %v15909_v45  ;;  %13766 = vmatprep.mubr.msk.f32.mxu1 %vm14192_vm1, %v14191_v20 }
 0x454   : > { %13764 = vmatprep.subr.mxu1 %v14191_v20  ;;  %v8486_v61 = vand.u32 4294901760, %v8485_v21 }
 0x455   : > { %13765 = vmatpush3.msra.mxu1 %v15915_v50 }
 0x456   : > { %13776 = vmatprep.subr.mxu1 %v14191_v20  ;;  %13767 = vmatmul.mubr.f32.vlgmr.msra.gmra.mxu1 %v8486_v61  ;;  %v8399_v46 = vpop.xlane.xlu0 %8398  ;;  %v8487_v35 = vsub.f32 %v8485_v21, %v8486_v61 }
 0x457   : > { %13777 = vmatpush3.msra.mxu1 %v15909_v45  ;;  %14089 = vrcp.f32 %v8399_v46  ;;  %13780 = vmatprep.mubr.msk.f32.mxu1 %vm14192_vm1, %v14191_v20  ;;  %v8996_v45 = vand.u32 4294901760, %v8995_v59 }
 0x458   : > { %13778 = vmatprep.subr.mxu1 %v14191_v20  ;;  %v8488_v56 = vand.u32 4294901760, %v8487_v35 }
 0x459   : > { %13779 = vmatpush3.msra.mxu1 %v15915_v50  ;;  %v16021_v50 = vand.u32 4294901760, %v15942_v23 }
 0x45a   : > { %13790 = vmatprep.subr.mxu1 %v14191_v20  ;;  %13746 = vmatmul.mubr.f32.vlgmr.msra.gmra.mxu0 %v8488_v56 }
 0x45b   : > { %13756 = vmatpush3.msra.mxu0 %v15913_v49  ;;  %13781 = vmatmul.mubr.f32.vlgmr.msra.gmra.mxu1 %v8484_v47 }
 0x45c   : > { %13791 = vmatpush3.msra.mxu1 %v8989_v4  ;;  %13757 = vmatprep.subr.mxu0 %v14191_v20  ;;  %v10263_v4 = vld [vmem:[%s16365_s4 + $0x8] sm:$0xff] }
 0x45d   : > { %13792 = vmatprep.subr.mxu1 %v14191_v20  ;;  %13758 = vmatpush3.msra.mxu0 %v15923_v57  ;;  %v16037_v57 = vsub.f32 %v15942_v23, %v16021_v50 }
 0x45e   : > { %13793 = vmatpush3.msra.mxu1 %v8996_v45  ;;  %13759 = vmatprep.mubr.msk.f32.mxu0 %vm14192_vm1, %v14191_v20 }
 0x45f   : > { %13769 = vmatprep.subr.mxu0 %v14191_v20  ;;  %13760 = vmatmul.mubr.f32.vlgmr.msra.gmra.mxu0 %v8485_v21  ;;  %v9449_v11 = vand.u32 4294901760, %v16037_v57 }
 0x460   : > { %13770 = vmatpush3.msra.mxu0 %v8525_v34  ;;  %13773 = vmatprep.mubr.msk.f32.mxu0 %vm14192_vm1, %v14191_v20  ;;  %v16028_v34 = vand.u32 4294901760, %v15944_v32 }
 0x461   : > { %13771 = vmatprep.subr.mxu0 %v14191_v20  ;;  %13794 = vmatprep.mubr.msk.f32.mxu1 %vm14192_vm1, %v14191_v20 }
 0x462   : > { %13772 = vmatpush3.msra.mxu0 %v8532_v53  ;;  %13804 = vmatprep.subr.mxu1 %v14191_v20  ;;  %v16044_v9 = vsub.f32 %v15944_v32, %v16028_v34  ;;  %v9450_v32 = vsub.f32 %v16037_v57, %v9449_v11 }
 0x463   : > { %13783 = vmatprep.subr.mxu0 %v14191_v20  ;;  %13774 = vmatmul.mubr.f32.vlgmr.msra.gmra.mxu0 %v8484_v47 }
 0x464   : > { %v14090_v49 = vpop.eup %14089  ;;  %13784 = vmatpush3.msra.mxu0 %v15972_v54  ;;  %13787 = vmatprep.mubr.msk.f32.mxu0 %vm14192_vm1, %v14191_v20  ;;  %v9456_v23 = vand.u32 4294901760, %v16044_v9  ;;  %v9451_v18 = vand.u32 4294901760, %v9450_v32 }
 0x465   : > { %13785 = vmatprep.subr.mxu0 %v14191_v20  ;;  %v8409_v40 = vmul.f32 %v14090_v49, %v15959_v30  ;;  %v9918_v30 = vand.u32 4294901760, %v16104_v1 }
 0x466   : > { %13786 = vmatpush3.msra.mxu0 %v15975_v55  ;;  %v9457_v37 = vsub.f32 %v16044_v9, %v9456_v23 }
 0x467   : > { %v8877_v53 = vsel %vm8369_vm3, %v8409_v40, 0  ;;  %13797 = vmatprep.subr.mxu0 %v14191_v20  ;;  %v9919_v33 = vsub.f32 %v16104_v1, %v9918_v30 }
 0x468   : > { %v8946_v10 = vand.u32 4294901760, %v8877_v53  ;;  %v9458_v19 = vand.u32 4294901760, %v9457_v37 }
 0x469   : > { %v9920_v29 = vand.u32 4294901760, %v9919_v33 }
 0x46a   : > { %v8947_v7 = vsub.f32 %v8877_v53, %v8946_v10  ;;  %13795 = vmatmul.mubr.f32.vlgmr.msra.gmra.mxu1 %v8946_v10 }
 0x46b   : > { %13805 = vmatpush3.msra.mxu1 %v15972_v54  ;;  %13808 = vmatprep.mubr.msk.f32.mxu1 %vm14192_vm1, %v14191_v20 }
 0x46c   : > { %13806 = vmatprep.subr.mxu1 %v14191_v20  ;;  %v8948_v15 = vand.u32 4294901760, %v8947_v7 }
 0x46d   : > { %13807 = vmatpush3.msra.mxu1 %v15975_v55 }
 0x46e   : > { %13818 = vmatprep.subr.mxu1 %v14191_v20  ;;  %13809 = vmatmul.mubr.f32.vlgmr.msra.gmra.mxu1 %v8948_v15  ;;  %v8949_v5 = vsub.f32 %v8947_v7, %v8948_v15 }
 0x46f   : > { %13819 = vmatpush3.msra.mxu1 %v15972_v54  ;;  %13822 = vmatprep.mubr.msk.f32.mxu1 %vm14192_vm1, %v14191_v20 }
 0x470   : > { %13820 = vmatprep.subr.mxu1 %v14191_v20  ;;  %v8950_v43 = vand.u32 4294901760, %v8949_v5 }
 0x471   : > { %13821 = vmatpush3.msra.mxu1 %v15975_v55 }
 0x472   : > { %13832 = vmatprep.subr.mxu1 %v14191_v20  ;;  %13788 = vmatmul.mubr.f32.vlgmr.msra.gmra.mxu0 %v8950_v43 }
 0x473   : > { %13798 = vmatpush3.msra.mxu0 %v15979_v60  ;;  %13823 = vmatmul.mubr.f32.vlgmr.msra.gmra.mxu1 %v8946_v10 }
 0x474   : > { %v8402_v63 = vpop.xlane.xlu1 %8401  ;;  %13833 = vmatpush3.msra.mxu1 %v9451_v18  ;;  %13799 = vmatprep.subr.mxu0 %v14191_v20 }
 0x475   : > { %14091 = vrcp.f32 %v8402_v63  ;;  %13834 = vmatprep.subr.mxu1 %v14191_v20  ;;  %13800 = vmatpush3.msra.mxu0 %v15984_v62 }
 0x476   : > { %13835 = vmatpush3.msra.mxu1 %v9458_v19  ;;  %13801 = vmatprep.mubr.msk.f32.mxu0 %vm14192_vm1, %v14191_v20 }
 0x477   : > { %13811 = vmatprep.subr.mxu0 %v14191_v20  ;;  %13802 = vmatmul.mubr.f32.vlgmr.msra.gmra.mxu0 %v8947_v7 }
 0x478   : > { %13812 = vmatpush3.msra.mxu0 %v8987_v2  ;;  %13815 = vmatprep.mubr.msk.f32.mxu0 %vm14192_vm1, %v14191_v20 }
 0x479   : > { %13813 = vmatprep.subr.mxu0 %v14191_v20  ;;  %13836 = vmatprep.mubr.msk.f32.mxu1 %vm14192_vm1, %v14191_v20 }
 0x47a   : > { %13814 = vmatpush3.msra.mxu0 %v8994_v51  ;;  %13846 = vmatprep.subr.mxu1 %v14191_v20 }
 0x47b   : > { %13825 = vmatprep.subr.mxu0 %v14191_v20  ;;  %13816 = vmatmul.mubr.f32.vlgmr.msra.gmra.mxu0 %v8946_v10 }
 0x47c   : > { %13826 = vmatpush3.msra.mxu0 %v16021_v50  ;;  %13829 = vmatprep.mubr.msk.f32.mxu0 %vm14192_vm1, %v14191_v20 }
 0x47d   : > { %13827 = vmatprep.subr.mxu0 %v14191_v20 }
 0x47e   : > { %13828 = vmatpush3.msra.mxu0 %v16028_v34 }
 0x47f   : > { %13839 = vmatprep.subr.mxu0 %v14191_v20 }
 0x482   : > { %v14092_v14 = vpop.eup %14091 }
 0x483   : > { %v8411_v22 = vmul.f32 %v14092_v14, %v15963_v13 }
 0x485   : > { %v9339_v17 = vsel %vm8369_vm3, %v8411_v22, 0 }
 0x486   : > { %v9408_v8 = vand.u32 4294901760, %v9339_v17 }
 0x488   : > { %v9409_v28 = vsub.f32 %v9339_v17, %v9408_v8  ;;  %13837 = vmatmul.mubr.f32.vlgmr.msra.gmra.mxu1 %v9408_v8 }
 0x489   : > { %13847 = vmatpush3.msra.mxu1 %v16021_v50  ;;  %13850 = vmatprep.mubr.msk.f32.mxu1 %vm14192_vm1, %v14191_v20 }
 0x48a   : > { %13848 = vmatprep.subr.mxu1 %v14191_v20  ;;  %v9410_v0 = vand.u32 4294901760, %v9409_v28 }
 0x48b   : > { %13849 = vmatpush3.msra.mxu1 %v16028_v34 }
 0x48c   : > { %13860 = vmatprep.subr.mxu1 %v14191_v20  ;;  %13851 = vmatmul.mubr.f32.vlgmr.msra.gmra.mxu1 %v9410_v0  ;;  %v9411_v25 = vsub.f32 %v9409_v28, %v9410_v0 }
 0x48d   : > { %13861 = vmatpush3.msra.mxu1 %v16021_v50  ;;  %13864 = vmatprep.mubr.msk.f32.mxu1 %vm14192_vm1, %v14191_v20 }
 0x48e   : > { %13862 = vmatprep.subr.mxu1 %v14191_v20  ;;  %v9412_v38 = vand.u32 4294901760, %v9411_v25 }
 0x48f   : > { %13863 = vmatpush3.msra.mxu1 %v16028_v34  ;;  %v16196_v34 = vand.u32 4294901760, %v10263_v4 }
 0x490   : > { %13874 = vmatprep.subr.mxu1 %v14191_v20  ;;  %13830 = vmatmul.mubr.f32.vlgmr.msra.gmra.mxu0 %v9412_v38 }
 0x491   : > { %13840 = vmatpush3.msra.mxu0 %v16037_v57  ;;  %13865 = vmatmul.mubr.f32.vlgmr.msra.gmra.mxu1 %v9408_v8  ;;  %v16199_v10 = vsub.f32 %v10263_v4, %v16196_v34 }
 0x492   : > { %v8405_v13 = vpop.xlane.xlu0 %8404  ;;  %13875 = vmatpush3.msra.mxu1 %v9913_v39  ;;  %13841 = vmatprep.subr.mxu0 %v14191_v20 }
 0x493   : > { %14093 = vrcp.f32 %v8405_v13  ;;  %13876 = vmatprep.subr.mxu1 %v14191_v20  ;;  %13842 = vmatpush3.msra.mxu0 %v16044_v9  ;;  %v10827_v15 = vand.u32 4294901760, %v16199_v10 }
 0x494   : > { %13877 = vmatpush3.msra.mxu1 %v9920_v29  ;;  %13843 = vmatprep.mubr.msk.f32.mxu0 %vm14192_vm1, %v14191_v20 }
 0x495   : > { %13853 = vmatprep.subr.mxu0 %v14191_v20  ;;  %13844 = vmatmul.mubr.f32.vlgmr.msra.gmra.mxu0 %v9409_v28  ;;  %v10828_v18 = vsub.f32 %v16199_v10, %v10827_v15 }
 0x496   : > { %13854 = vmatpush3.msra.mxu0 %v9449_v11  ;;  %13857 = vmatprep.mubr.msk.f32.mxu0 %vm14192_vm1, %v14191_v20 }
 0x497   : > { %13855 = vmatprep.subr.mxu0 %v14191_v20  ;;  %13878 = vmatprep.mubr.msk.f32.mxu1 %vm14192_vm1, %v14191_v20 }
 0x498   : > { %13856 = vmatpush3.msra.mxu0 %v9456_v23  ;;  %13888 = vmatprep.subr.mxu1 %v14191_v20 }
 0x499   : > { %13867 = vmatprep.subr.mxu0 %v14191_v20  ;;  %13858 = vmatmul.mubr.f32.vlgmr.msra.gmra.mxu0 %v9408_v8 }
 0x49a   : > { %13868 = vmatpush3.msra.mxu0 %v16091_v6  ;;  %13871 = vmatprep.mubr.msk.f32.mxu0 %vm14192_vm1, %v14191_v20 }
 0x49b   : > { %13869 = vmatprep.subr.mxu0 %v14191_v20 }
 0x49c   : > { %13870 = vmatpush3.msra.mxu0 %v16094_v16 }
 0x49d   : > { %13881 = vmatprep.subr.mxu0 %v14191_v20 }
 0x4a0   : > { %v14094_v41 = vpop.eup %14093 }
 0x4a1   : > { %v8413_v36 = vmul.f32 %v14094_v41, %v15967_v48  ;;  %v10262_v48 = vld [vmem:[%s16365_s4] sm:$0xff] }
 0x4a2   : > { %v10300_v58 = vand.u32 4294901760, %v10262_v48 }
 0x4a3   : > { %v9801_v31 = vsel %vm8369_vm3, %v8413_v36, 0 }
 0x4a4   : > { %v9870_v52 = vand.u32 4294901760, %v9801_v31  ;;  %v16166_v60 = vsub.f32 %v10262_v48, %v10300_v58 }
 0x4a6   : > { %v9871_v42 = vsub.f32 %v9801_v31, %v9870_v52  ;;  %13879 = vmatmul.mubr.f32.vlgmr.msra.gmra.mxu1 %v9870_v52  ;;  %v10378_v27 = vand.u32 4294901760, %v16166_v60 }
 0x4a7   : > { %13889 = vmatpush3.msra.mxu1 %v16091_v6  ;;  %13892 = vmatprep.mubr.msk.f32.mxu1 %vm14192_vm1, %v14191_v20 }
 0x4a8   : > { %13890 = vmatprep.subr.mxu1 %v14191_v20  ;;  %v9872_v54 = vand.u32 4294901760, %v9871_v42  ;;  %v10379_v62 = vsub.f32 %v16166_v60, %v10378_v27 }
 0x4a9   : > { %13891 = vmatpush3.msra.mxu1 %v16094_v16 }
 0x4aa   : > { %13902 = vmatprep.subr.mxu1 %v14191_v20  ;;  %13893 = vmatmul.mubr.f32.vlgmr.msra.gmra.mxu1 %v9872_v54  ;;  %v9873_v44 = vsub.f32 %v9871_v42, %v9872_v54  ;;  %v10380_v47 = vand.u32 4294901760, %v10379_v62 }
 0x4ab   : > { %13903 = vmatpush3.msra.mxu1 %v16091_v6  ;;  %13906 = vmatprep.mubr.msk.f32.mxu1 %vm14192_vm1, %v14191_v20 }
 0x4ac   : > { %13904 = vmatprep.subr.mxu1 %v14191_v20  ;;  %v9874_v55 = vand.u32 4294901760, %v9873_v44 }
 0x4ad   : > { %13905 = vmatpush3.msra.mxu1 %v16094_v16  ;;  %v10829_v16 = vand.u32 4294901760, %v10828_v18 }
 0x4ae   : > { %13872 = vmatmul.mubr.f32.vlgmr.msra.gmra.mxu0 %v9874_v55  ;;  %13907 = vmatmul.mubr.f32.vlgmr.msra.gmra.mxu1 %v9870_v52 }
 0x4af   : > { %13882 = vmatpush3.msra.mxu0 %v16099_v24  ;;  %13885 = vmatprep.mubr.msk.f32.mxu0 %vm14192_vm1, %v14191_v20 }
 0x4b0   : > { %13883 = vmatprep.subr.mxu0 %v14191_v20  ;;  %13914 = vmatprep.subr.mxu1 %v14191_v20 }
 0x4b1   : > { %13884 = vmatpush3.msra.mxu0 %v16104_v1  ;;  %13916 = vmatprep.mubr.msk.f32.mxu1 %vm14192_vm1, %v14191_v20 }
 0x4b2   : > { %13895 = vmatprep.subr.mxu0 %v14191_v20  ;;  %13886 = vmatmul.mubr.f32.vlgmr.msra.gmra.mxu0 %v9871_v42 }
 0x4b3   : > { %13896 = vmatpush3.msra.mxu0 %v9911_v26  ;;  %13899 = vmatprep.mubr.msk.f32.mxu0 %vm14192_vm1, %v14191_v20  ;;  %v10264_v26 = vld [vmem:[%s16365_s4 + $0x10] sm:$0xff] }
 0x4b4   : > { %13897 = vmatprep.subr.mxu0 %v14191_v20  ;;  %13915 = vmatpush3.msra.mxu1 %v10380_v47  ;;  %v16227_v3 = vand.u32 4294901760, %v10264_v26 }
 0x4b5   : > { %13898 = vmatpush3.msra.mxu0 %v9918_v30  ;;  %13924 = vmatprep.subr.mxu1 %v14191_v20 }
 0x4b6   : > { %13900 = vmatmul.mubr.f32.vlgmr.msra.gmra.mxu0 %v9870_v52  ;;  %13909 = vmatprep.subr.mxu0 %v14191_v20  ;;  %v16234_v13 = vsub.f32 %v10264_v26, %v16227_v3 }
 0x4b7   : > { %13910 = vmatpush3.msra.mxu0 %v10300_v58  ;;  %13911 = vmatprep.mubr.msk.f32.mxu0 %vm14192_vm1, %v14191_v20 }
 0x4b8   : > { %13919 = vmatprep.subr.mxu0 %v14191_v20  ;;  %v11276_v31 = vand.u32 4294901760, %v16234_v13 }
 0x4ba   : > { %v11277_v54 = vsub.f32 %v16234_v13, %v11276_v31 }
 0x512   : > { %v8571_v2 = vpop.f32.mrf.mxu1 }
 0x514   : > { %v13754_v21 = vpop.f32.mrf.mxu1 }
 0x516   : > { %v8722_v51 = vpop.f32.mrf.mxu1 }
 0x518   : > { %v13768_v61 = vpop.f32.mrf.mxu1 }
 0x51a   : > { %v8490_v12 = vpop.f32.mrf.mxu0 }
 0x51b   : > { %v8872_v46 = vpop.f32.mrf.mxu1  ;;  %v8572_v56 = vadd.f32 %v8571_v2, %v8490_v12  ;;  %v10265_v12 = vld [vmem:[%s16365_s4 + $0x18] sm:$0xff] }
 0x51c   : > { %v13747_v35 = vpop.f32.mrf.mxu0 }
 0x51d   : > { %v13782_v59 = vpop.f32.mrf.mxu1 }
 0x51f   : > { %v8647_v45 = vpop.f32.mrf.mxu0 }
 0x520   : > { %v8648_v50 = vadd.f32 %v8647_v45, %v8572_v56  ;;  %v16268_v56 = vand.u32 4294901760, %v10265_v12 }
 0x521   : > { %v13761_v49 = vpop.f32.mrf.mxu0 }
 0x522   : > { %v8723_v40 = vadd.f32 %v8722_v51, %v8648_v50 }
 0x523   : > { %v8799_v57 = vpop.f32.mrf.mxu0 }
 0x524   : > { %v8800_v53 = vadd.f32 %v8799_v57, %v8723_v40 }
 0x525   : > { %v13775_v9 = vpop.f32.mrf.mxu0 }
 0x526   : > { %v8873_v11 = vadd.f32 %v8872_v46, %v8800_v53 }
 0x528   : > { %v10267_v7 = vsel %vm6496_vm2, %v8873_v11, 0 }
 0x529   : > { %v10335_v23 = vand.u32 4294901760, %v10267_v7 }
 0x52a   : > { %v9033_v32 = vpop.f32.mrf.mxu1 }
 0x52b   : > { %v10336_v5 = vsub.f32 %v10267_v7, %v10335_v23  ;;  %13917 = vmatmul.mubr.f32.vlgmr.msra.gmra.mxu1 %v10335_v23 }
 0x52c   : > { %v13796_v37 = vpop.f32.mrf.mxu1  ;;  %13925 = vmatpush3.msra.mxu1 %v10300_v58  ;;  %13926 = vmatprep.mubr.msk.f32.mxu1 %vm14192_vm1, %v14191_v20 }
 0x52d   : > { %v10337_v43 = vand.u32 4294901760, %v10336_v5  ;;  %13934 = vmatprep.subr.mxu1 %v14191_v20 }
 0x52e   : > { %v9184_v63 = vpop.f32.mrf.mxu1 }
 0x52f   : > { %v10338_v19 = vsub.f32 %v10336_v5, %v10337_v43  ;;  %13927 = vmatmul.mubr.f32.vlgmr.msra.gmra.mxu1 %v10337_v43 }
 0x530   : > { %v13810_v6 = vpop.f32.mrf.mxu1  ;;  %13935 = vmatpush3.msra.mxu1 %v10300_v58  ;;  %13936 = vmatprep.mubr.msk.f32.mxu1 %vm14192_vm1, %v14191_v20  ;;  %v11278_v58 = vand.u32 4294901760, %v11277_v54 }
 0x531   : > { %v10339_v14 = vand.u32 4294901760, %v10338_v19  ;;  %13944 = vmatprep.subr.mxu1 %v14191_v20 }
 0x532   : > { %v8952_v22 = vpop.f32.mrf.mxu0 }
 0x533   : > { %v9334_v24 = vpop.f32.mrf.mxu1  ;;  %13912 = vmatmul.mubr.f32.vlgmr.msra.gmra.mxu0 %v10339_v14  ;;  %13937 = vmatmul.mubr.f32.vlgmr.msra.gmra.mxu1 %v10335_v23  ;;  %v9034_v8 = vadd.f32 %v9033_v32, %v8952_v22 }
 0x534   : > { %v13789_v17 = vpop.f32.mrf.mxu0  ;;  %13920 = vmatpush3.msra.mxu0 %v16166_v60  ;;  %13921 = vmatprep.mubr.msk.f32.mxu0 %vm14192_vm1, %v14191_v20 }
 0x535   : > { %v13824_v1 = vpop.f32.mrf.mxu1  ;;  %13929 = vmatprep.subr.mxu0 %v14191_v20  ;;  %13945 = vmatpush3.msra.mxu1 %v10829_v16 }
 0x536   : > { %13946 = vmatprep.mubr.msk.f32.mxu1 %vm14192_vm1, %v14191_v20  ;;  %13954 = vmatprep.subr.mxu1 %v14191_v20 }
 0x537   : > { %v9109_v28 = vpop.f32.mrf.mxu0  ;;  %13922 = vmatmul.mubr.f32.vlgmr.msra.gmra.mxu0 %v10336_v5 }
 0x538   : > { %v9110_v30 = vadd.f32 %v9109_v28, %v9034_v8  ;;  %13930 = vmatpush3.msra.mxu0 %v10378_v27  ;;  %13931 = vmatprep.mubr.msk.f32.mxu0 %vm14192_vm1, %v14191_v20 }
 0x539   : > { %v13803_v0 = vpop.f32.mrf.mxu0  ;;  %13939 = vmatprep.subr.mxu0 %v14191_v20 }
 0x53a   : > { %v9185_v25 = vadd.f32 %v9184_v63, %v9110_v30 }
 0x53b   : > { %v9261_v33 = vpop.f32.mrf.mxu0  ;;  %13932 = vmatmul.mubr.f32.vlgmr.msra.gmra.mxu0 %v10335_v23 }
 0x53c   : > { %v9262_v38 = vadd.f32 %v9261_v33, %v9185_v25  ;;  %13940 = vmatpush3.msra.mxu0 %v16196_v34  ;;  %13941 = vmatprep.mubr.msk.f32.mxu0 %vm14192_vm1, %v14191_v20 }
 0x53d   : > { %v13817_v39 = vpop.f32.mrf.mxu0  ;;  %13949 = vmatprep.subr.mxu0 %v14191_v20 }
 0x53e   : > { %v9335_v29 = vadd.f32 %v9334_v24, %v9262_v38 }
 0x540   : > { %v10716_v41 = vsel %vm6496_vm2, %v9335_v29, 0 }
 0x541   : > { %v10784_v36 = vand.u32 4294901760, %v10716_v41 }
 0x543   : > { %v10785_v52 = vsub.f32 %v10716_v41, %v10784_v36  ;;  %13947 = vmatmul.mubr.f32.vlgmr.msra.gmra.mxu1 %v10784_v36 }
 0x544   : > { %13955 = vmatpush3.msra.mxu1 %v16196_v34  ;;  %13956 = vmatprep.mubr.msk.f32.mxu1 %vm14192_vm1, %v14191_v20 }
 0x545   : > { %v10786_v42 = vand.u32 4294901760, %v10785_v52  ;;  %13964 = vmatprep.subr.mxu1 %v14191_v20 }
 0x547   : > { %v10787_v44 = vsub.f32 %v10785_v52, %v10786_v42  ;;  %13957 = vmatmul.mubr.f32.vlgmr.msra.gmra.mxu1 %v10786_v42 }
 0x548   : > { %v9495_v48 = vpop.f32.mrf.mxu1  ;;  %13965 = vmatpush3.msra.mxu1 %v16196_v34  ;;  %13966 = vmatprep.mubr.msk.f32.mxu1 %vm14192_vm1, %v14191_v20  ;;  %v16271_v34 = vsub.f32 %v10265_v12, %v16268_v56 }
 0x549   : > { %v10788_v55 = vand.u32 4294901760, %v10787_v44  ;;  %13974 = vmatprep.subr.mxu1 %v14191_v20 }
 0x54a   : > { %v13838_v60 = vpop.f32.mrf.mxu1  ;;  %v11725_v9 = vand.u32 4294901760, %v16271_v34 }
 0x54b   : > { %13942 = vmatmul.mubr.f32.vlgmr.msra.gmra.mxu0 %v10788_v55  ;;  %13967 = vmatmul.mubr.f32.vlgmr.msra.gmra.mxu1 %v10784_v36 }
 0x54c   : > { %v9646_v27 = vpop.f32.mrf.mxu1  ;;  %13950 = vmatpush3.msra.mxu0 %v16199_v10  ;;  %13951 = vmatprep.mubr.msk.f32.mxu0 %vm14192_vm1, %v14191_v20  ;;  %v11726_v7 = vsub.f32 %v16271_v34, %v11725_v9 }
 0x54d   : > { %13959 = vmatprep.subr.mxu0 %v14191_v20  ;;  %13975 = vmatpush3.msra.mxu1 %v11278_v58 }
 0x54e   : > { %v13852_v62 = vpop.f32.mrf.mxu1  ;;  %13976 = vmatprep.mubr.msk.f32.mxu1 %vm14192_vm1, %v14191_v20  ;;  %13984 = vmatprep.subr.mxu1 %v14191_v20  ;;  %v11727_v5 = vand.u32 4294901760, %v11726_v7 }
 0x54f   : > { %13952 = vmatmul.mubr.f32.vlgmr.msra.gmra.mxu0 %v10785_v52 }
 0x550   : > { %v9414_v47 = vpop.f32.mrf.mxu0  ;;  %13960 = vmatpush3.msra.mxu0 %v10827_v15  ;;  %13961 = vmatprep.mubr.msk.f32.mxu0 %vm14192_vm1, %v14191_v20 }
 0x551   : > { %v9796_v2 = vpop.f32.mrf.mxu1  ;;  %13969 = vmatprep.subr.mxu0 %v14191_v20  ;;  %v9496_v61 = vadd.f32 %v9495_v48, %v9414_v47 }
 0x552   : > { %v13831_v21 = vpop.f32.mrf.mxu0 }
 0x553   : > { %v13866_v51 = vpop.f32.mrf.mxu1  ;;  %13962 = vmatmul.mubr.f32.vlgmr.msra.gmra.mxu0 %v10784_v36 }
 0x554   : > { %13970 = vmatpush3.msra.mxu0 %v16227_v3  ;;  %13971 = vmatprep.mubr.msk.f32.mxu0 %vm14192_vm1, %v14191_v20 }
 0x555   : > { %v9571_v46 = vpop.f32.mrf.mxu0  ;;  %13979 = vmatprep.subr.mxu0 %v14191_v20 }
 0x556   : > { %v9572_v35 = vadd.f32 %v9571_v46, %v9496_v61 }
 0x557   : > { %v13845_v59 = vpop.f32.mrf.mxu0 }
 0x558   : > { %v9647_v4 = vadd.f32 %v9646_v27, %v9572_v35 }
 0x559   : > { %v9723_v45 = vpop.f32.mrf.mxu0 }
 0x55a   : > { %v9724_v50 = vadd.f32 %v9723_v45, %v9647_v4 }
 0x55b   : > { %v13859_v49 = vpop.f32.mrf.mxu0 }
 0x55c   : > { %v9797_v40 = vadd.f32 %v9796_v2, %v9724_v50 }
 0x55e   : > { %v11165_v57 = vsel %vm6496_vm2, %v9797_v40, 0 }
 0x55f   : > { %v11233_v53 = vand.u32 4294901760, %v11165_v57 }
 0x561   : > { %v11234_v10 = vsub.f32 %v11165_v57, %v11233_v53  ;;  %13977 = vmatmul.mubr.f32.vlgmr.msra.gmra.mxu1 %v11233_v53 }
 0x562   : > { %13985 = vmatpush3.msra.mxu1 %v16227_v3  ;;  %13986 = vmatprep.mubr.msk.f32.mxu1 %vm14192_vm1, %v14191_v20 }
 0x563   : > { %v11235_v11 = vand.u32 4294901760, %v11234_v10  ;;  %13994 = vmatprep.subr.mxu1 %v14191_v20 }
 0x565   : > { %v11236_v23 = vsub.f32 %v11234_v10, %v11235_v11  ;;  %13987 = vmatmul.mubr.f32.vlgmr.msra.gmra.mxu1 %v11235_v11 }
 0x566   : > { %v9957_v15 = vpop.f32.mrf.mxu1  ;;  %13995 = vmatpush3.msra.mxu1 %v16227_v3  ;;  %13996 = vmatprep.mubr.msk.f32.mxu1 %vm14192_vm1, %v14191_v20 }
 0x567   : > { %v11237_v32 = vand.u32 4294901760, %v11236_v23  ;;  %14004 = vmatprep.subr.mxu1 %v14191_v20 }
 0x568   : > { %v13880_v37 = vpop.f32.mrf.mxu1 }
 0x569   : > { %13972 = vmatmul.mubr.f32.vlgmr.msra.gmra.mxu0 %v11237_v32  ;;  %13997 = vmatmul.mubr.f32.vlgmr.msra.gmra.mxu1 %v11233_v53 }
 0x56a   : > { %v10108_v43 = vpop.f32.mrf.mxu1  ;;  %13980 = vmatpush3.msra.mxu0 %v16234_v13  ;;  %13981 = vmatprep.mubr.msk.f32.mxu0 %vm14192_vm1, %v14191_v20 }
 0x56b   : > { %13989 = vmatprep.subr.mxu0 %v14191_v20  ;;  %14005 = vmatpush3.msra.mxu1 %v11727_v5 }
 0x56c   : > { %v13894_v18 = vpop.f32.mrf.mxu1  ;;  %14006 = vmatprep.mubr.msk.f32.mxu1 %vm14192_vm1, %v14191_v20  ;;  %14014 = vmatprep.subr.mxu1 %v14191_v20 }
 0x56d   : > { %13982 = vmatmul.mubr.f32.vlgmr.msra.gmra.mxu0 %v11234_v10 }
 0x56e   : > { %v9876_v63 = vpop.f32.mrf.mxu0  ;;  %v10258_v19 = vpop.f32.mrf.mxu1  ;;  %13990 = vmatpush3.msra.mxu0 %v11276_v31  ;;  %13991 = vmatprep.mubr.msk.f32.mxu0 %vm14192_vm1, %v14191_v20 }
 0x56f   : > { %13999 = vmatprep.subr.mxu0 %v14191_v20  ;;  %v9958_v16 = vadd.f32 %v9957_v15, %v9876_v63 }
 0x570   : > { %v13873_v6 = vpop.f32.mrf.mxu0  ;;  %v13908_v14 = vpop.f32.mrf.mxu1 }
 0x571   : > { %13992 = vmatmul.mubr.f32.vlgmr.msra.gmra.mxu0 %v11233_v53 }
 0x572   : > { %v10033_v22 = vpop.f32.mrf.mxu0  ;;  %14000 = vmatpush3.msra.mxu0 %v16268_v56  ;;  %14001 = vmatprep.mubr.msk.f32.mxu0 %vm14192_vm1, %v14191_v20 }
 0x573   : > { %v10034_v24 = vadd.f32 %v10033_v22, %v9958_v16  ;;  %14009 = vmatprep.subr.mxu0 %v14191_v20 }
 0x574   : > { %v13887_v17 = vpop.f32.mrf.mxu0 }
 0x575   : > { %v10109_v1 = vadd.f32 %v10108_v43, %v10034_v24 }
 0x576   : > { %v10185_v8 = vpop.f32.mrf.mxu0 }
 0x577   : > { %v10186_v26 = vadd.f32 %v10185_v8, %v10109_v1 }
 0x578   : > { %v13901_v28 = vpop.f32.mrf.mxu0 }
 0x579   : > { %v10259_v30 = vadd.f32 %v10258_v19, %v10186_v26 }
 0x57b   : > { %v11614_v0 = vsel %vm6496_vm2, %v10259_v30, 0 }
 0x57c   : > { %v11682_v3 = vand.u32 4294901760, %v11614_v0 }
 0x57e   : > { %v11683_v25 = vsub.f32 %v11614_v0, %v11682_v3  ;;  %14007 = vmatmul.mubr.f32.vlgmr.msra.gmra.mxu1 %v11682_v3 }
 0x57f   : > { %14015 = vmatpush3.msra.mxu1 %v16268_v56  ;;  %14016 = vmatprep.mubr.msk.f32.mxu1 %vm14192_vm1, %v14191_v20 }
 0x580   : > { %v11684_v33 = vand.u32 4294901760, %v11683_v25  ;;  %14024 = vmatprep.subr.mxu1 %v14191_v20 }
 0x582   : > { %v11685_v38 = vsub.f32 %v11683_v25, %v11684_v33  ;;  %14017 = vmatmul.mubr.f32.vlgmr.msra.gmra.mxu1 %v11684_v33 }
 0x583   : > { %14025 = vmatpush3.msra.mxu1 %v16268_v56  ;;  %14026 = vmatprep.mubr.msk.f32.mxu1 %vm14192_vm1, %v14191_v20 }
 0x584   : > { %v11686_v39 = vand.u32 4294901760, %v11685_v38 }
 0x586   : > { %14002 = vmatmul.mubr.f32.vlgmr.msra.gmra.mxu0 %v11686_v39  ;;  %14027 = vmatmul.mubr.f32.vlgmr.msra.gmra.mxu1 %v11682_v3 }
 0x587   : > { %14010 = vmatpush3.msra.mxu0 %v16271_v34  ;;  %14011 = vmatprep.mubr.msk.f32.mxu0 %vm14192_vm1, %v14191_v20 }
 0x588   : > { %14019 = vmatprep.subr.mxu0 %v14191_v20 }
 0x58a   : > { %14012 = vmatmul.mubr.f32.vlgmr.msra.gmra.mxu0 %v11683_v25 }
 0x58b   : > { %14020 = vmatpush3.msra.mxu0 %v11725_v9  ;;  %14021 = vmatprep.mubr.msk.f32.mxu0 %vm14192_vm1, %v14191_v20 }
 0x58e   : > { %14022 = vmatmul.mubr.f32.vlgmr.msra.gmra.mxu0 %v11682_v3 }
 0x5eb   : > { %v10417_v13 = vpop.f32.mrf.mxu1 }
 0x5ed   : > { %v13918_v29 = vpop.f32.mrf.mxu1 }
 0x5ef   : > { %v10565_v41 = vpop.f32.mrf.mxu1 }
 0x5f1   : > { %v13928_v36 = vpop.f32.mrf.mxu1 }
 0x5f3   : > { %v10341_v31 = vpop.f32.mrf.mxu0  ;;  %v10711_v52 = vpop.f32.mrf.mxu1 }
 0x5f4   : > { %v10418_v42 = vadd.f32 %v10417_v13, %v10341_v31 }
 0x5f5   : > { %v13913_v54 = vpop.f32.mrf.mxu0  ;;  %v13938_v44 = vpop.f32.mrf.mxu1 }
 0x5f7   : > { %v10491_v48 = vpop.f32.mrf.mxu0 }
 0x5f8   : > { %v10492_v55 = vadd.f32 %v10491_v48, %v10418_v42 }
 0x5f9   : > { %v13923_v58 = vpop.f32.mrf.mxu0 }
 0x5fa   : > { %v10566_v60 = vadd.f32 %v10565_v41, %v10492_v55  ;;  %v14095_v58 = vld [vmem:[%s14328_s15] sm:$0xff] }
 0x5fb   : > { %v10639_v27 = vpop.f32.mrf.mxu0 }
 0x5fc   : > { %v10640_v62 = vadd.f32 %v10639_v27, %v10566_v60 }
 0x5fd   : > { %v13933_v47 = vpop.f32.mrf.mxu0 }
 0x5fe   : > { %v10712_v2 = vadd.f32 %v10711_v52, %v10640_v62 }
 0x600   : > { %v12062_v9 = vsel %vm266_vm0, %v10712_v2, 0.0 }
 0x603   : > { %v10866_v21 = vpop.f32.mrf.mxu1 }
 0x605   : > { %v13948_v20 = vpop.f32.mrf.mxu1 }
 0x607   : > { %v11014_v51 = vpop.f32.mrf.mxu1 }
 0x609   : > { %v13958_v61 = vpop.f32.mrf.mxu1 }
 0x60b   : > { %v10790_v12 = vpop.f32.mrf.mxu0  ;;  %v11160_v46 = vpop.f32.mrf.mxu1 }
 0x60c   : > { %v10867_v56 = vadd.f32 %v10866_v21, %v10790_v12 }
 0x60d   : > { %v13943_v35 = vpop.f32.mrf.mxu0  ;;  %v13968_v59 = vpop.f32.mrf.mxu1 }
 0x60f   : > { %v10940_v4 = vpop.f32.mrf.mxu0 }
 0x610   : > { %v10941_v45 = vadd.f32 %v10940_v4, %v10867_v56 }
 0x611   : > { %v13953_v50 = vpop.f32.mrf.mxu0 }
 0x612   : > { %v11015_v49 = vadd.f32 %v11014_v51, %v10941_v45 }
 0x613   : > { %v11088_v34 = vpop.f32.mrf.mxu0 }
 0x614   : > { %v11089_v40 = vadd.f32 %v11088_v34, %v11015_v49 }
 0x615   : > { %v13963_v57 = vpop.f32.mrf.mxu0 }
 0x616   : > { %v11161_v53 = vadd.f32 %v11160_v46, %v11089_v40 }
 0x618   : > { %v12063_v10 = vsel %vm266_vm0, %v11161_v53, 0.0 }
 0x619   : > { %v12064_v11 = vadd.f32 %v12063_v10, %v12062_v9 }
 0x621   : > { %v11315_v7 = vpop.f32.mrf.mxu1 }
 0x623   : > { %v13978_v23 = vpop.f32.mrf.mxu1 }
 0x625   : > { %v11463_v15 = vpop.f32.mrf.mxu1 }
 0x627   : > { %v13988_v32 = vpop.f32.mrf.mxu1 }
 0x629   : > { %v11239_v5 = vpop.f32.mrf.mxu0  ;;  %v11609_v37 = vpop.f32.mrf.mxu1 }
 0x62a   : > { %v11316_v16 = vadd.f32 %v11315_v7, %v11239_v5 }
 0x62b   : > { %v13973_v43 = vpop.f32.mrf.mxu0  ;;  %v13998_v18 = vpop.f32.mrf.mxu1 }
 0x62d   : > { %v11389_v63 = vpop.f32.mrf.mxu0 }
 0x62e   : > { %v11390_v24 = vadd.f32 %v11389_v63, %v11316_v16 }
 0x62f   : > { %v13983_v19 = vpop.f32.mrf.mxu0 }
 0x630   : > { %v11464_v8 = vadd.f32 %v11463_v15, %v11390_v24 }
 0x631   : > { %v11537_v6 = vpop.f32.mrf.mxu0 }
 0x632   : > { %v11538_v0 = vadd.f32 %v11537_v6, %v11464_v8 }
 0x633   : > { %v13993_v14 = vpop.f32.mrf.mxu0 }
 0x634   : > { %v11610_v39 = vadd.f32 %v11609_v37, %v11538_v0 }
 0x636   : > { %v12065_v31 = vsel %vm266_vm0, %v11610_v39, 0.0 }
 0x637   : > { %v12066_v44 = vadd.f32 %v12065_v31, %v12064_v11 }
 0x63e   : > { %v11764_v22 = vpop.f32.mrf.mxu1 }
 0x640   : > { %v14008_v17 = vpop.f32.mrf.mxu1 }
 0x642   : > { %v11912_v1 = vpop.f32.mrf.mxu1 }
 0x644   : > { %v14018_v26 = vpop.f32.mrf.mxu1 }
 0x646   : > { %v11688_v28 = vpop.f32.mrf.mxu0  ;;  %v12058_v30 = vpop.f32.mrf.mxu1 }
 0x647   : > { %v11765_v33 = vadd.f32 %v11764_v22, %v11688_v28 }
 0x648   : > { %v14003_v3 = vpop.f32.mrf.mxu0  ;;  %v14028_v25 = vpop.f32.mrf.mxu1 }
 0x64a   : > { %v11838_v38 = vpop.f32.mrf.mxu0 }
 0x64b   : > { %v11839_v13 = vadd.f32 %v11838_v38, %v11765_v33 }
 0x64c   : > { %v14013_v29 = vpop.f32.mrf.mxu0 }
 0x64d   : > { %v11913_v41 = vadd.f32 %v11912_v1, %v11839_v13 }
 0x64e   : > { %v11986_v36 = vpop.f32.mrf.mxu0 }
 0x64f   : > { %v11987_v52 = vadd.f32 %v11986_v36, %v11913_v41 }
 0x650   : > { %v14023_v42 = vpop.f32.mrf.mxu0 }
 0x651   : > { %v12059_v54 = vadd.f32 %v12058_v30, %v11987_v52 }
 0x653   : > { %v12067_v48 = vsel %vm266_vm0, %v12059_v54, 0.0 }
 0x654   : > { %v12068_v55 = vadd.f32 %v12067_v48, %v12066_v44 }
 0x656   : > { %v12069_v60 = vadd.f32 %v14095_v58, %v12068_v55 }
 0x658   : > { %12070 = vst.msk [vmem:[%s255_s28] sm:$0xff] %vm266_vm0, %v12069_v60 }
 0x659   : > { %14137 = shalt.err (!%p14134_p2)
}
 0x65a   : > { %s14138_s15 = scalar_lea.hbm %s12083_s10, 128  ;;  %s14142_s16 = scalar_lea.hbm %s16366_s5, 256 }
 0x65b   : > { %p14139_p4 = scmp.ne.s32.totalorder %s12083_s10, %s14138_s15  ;;  %p14143_p0 = scmp.lt.s32.totalorder %s12083_s10, %s16366_s5 }
 0x65c   : > { %p14144_p6 = scmp.lt.s32.totalorder %s14142_s16, %s14138_s15 }
 0x65d   : > { %p14140_p9 = pnand %p14139_p4, %p16377_p13 }
 0x65e   : > { %p14145_p11 = por %p14144_p6, %p14143_p0 }
 0x65f   : > { %p14141_p7 = pneg %p14140_p9 }
 0x661   : > { %p14146_p12 = pnand %p14145_p11, %p14141_p7 }
 0x663   : > { %14149 = shalt.err (!%p14146_p12)
}
 0x664   : > { %14031 = dma.vmem_to_hbm [thread:$0]  (%p16377_p13), %s12086_s8, 128, %s12083_s10, %s12072_s11  }
 0x665 PF: > { %s12097_s26 = sand.u32 1, %s14176_s18   ;;  %p16378_p1 = scmp.ne.s32.totalorder %s16372_s6, 0 }
 0x666   : > { %p16379_p3 = scmp.ge.s32.totalorder %s14188_s21, 2  ;;  %s12098_s28 = scalar_lea.sflag [#allocation4], %s12097_s26 }
 0x668   : > { %p14038_p5 = pnand %p16379_p3, %p16378_p1 }
 0x66a   : > { %p14039_p8 = pneg %p14038_p5 }
 0x66c   : > { %14171 = dma.done.wait (%p14039_p8), %s12098_s28, 128  }
 0x66d   : > { %14173 = vsyncadd (%p14039_p8), %s12098_s28, 4294967168  ;;  %p18_p10 = scmp.ge.s32.totalorder %s14249_s24, 4   ;;  %s16380_s18 = smov %s14180_s19 }
 0x66e   : > { %s16381_s19 = smov %s14184_s20  ;;  %s16382_s20 = smov %s14261_s27 }
 0x66f   : > { %s16383_s21 = smov %s14249_s24  ;;  %20 = sbr.rel (!%p18_p10) target bundleno = 5 (0x5), region = 88 }
 0x674   :  { %12103 = vsyncpa [#allocation3], 1 }
 0x675   :  { %12105 = vsyncpa [#allocation3 + $0x1], 1 }
 0x676   :  { %12106 = vsyncpa [#allocation4], 1 }
 0x677   :  { %12108 = vsyncpa [#allocation4 + $0x1], 1 }

</bundles_post_ra>
